<compile_context>
chip_gen: v7x
topology: tpu7x:2x2x1
jax: 0.10.0
libtpu: 0.0.40
codegen_flags: <defaults>
</compile_context>

<pallas_src>
import numpy as np
import jax
import jax.numpy as jnp
from jax.experimental import pallas as pl
from jax.experimental.pallas import tpu as pltpu

NEG_SLOPE = 0.1
C_CONV = 32          # conv1/conv2 output channels
D1, D2 = 128, 64     # linear1 / linear2 widths


def _lrelu(x):
    return jnp.where(x >= 0.0, x, NEG_SLOPE * x)


# ---------------------------------------------------------------------------
# In-kernel building blocks
# ---------------------------------------------------------------------------
def _zero_halo(pad, Hc, Wc, Cc):
    """Zero the 1-wide border of a (Hc+2, Wc+2, Cc) padded scratch (interior is
    fully overwritten each image, so only the halo strips need clearing)."""
    z_row = jnp.zeros((1, Wc + 2, Cc), pad.dtype)
    z_col = jnp.zeros((Hc + 2, 1, Cc), pad.dtype)
    pad[pl.ds(0, 1), :, :] = z_row                      # top
    pad[pl.ds(Hc + 1, 1), :, :] = z_row                 # bottom
    pad[:, pl.ds(0, 1), :] = z_col                      # left  (corners twice: harmless)
    pad[:, pl.ds(Wc + 1, 1), :] = z_col                 # right


def _conv3x3_im2col(pad_ref, w_ref, b_ref, Hc, Wc, Cin):
    """3x3 'same' conv as ONE im2col matmul: (Hc*Wc, 9*Cin) @ (9*Cin, Cout)."""
    taps = []
    for dy in range(3):                                  # static unroll (9 taps)
        for dx in range(3):
            taps.append(
                pad_ref[pl.ds(dy, Hc), pl.ds(dx, Wc), :].reshape(Hc * Wc, Cin))
    patch = jnp.concatenate(taps, axis=1).astype(jnp.bfloat16)   # (Hc*Wc, 9*Cin)
    y = jnp.dot(patch, w_ref[...], preferred_element_type=jnp.float32)
    return _lrelu(y + b_ref[...])                        # bias once, f32 lrelu


def _maxpool2(y, rmax_ref, Hc, Wc, C):
    """2x2/2 max-pool of a (Hc*Wc, C) conv output -> (Hc//2 * Wc//2, C), HWC order.
    Row pairs are reduced in registers; the column-pair compaction goes through a
    small scratch so the stride-2 gather is a strided ref load."""
    v = y.reshape(Hc // 2, 2, Wc, C)
    rmax_ref[...] = jnp.maximum(v[:, 0], v[:, 1]).reshape((Hc // 2) * Wc, C)
    n = (Hc // 2) * (Wc // 2)
    return jnp.maximum(rmax_ref[pl.ds(0, n, 2), :], rmax_ref[pl.ds(1, n, 2), :])


# ---------------------------------------------------------------------------
# Single fused kernel: conv1 + pool + conv2 + pool + MLP head + sigmoid
# ---------------------------------------------------------------------------
def _disc_kernel(emb_ref, x_ref, w1c_ref, b1c_ref, w2c_ref, b2c_ref,
                 wf_ref, we_ref, b1_ref, w2_ref, b2_ref, w3_ref, b3_ref,
                 o_ref, pad1, pad2, rs1, rs2):
    b = pl.program_id(0)
    _, H, W, Cin = x_ref.shape
    C = C_CONV
    H2, W2 = H // 2, W // 2
    H4, W4 = H // 4, W // 4
    P2 = H4 * W4

    # ---- conv1 (3x3 'same') + LeakyReLU, in-kernel zero-padding ----------------
    _zero_halo(pad1, H, W, Cin)
    pad1[pl.ds(1, H), pl.ds(1, W), :] = x_ref[0]
    y1 = _conv3x3_im2col(pad1, w1c_ref, b1c_ref, H, W, Cin)          # (H*W, C) f32

    # ---- maxpool 2x2 #1 ---------------------------------------------------------
    p1 = _maxpool2(y1, rs1, H, W, C)                                  # (H2*W2, C)

    # ---- conv2 (3x3 'same') + LeakyReLU -----------------------------------------
    _zero_halo(pad2, H2, W2, C)
    pad2[pl.ds(1, H2), pl.ds(1, W2), :] = p1.reshape(H2, W2, C)
    y2 = _conv3x3_im2col(pad2, w2c_ref, b2c_ref, H2, W2, C)          # (H2*W2, C)

    # ---- maxpool 2x2 #2 + flatten into ONE lane-dense feature row ---------------
    fe = _maxpool2(y2, rs2, H2, W2, C)                                # (P2, C), HWC
    feat_row = jnp.concatenate([fe[i:i + 1, :] for i in range(P2)], axis=1)  # (1, F)

    # ---- linear1: single (1, F)@(F, D1) + label-embedding contribution ----------
    h1 = jnp.dot(feat_row.astype(jnp.bfloat16), wf_ref[...],
                 preferred_element_type=jnp.float32)                  # (1, D1) f32
    wemb = we_ref[...].astype(jnp.float32)                            # (2, D1)
    h1 = h1 + emb_ref[b, 0] * wemb[0:1, :] + emb_ref[b, 1] * wemb[1:2, :]
    h1 = _lrelu(h1 + b1_ref[...])

    # ---- linear2 + lrelu, linear3 + sigmoid --------------------------------------
    h2 = _lrelu(jnp.dot(h1.astype(jnp.bfloat16), w2_ref[...],
                        preferred_element_type=jnp.float32) + b2_ref[...])
    z = jnp.sum(h2 * w3_ref[...], axis=1, keepdims=True) + b3_ref[...]
    o_ref[...] = (1.0 / (1.0 + jnp.exp(-z))).reshape(1, 1, 1)


# ---------------------------------------------------------------------------
# Wrapper: layout / weight-prep glue only (parameters + NCHW->NHWC transpose)
# ---------------------------------------------------------------------------
def discriminator_forward(x_nchw, labels, p):
    B, Cin, H, W = x_nchw.shape
    H2, W2, H4, W4 = H // 2, W // 2, H // 4, W // 4
    C, P2 = C_CONV, H4 * W4
    F = C * P2
    bf = jnp.bfloat16

    x_nhwc = jnp.transpose(x_nchw, (0, 2, 3, 1)).astype(jnp.float32)  # NCHW -> NHWC

    # label embedding rows gathered here (torch's nn.Embedding would raise on
    # out-of-range labels; they are clamped to the valid range instead).
    labels = jnp.clip(jnp.asarray(labels, jnp.int32).reshape(B), 0, 1)
    emb_rows = p["emb"][labels].astype(jnp.float32)                   # (B, 2) -> SMEM

    # conv weights pre-stacked for im2col: HWIO (3,3,Cin,C) -> (9*Cin, C)
    w1c = p["w1c"].reshape(9 * Cin, C)
    w2c = p["w2c"].reshape(9 * C, C)

    # split cat([flat, emb]) weight; permute feature rows from CHW (torch flatten
    # order) to HWC (kernel feature-row layout) so the kernel never transposes
    # activations.
    w_feat = p["wl1"][:F].reshape(C, P2, D1).transpose(1, 0, 2).reshape(F, D1)
    w_emb = p["wl1"][F:]                                              # (2, D1)

    def const(shape):
        nd = len(shape)
        return pl.BlockSpec(shape, lambda b, _n=nd: (0,) * _n)        # weight-resident

    in_specs = [
        pl.BlockSpec(memory_space=pltpu.MemorySpace.SMEM),            # (B, 2) emb rows
        pl.BlockSpec((1, H, W, Cin), lambda b: (b, 0, 0, 0)),         # per-image input
        const((9 * Cin, C)), const((1, C)),                           # conv1 w, b
        const((9 * C, C)), const((1, C)),                             # conv2 w, b
        const((F, D1)), const((2, D1)), const((1, D1)),               # linear1
        const((D1, D2)), const((1, D2)),                              # linear2
        const((1, D2)), const((1, 1)),                                # linear3
    ]

    out = pl.pallas_call(
        _disc_kernel,
        out_shape=jax.ShapeDtypeStruct((B, 1, 1), jnp.float32),
        grid=(B,),
        in_specs=in_specs,
        out_specs=pl.BlockSpec((1, 1, 1), lambda b: (b, 0, 0)),
        scratch_shapes=[
            pltpu.VMEM((H + 2, W + 2, Cin), jnp.float32),             # conv1 padded in
            pltpu.VMEM((H2 + 2, W2 + 2, C), jnp.float32),             # conv2 padded in
            pltpu.VMEM((H2 * W, C), jnp.float32),                     # pool1 row-pair max
            pltpu.VMEM((H4 * W2, C), jnp.float32),                    # pool2 row-pair max
        ],
        compiler_params=pltpu.CompilerParams(
            dimension_semantics=("parallel",)),                       # batch across cores
    )(
        emb_rows, x_nhwc,
        w1c.astype(bf), p["b1c"].reshape(1, C),
        w2c.astype(bf), p["b2c"].reshape(1, C),
        w_feat.astype(bf), w_emb.astype(bf), p["bl1"].reshape(1, D1),
        p["wl2"].astype(bf), p["bl2"].reshape(1, D2),
        p["wl3"].reshape(1, D2), p["bl3"].reshape(1, 1),
    )
    return out.reshape(B, 1)                             # per-image sigmoid score


# ---------------------------------------------------------------------------
# Parameters + pure-JAX reference
# ---------------------------------------------------------------------------
def init_params(key, H, W):
    F = C_CONV * (H // 4) * (W // 4)
    ks = jax.random.split(key, 11)
    n = jax.random.normal
    return dict(
        w1c=0.10 * n(ks[0], (3, 3, 3, C_CONV), jnp.float32),     # conv1 HWIO
        b1c=0.10 * n(ks[1], (C_CONV,), jnp.float32),
        w2c=0.05 * n(ks[2], (3, 3, C_CONV, C_CONV), jnp.float32),
        b2c=0.05 * n(ks[3], (C_CONV,), jnp.float32),
        wl1=0.02 * n(ks[4], (F + 2, D1), jnp.float32),           # linear1 (in, out)
        bl1=0.02 * n(ks[5], (D1,), jnp.float32),
        wl2=0.05 * n(ks[6], (D1, D2), jnp.float32),
        bl2=0.05 * n(ks[7], (D2,), jnp.float32),
        wl3=0.05 * n(ks[8], (D2, 1), jnp.float32),
        bl3=0.05 * n(ks[9], (1,), jnp.float32),
        emb=1.00 * n(ks[10], (2, 2), jnp.float32),               # Embedding(2, 2)
    )


def _bf16_round(w):
    return w.astype(jnp.bfloat16).astype(jnp.float32)


def reference_forward(x_nchw, labels, p):
    # f32 HIGHEST reference with the same bf16-rounded matmul weights the kernel uses.
    dn = ("NCHW", "HWIO", "NCHW")
    hp = jax.lax.Precision.HIGHEST
    y = jax.lax.conv_general_dilated(x_nchw, _bf16_round(p["w1c"]), (1, 1), "SAME",
                                     dimension_numbers=dn, precision=hp)
    y = _lrelu(y + p["b1c"][None, :, None, None])
    y = jax.lax.reduce_window(y, -jnp.inf, jax.lax.max,
                              (1, 1, 2, 2), (1, 1, 2, 2), "VALID")
    y = jax.lax.conv_general_dilated(y, _bf16_round(p["w2c"]), (1, 1), "SAME",
                                     dimension_numbers=dn, precision=hp)
    y = _lrelu(y + p["b2c"][None, :, None, None])
    y = jax.lax.reduce_window(y, -jnp.inf, jax.lax.max,
                              (1, 1, 2, 2), (1, 1, 2, 2), "VALID")
    flat = y.reshape(y.shape[0], -1)                         # per-image CHW flatten
    emb = p["emb"][jnp.clip(jnp.asarray(labels, jnp.int32), 0, 1)]
    z = jnp.concatenate([flat, emb], axis=-1)
    z = _lrelu(jnp.dot(z, _bf16_round(p["wl1"]), precision=hp) + p["bl1"])
    z = _lrelu(jnp.dot(z, _bf16_round(p["wl2"]), precision=hp) + p["bl2"])
    z = jax.nn.sigmoid(jnp.dot(z, p["wl3"], precision=hp) + p["bl3"])
    return z                                                  # (B, 1)


if __name__ == "__main__":
    H = W = 16                                             # small spatial size
    B = 2                                                  # small batch (grid axis)
    key = jax.random.PRNGKey(0)
    kx, kp = jax.random.split(key)
    x = jax.random.normal(kx, (B, 3, H, W), jnp.float32)   # PyTorch-style NCHW input
    labels = jnp.array([1, 0], dtype=jnp.int32)            # per-image labels
    params = init_params(kp, H, W)

    fwd = jax.jit(discriminator_forward)
    out = jax.block_until_ready(fwd(x, labels, params))

    ref = np.asarray(reference_forward(x, labels, params))
    assert out.shape == (B, 1), out.shape
    assert np.allclose(np.asarray(out), ref, rtol=2e-3, atol=2e-3), (out, ref)
    print("KERNEL_OK")
</pallas_src>

<mosaic_0001>
module attributes {stable_mosaic.version = 11 : i64} {
  func.func @_disc_kernel(%arg0: i32, %arg1: memref<2x2xf32, #tpu.memory_space<smem>>, %arg2: memref<1x16x16x3xf32, #tpu.memory_space<vmem>>, %arg3: memref<27x32xbf16, #tpu.memory_space<vmem>>, %arg4: memref<1x32xf32, #tpu.memory_space<vmem>>, %arg5: memref<288x32xbf16, #tpu.memory_space<vmem>>, %arg6: memref<1x32xf32, #tpu.memory_space<vmem>>, %arg7: memref<512x128xbf16, #tpu.memory_space<vmem>>, %arg8: memref<2x128xbf16, #tpu.memory_space<vmem>>, %arg9: memref<1x128xf32, #tpu.memory_space<vmem>>, %arg10: memref<128x64xbf16, #tpu.memory_space<vmem>>, %arg11: memref<1x64xf32, #tpu.memory_space<vmem>>, %arg12: memref<1x64xf32, #tpu.memory_space<vmem>>, %arg13: memref<1x1xf32, #tpu.memory_space<vmem>>, %arg14: memref<1x1x1xf32, #tpu.memory_space<vmem>>, %arg15: memref<18x18x3xf32, #tpu.memory_space<vmem>>, %arg16: memref<10x10x32xf32, #tpu.memory_space<vmem>>, %arg17: memref<128x32xf32, #tpu.memory_space<vmem>>, %arg18: memref<32x32xf32, #tpu.memory_space<vmem>>) attributes {dimension_semantics = [#tpu.dimension_semantics<parallel>], iteration_bounds = array<i64: 2>, scalar_prefetch = 0 : i64, scratch_operands = 4 : i64, tpu.core_type = #tpu.core_type<tc>, window_params = [{transform_indices = @transform_0, window_bounds = array<i64: 2, 2>}, {transform_indices = @transform_1, window_bounds = array<i64: 1, 16, 16, 3>}, {pipeline_mode = #tpu.pipeline_mode<synchronous>, transform_indices = @transform_2, window_bounds = array<i64: 27, 32>}, {pipeline_mode = #tpu.pipeline_mode<synchronous>, transform_indices = @transform_3, window_bounds = array<i64: 1, 32>}, {pipeline_mode = #tpu.pipeline_mode<synchronous>, transform_indices = @transform_4, window_bounds = array<i64: 288, 32>}, {pipeline_mode = #tpu.pipeline_mode<synchronous>, transform_indices = @transform_5, window_bounds = array<i64: 1, 32>}, {pipeline_mode = #tpu.pipeline_mode<synchronous>, transform_indices = @transform_6, window_bounds = array<i64: 512, 128>}, {pipeline_mode = #tpu.pipeline_mode<synchronous>, transform_indices = @transform_7, window_bounds = array<i64: 2, 128>}, {pipeline_mode = #tpu.pipeline_mode<synchronous>, transform_indices = @transform_8, window_bounds = array<i64: 1, 128>}, {pipeline_mode = #tpu.pipeline_mode<synchronous>, transform_indices = @transform_9, window_bounds = array<i64: 128, 64>}, {pipeline_mode = #tpu.pipeline_mode<synchronous>, transform_indices = @transform_10, window_bounds = array<i64: 1, 64>}, {pipeline_mode = #tpu.pipeline_mode<synchronous>, transform_indices = @transform_11, window_bounds = array<i64: 1, 64>}, {pipeline_mode = #tpu.pipeline_mode<synchronous>, transform_indices = @transform_12, window_bounds = array<i64: 1, 1>}, {transform_indices = @transform_13, window_bounds = array<i64: 1, 1, 1>}]} {
    %cst = arith.constant 0.000000e+00 : f32
    %0 = vector.broadcast %cst : f32 to vector<1x18x3xf32>
    %cst_0 = arith.constant 0.000000e+00 : f32
    %1 = vector.broadcast %cst_0 : f32 to vector<18x1x3xf32>
    %c0 = arith.constant 0 : index
    %c0_1 = arith.constant 0 : index
    %c0_2 = arith.constant 0 : index
    %2 = vector.load %arg15[%c0, %c0_1, %c0_2] : memref<18x18x3xf32, #tpu.memory_space<vmem>>, vector<1x18x3xf32>
    tpu.vector_store %arg15[%c0, %c0_1, %c0_2], %0 {strides = array<i32>} : memref<18x18x3xf32, #tpu.memory_space<vmem>>, vector<1x18x3xf32>,
    %c17 = arith.constant 17 : index
    %c0_3 = arith.constant 0 : index
    %c0_4 = arith.constant 0 : index
    %3 = vector.load %arg15[%c17, %c0_3, %c0_4] : memref<18x18x3xf32, #tpu.memory_space<vmem>>, vector<1x18x3xf32>
    tpu.vector_store %arg15[%c17, %c0_3, %c0_4], %0 {strides = array<i32>} : memref<18x18x3xf32, #tpu.memory_space<vmem>>, vector<1x18x3xf32>,
    %c0_5 = arith.constant 0 : index
    %c0_6 = arith.constant 0 : index
    %c0_7 = arith.constant 0 : index
    %4 = vector.load %arg15[%c0_5, %c0_6, %c0_7] : memref<18x18x3xf32, #tpu.memory_space<vmem>>, vector<18x1x3xf32>
    tpu.vector_store %arg15[%c0_5, %c0_6, %c0_7], %1 {strides = array<i32>} : memref<18x18x3xf32, #tpu.memory_space<vmem>>, vector<18x1x3xf32>,
    %c0_8 = arith.constant 0 : index
    %c17_9 = arith.constant 17 : index
    %c0_10 = arith.constant 0 : index
    %5 = vector.load %arg15[%c0_8, %c17_9, %c0_10] : memref<18x18x3xf32, #tpu.memory_space<vmem>>, vector<18x1x3xf32>
    tpu.vector_store %arg15[%c0_8, %c17_9, %c0_10], %1 {strides = array<i32>} : memref<18x18x3xf32, #tpu.memory_space<vmem>>, vector<18x1x3xf32>,
    %c0_11 = arith.constant 0 : index
    %c0_12 = arith.constant 0 : index
    %c0_13 = arith.constant 0 : index
    %c0_14 = arith.constant 0 : index
    %6 = vector.load %arg2[%c0_11, %c0_12, %c0_13, %c0_14] : memref<1x16x16x3xf32, #tpu.memory_space<vmem>>, vector<1x16x16x3xf32>
    %7 = vector.shape_cast %6 : vector<1x16x16x3xf32> to vector<16x16x3xf32>
    %c1 = arith.constant 1 : index
    %c1_15 = arith.constant 1 : index
    %c0_16 = arith.constant 0 : index
    %8 = vector.load %arg15[%c1, %c1_15, %c0_16] : memref<18x18x3xf32, #tpu.memory_space<vmem>>, vector<16x16x3xf32>
    tpu.vector_store %arg15[%c1, %c1_15, %c0_16], %7 {strides = array<i32>} : memref<18x18x3xf32, #tpu.memory_space<vmem>>, vector<16x16x3xf32>,
    %c0_17 = arith.constant 0 : index
    %c0_18 = arith.constant 0 : index
    %c0_19 = arith.constant 0 : index
    %9 = vector.load %arg15[%c0_17, %c0_18, %c0_19] : memref<18x18x3xf32, #tpu.memory_space<vmem>>, vector<16x16x3xf32>
    %10 = vector.shape_cast %9 : vector<16x16x3xf32> to vector<256x3xf32>
    %c0_20 = arith.constant 0 : index
    %c1_21 = arith.constant 1 : index
    %c0_22 = arith.constant 0 : index
    %11 = vector.load %arg15[%c0_20, %c1_21, %c0_22] : memref<18x18x3xf32, #tpu.memory_space<vmem>>, vector<16x16x3xf32>
    %12 = vector.shape_cast %11 : vector<16x16x3xf32> to vector<256x3xf32>
    %c0_23 = arith.constant 0 : index
    %c2 = arith.constant 2 : index
    %c0_24 = arith.constant 0 : index
    %13 = vector.load %arg15[%c0_23, %c2, %c0_24] : memref<18x18x3xf32, #tpu.memory_space<vmem>>, vector<16x16x3xf32>
    %14 = vector.shape_cast %13 : vector<16x16x3xf32> to vector<256x3xf32>
    %c1_25 = arith.constant 1 : index
    %c0_26 = arith.constant 0 : index
    %c0_27 = arith.constant 0 : index
    %15 = vector.load %arg15[%c1_25, %c0_26, %c0_27] : memref<18x18x3xf32, #tpu.memory_space<vmem>>, vector<16x16x3xf32>
    %16 = vector.shape_cast %15 : vector<16x16x3xf32> to vector<256x3xf32>
    %c1_28 = arith.constant 1 : index
    %c1_29 = arith.constant 1 : index
    %c0_30 = arith.constant 0 : index
    %17 = vector.load %arg15[%c1_28, %c1_29, %c0_30] : memref<18x18x3xf32, #tpu.memory_space<vmem>>, vector<16x16x3xf32>
    %18 = vector.shape_cast %17 : vector<16x16x3xf32> to vector<256x3xf32>
    %c1_31 = arith.constant 1 : index
    %c2_32 = arith.constant 2 : index
    %c0_33 = arith.constant 0 : index
    %19 = vector.load %arg15[%c1_31, %c2_32, %c0_33] : memref<18x18x3xf32, #tpu.memory_space<vmem>>, vector<16x16x3xf32>
    %20 = vector.shape_cast %19 : vector<16x16x3xf32> to vector<256x3xf32>
    %c2_34 = arith.constant 2 : index
    %c0_35 = arith.constant 0 : index
    %c0_36 = arith.constant 0 : index
    %21 = vector.load %arg15[%c2_34, %c0_35, %c0_36] : memref<18x18x3xf32, #tpu.memory_space<vmem>>, vector<16x16x3xf32>
    %22 = vector.shape_cast %21 : vector<16x16x3xf32> to vector<256x3xf32>
    %c2_37 = arith.constant 2 : index
    %c1_38 = arith.constant 1 : index
    %c0_39 = arith.constant 0 : index
    %23 = vector.load %arg15[%c2_37, %c1_38, %c0_39] : memref<18x18x3xf32, #tpu.memory_space<vmem>>, vector<16x16x3xf32>
    %24 = vector.shape_cast %23 : vector<16x16x3xf32> to vector<256x3xf32>
    %c2_40 = arith.constant 2 : index
    %c2_41 = arith.constant 2 : index
    %c0_42 = arith.constant 0 : index
    %25 = vector.load %arg15[%c2_40, %c2_41, %c0_42] : memref<18x18x3xf32, #tpu.memory_space<vmem>>, vector<16x16x3xf32>
    %26 = vector.shape_cast %25 : vector<16x16x3xf32> to vector<256x3xf32>
    %27 = tpu.concatenate %10, %12, %14, %16, %18, %20, %22, %24, %26 in 1 : vector<256x3xf32>, vector<256x3xf32>, vector<256x3xf32>, vector<256x3xf32>, vector<256x3xf32>, vector<256x3xf32>, vector<256x3xf32>, vector<256x3xf32>, vector<256x3xf32> -> vector<256x27xf32>
    %28 = arith.truncf %27 : vector<256x27xf32> to vector<256x27xbf16>
    %c0_43 = arith.constant 0 : index
    %c0_44 = arith.constant 0 : index
    %29 = vector.load %arg3[%c0_43, %c0_44] : memref<27x32xbf16, #tpu.memory_space<vmem>>, vector<27x32xbf16>
    %cst_45 = arith.constant dense<0.000000e+00> : vector<256x32xf32>
    %30 = tpu.matmul %28, %29, %cst_45 {dimension_numbers = #tpu.dot_dimension_numbers<[1], [0], [0], [1], [0, 0, 1, 1], [], []>} : vector<256x27xbf16>, vector<27x32xbf16>, vector<256x32xf32> -> vector<256x32xf32>
    %c0_46 = arith.constant 0 : index
    %c0_47 = arith.constant 0 : index
    %31 = vector.load %arg4[%c0_46, %c0_47] : memref<1x32xf32, #tpu.memory_space<vmem>>, vector<1x32xf32>
    %32 = vector.broadcast %31 : vector<1x32xf32> to vector<256x32xf32>
    %33 = arith.addf %30, %32 : vector<256x32xf32>
    %cst_48 = arith.constant 0.000000e+00 : f32
    %34 = vector.broadcast %cst_48 : f32 to vector<256x32xf32>
    %35 = arith.cmpf oge, %33, %34 : vector<256x32xf32>
    %cst_49 = arith.constant 1.000000e-01 : f32
    %36 = vector.broadcast %cst_49 : f32 to vector<256x32xf32>
    %37 = arith.mulf %36, %33 : vector<256x32xf32>
    %38 = arith.select %35, %33, %37 : vector<256x32xi1>, vector<256x32xf32>
    %39 = vector.shape_cast %38 : vector<256x32xf32> to vector<8x2x16x32xf32>
    %40 = vector.extract_strided_slice %39 {offsets = [0, 0, 0, 0], sizes = [8, 1, 16, 32], strides = [1, 1, 1, 1]} : vector<8x2x16x32xf32> to vector<8x1x16x32xf32>
    %41 = vector.shape_cast %40 : vector<8x1x16x32xf32> to vector<8x16x32xf32>
    %42 = vector.extract_strided_slice %39 {offsets = [0, 1, 0, 0], sizes = [8, 1, 16, 32], strides = [1, 1, 1, 1]} : vector<8x2x16x32xf32> to vector<8x1x16x32xf32>
    %43 = vector.shape_cast %42 : vector<8x1x16x32xf32> to vector<8x16x32xf32>
    %44 = arith.maximumf %41, %43 : vector<8x16x32xf32>
    %45 = vector.shape_cast %44 : vector<8x16x32xf32> to vector<128x32xf32>
    %c0_50 = arith.constant 0 : index
    %c0_51 = arith.constant 0 : index
    %46 = vector.load %arg17[%c0_50, %c0_51] : memref<128x32xf32, #tpu.memory_space<vmem>>, vector<128x32xf32>
    tpu.vector_store %arg17[%c0_50, %c0_51], %45 {strides = array<i32>} : memref<128x32xf32, #tpu.memory_space<vmem>>, vector<128x32xf32>,
    %c0_52 = arith.constant 0 : index
    %c0_53 = arith.constant 0 : index
    %47 = tpu.strided_load %arg17[%c0_52, %c0_53] {strides = array<i32: 2, 1>} : memref<128x32xf32, #tpu.memory_space<vmem>>, vector<64x32xf32>
    %c1_54 = arith.constant 1 : index
    %c0_55 = arith.constant 0 : index
    %48 = tpu.strided_load %arg17[%c1_54, %c0_55] {strides = array<i32: 2, 1>} : memref<128x32xf32, #tpu.memory_space<vmem>>, vector<64x32xf32>
    %49 = arith.maximumf %47, %48 : vector<64x32xf32>
    %cst_56 = arith.constant 0.000000e+00 : f32
    %50 = vector.broadcast %cst_56 : f32 to vector<1x10x32xf32>
    %cst_57 = arith.constant 0.000000e+00 : f32
    %51 = vector.broadcast %cst_57 : f32 to vector<10x1x32xf32>
    %c0_58 = arith.constant 0 : index
    %c0_59 = arith.constant 0 : index
    %c0_60 = arith.constant 0 : index
    %52 = vector.load %arg16[%c0_58, %c0_59, %c0_60] : memref<10x10x32xf32, #tpu.memory_space<vmem>>, vector<1x10x32xf32>
    tpu.vector_store %arg16[%c0_58, %c0_59, %c0_60], %50 {strides = array<i32>} : memref<10x10x32xf32, #tpu.memory_space<vmem>>, vector<1x10x32xf32>,
    %c9 = arith.constant 9 : index
    %c0_61 = arith.constant 0 : index
    %c0_62 = arith.constant 0 : index
    %53 = vector.load %arg16[%c9, %c0_61, %c0_62] : memref<10x10x32xf32, #tpu.memory_space<vmem>>, vector<1x10x32xf32>
    tpu.vector_store %arg16[%c9, %c0_61, %c0_62], %50 {strides = array<i32>} : memref<10x10x32xf32, #tpu.memory_space<vmem>>, vector<1x10x32xf32>,
    %c0_63 = arith.constant 0 : index
    %c0_64 = arith.constant 0 : index
    %c0_65 = arith.constant 0 : index
    %54 = vector.load %arg16[%c0_63, %c0_64, %c0_65] : memref<10x10x32xf32, #tpu.memory_space<vmem>>, vector<10x1x32xf32>
    tpu.vector_store %arg16[%c0_63, %c0_64, %c0_65], %51 {strides = array<i32>} : memref<10x10x32xf32, #tpu.memory_space<vmem>>, vector<10x1x32xf32>,
    %c0_66 = arith.constant 0 : index
    %c9_67 = arith.constant 9 : index
    %c0_68 = arith.constant 0 : index
    %55 = vector.load %arg16[%c0_66, %c9_67, %c0_68] : memref<10x10x32xf32, #tpu.memory_space<vmem>>, vector<10x1x32xf32>
    tpu.vector_store %arg16[%c0_66, %c9_67, %c0_68], %51 {strides = array<i32>} : memref<10x10x32xf32, #tpu.memory_space<vmem>>, vector<10x1x32xf32>,
    %56 = vector.shape_cast %49 : vector<64x32xf32> to vector<8x8x32xf32>
    %c1_69 = arith.constant 1 : index
    %c1_70 = arith.constant 1 : index
    %c0_71 = arith.constant 0 : index
    %57 = vector.load %arg16[%c1_69, %c1_70, %c0_71] : memref<10x10x32xf32, #tpu.memory_space<vmem>>, vector<8x8x32xf32>
    tpu.vector_store %arg16[%c1_69, %c1_70, %c0_71], %56 {strides = array<i32>} : memref<10x10x32xf32, #tpu.memory_space<vmem>>, vector<8x8x32xf32>,
    %c0_72 = arith.constant 0 : index
    %c0_73 = arith.constant 0 : index
    %c0_74 = arith.constant 0 : index
    %58 = vector.load %arg16[%c0_72, %c0_73, %c0_74] : memref<10x10x32xf32, #tpu.memory_space<vmem>>, vector<8x8x32xf32>
    %59 = vector.shape_cast %58 : vector<8x8x32xf32> to vector<64x32xf32>
    %c0_75 = arith.constant 0 : index
    %c1_76 = arith.constant 1 : index
    %c0_77 = arith.constant 0 : index
    %60 = vector.load %arg16[%c0_75, %c1_76, %c0_77] : memref<10x10x32xf32, #tpu.memory_space<vmem>>, vector<8x8x32xf32>
    %61 = vector.shape_cast %60 : vector<8x8x32xf32> to vector<64x32xf32>
    %c0_78 = arith.constant 0 : index
    %c2_79 = arith.constant 2 : index
    %c0_80 = arith.constant 0 : index
    %62 = vector.load %arg16[%c0_78, %c2_79, %c0_80] : memref<10x10x32xf32, #tpu.memory_space<vmem>>, vector<8x8x32xf32>
    %63 = vector.shape_cast %62 : vector<8x8x32xf32> to vector<64x32xf32>
    %c1_81 = arith.constant 1 : index
    %c0_82 = arith.constant 0 : index
    %c0_83 = arith.constant 0 : index
    %64 = vector.load %arg16[%c1_81, %c0_82, %c0_83] : memref<10x10x32xf32, #tpu.memory_space<vmem>>, vector<8x8x32xf32>
    %65 = vector.shape_cast %64 : vector<8x8x32xf32> to vector<64x32xf32>
    %c1_84 = arith.constant 1 : index
    %c1_85 = arith.constant 1 : index
    %c0_86 = arith.constant 0 : index
    %66 = vector.load %arg16[%c1_84, %c1_85, %c0_86] : memref<10x10x32xf32, #tpu.memory_space<vmem>>, vector<8x8x32xf32>
    %67 = vector.shape_cast %66 : vector<8x8x32xf32> to vector<64x32xf32>
    %c1_87 = arith.constant 1 : index
    %c2_88 = arith.constant 2 : index
    %c0_89 = arith.constant 0 : index
    %68 = vector.load %arg16[%c1_87, %c2_88, %c0_89] : memref<10x10x32xf32, #tpu.memory_space<vmem>>, vector<8x8x32xf32>
    %69 = vector.shape_cast %68 : vector<8x8x32xf32> to vector<64x32xf32>
    %c2_90 = arith.constant 2 : index
    %c0_91 = arith.constant 0 : index
    %c0_92 = arith.constant 0 : index
    %70 = vector.load %arg16[%c2_90, %c0_91, %c0_92] : memref<10x10x32xf32, #tpu.memory_space<vmem>>, vector<8x8x32xf32>
    %71 = vector.shape_cast %70 : vector<8x8x32xf32> to vector<64x32xf32>
    %c2_93 = arith.constant 2 : index
    %c1_94 = arith.constant 1 : index
    %c0_95 = arith.constant 0 : index
    %72 = vector.load %arg16[%c2_93, %c1_94, %c0_95] : memref<10x10x32xf32, #tpu.memory_space<vmem>>, vector<8x8x32xf32>
    %73 = vector.shape_cast %72 : vector<8x8x32xf32> to vector<64x32xf32>
    %c2_96 = arith.constant 2 : index
    %c2_97 = arith.constant 2 : index
    %c0_98 = arith.constant 0 : index
    %74 = vector.load %arg16[%c2_96, %c2_97, %c0_98] : memref<10x10x32xf32, #tpu.memory_space<vmem>>, vector<8x8x32xf32>
    %75 = vector.shape_cast %74 : vector<8x8x32xf32> to vector<64x32xf32>
    %76 = tpu.concatenate %59, %61, %63, %65, %67, %69, %71, %73, %75 in 1 : vector<64x32xf32>, vector<64x32xf32>, vector<64x32xf32>, vector<64x32xf32>, vector<64x32xf32>, vector<64x32xf32>, vector<64x32xf32>, vector<64x32xf32>, vector<64x32xf32> -> vector<64x288xf32>
    %77 = arith.truncf %76 : vector<64x288xf32> to vector<64x288xbf16>
    %c0_99 = arith.constant 0 : index
    %c0_100 = arith.constant 0 : index
    %78 = vector.load %arg5[%c0_99, %c0_100] : memref<288x32xbf16, #tpu.memory_space<vmem>>, vector<288x32xbf16>
    %cst_101 = arith.constant dense<0.000000e+00> : vector<64x32xf32>
    %79 = tpu.matmul %77, %78, %cst_101 {dimension_numbers = #tpu.dot_dimension_numbers<[1], [0], [0], [1], [0, 0, 1, 1], [], []>} : vector<64x288xbf16>, vector<288x32xbf16>, vector<64x32xf32> -> vector<64x32xf32>
    %c0_102 = arith.constant 0 : index
    %c0_103 = arith.constant 0 : index
    %80 = vector.load %arg6[%c0_102, %c0_103] : memref<1x32xf32, #tpu.memory_space<vmem>>, vector<1x32xf32>
    %81 = vector.broadcast %80 : vector<1x32xf32> to vector<64x32xf32>
    %82 = arith.addf %79, %81 : vector<64x32xf32>
    %cst_104 = arith.constant 0.000000e+00 : f32
    %83 = vector.broadcast %cst_104 : f32 to vector<64x32xf32>
    %84 = arith.cmpf oge, %82, %83 : vector<64x32xf32>
    %cst_105 = arith.constant 1.000000e-01 : f32
    %85 = vector.broadcast %cst_105 : f32 to vector<64x32xf32>
    %86 = arith.mulf %85, %82 : vector<64x32xf32>
    %87 = arith.select %84, %82, %86 : vector<64x32xi1>, vector<64x32xf32>
    %88 = vector.shape_cast %87 : vector<64x32xf32> to vector<4x2x8x32xf32>
    %89 = vector.extract_strided_slice %88 {offsets = [0, 0, 0, 0], sizes = [4, 1, 8, 32], strides = [1, 1, 1, 1]} : vector<4x2x8x32xf32> to vector<4x1x8x32xf32>
    %90 = vector.shape_cast %89 : vector<4x1x8x32xf32> to vector<4x8x32xf32>
    %91 = vector.extract_strided_slice %88 {offsets = [0, 1, 0, 0], sizes = [4, 1, 8, 32], strides = [1, 1, 1, 1]} : vector<4x2x8x32xf32> to vector<4x1x8x32xf32>
    %92 = vector.shape_cast %91 : vector<4x1x8x32xf32> to vector<4x8x32xf32>
    %93 = arith.maximumf %90, %92 : vector<4x8x32xf32>
    %94 = vector.shape_cast %93 : vector<4x8x32xf32> to vector<32x32xf32>
    %c0_106 = arith.constant 0 : index
    %c0_107 = arith.constant 0 : index
    %95 = vector.load %arg18[%c0_106, %c0_107] : memref<32x32xf32, #tpu.memory_space<vmem>>, vector<32x32xf32>
    tpu.vector_store %arg18[%c0_106, %c0_107], %94 {strides = array<i32>} : memref<32x32xf32, #tpu.memory_space<vmem>>, vector<32x32xf32>,
    %c0_108 = arith.constant 0 : index
    %c0_109 = arith.constant 0 : index
    %96 = tpu.strided_load %arg18[%c0_108, %c0_109] {strides = array<i32: 2, 1>} : memref<32x32xf32, #tpu.memory_space<vmem>>, vector<16x32xf32>
    %c1_110 = arith.constant 1 : index
    %c0_111 = arith.constant 0 : index
    %97 = tpu.strided_load %arg18[%c1_110, %c0_111] {strides = array<i32: 2, 1>} : memref<32x32xf32, #tpu.memory_space<vmem>>, vector<16x32xf32>
    %98 = arith.maximumf %96, %97 : vector<16x32xf32>
    %99 = vector.extract_strided_slice %98 {offsets = [0, 0], sizes = [1, 32], strides = [1, 1]} : vector<16x32xf32> to vector<1x32xf32>
    %100 = vector.extract_strided_slice %98 {offsets = [1, 0], sizes = [1, 32], strides = [1, 1]} : vector<16x32xf32> to vector<1x32xf32>
    %101 = vector.extract_strided_slice %98 {offsets = [2, 0], sizes = [1, 32], strides = [1, 1]} : vector<16x32xf32> to vector<1x32xf32>
    %102 = vector.extract_strided_slice %98 {offsets = [3, 0], sizes = [1, 32], strides = [1, 1]} : vector<16x32xf32> to vector<1x32xf32>
    %103 = vector.extract_strided_slice %98 {offsets = [4, 0], sizes = [1, 32], strides = [1, 1]} : vector<16x32xf32> to vector<1x32xf32>
    %104 = vector.extract_strided_slice %98 {offsets = [5, 0], sizes = [1, 32], strides = [1, 1]} : vector<16x32xf32> to vector<1x32xf32>
    %105 = vector.extract_strided_slice %98 {offsets = [6, 0], sizes = [1, 32], strides = [1, 1]} : vector<16x32xf32> to vector<1x32xf32>
    %106 = vector.extract_strided_slice %98 {offsets = [7, 0], sizes = [1, 32], strides = [1, 1]} : vector<16x32xf32> to vector<1x32xf32>
    %107 = vector.extract_strided_slice %98 {offsets = [8, 0], sizes = [1, 32], strides = [1, 1]} : vector<16x32xf32> to vector<1x32xf32>
    %108 = vector.extract_strided_slice %98 {offsets = [9, 0], sizes = [1, 32], strides = [1, 1]} : vector<16x32xf32> to vector<1x32xf32>
    %109 = vector.extract_strided_slice %98 {offsets = [10, 0], sizes = [1, 32], strides = [1, 1]} : vector<16x32xf32> to vector<1x32xf32>
    %110 = vector.extract_strided_slice %98 {offsets = [11, 0], sizes = [1, 32], strides = [1, 1]} : vector<16x32xf32> to vector<1x32xf32>
    %111 = vector.extract_strided_slice %98 {offsets = [12, 0], sizes = [1, 32], strides = [1, 1]} : vector<16x32xf32> to vector<1x32xf32>
    %112 = vector.extract_strided_slice %98 {offsets = [13, 0], sizes = [1, 32], strides = [1, 1]} : vector<16x32xf32> to vector<1x32xf32>
    %113 = vector.extract_strided_slice %98 {offsets = [14, 0], sizes = [1, 32], strides = [1, 1]} : vector<16x32xf32> to vector<1x32xf32>
    %114 = vector.extract_strided_slice %98 {offsets = [15, 0], sizes = [1, 32], strides = [1, 1]} : vector<16x32xf32> to vector<1x32xf32>
    %115 = tpu.concatenate %99, %100, %101, %102, %103, %104, %105, %106, %107, %108, %109, %110, %111, %112, %113, %114 in 1 : vector<1x32xf32>, vector<1x32xf32>, vector<1x32xf32>, vector<1x32xf32>, vector<1x32xf32>, vector<1x32xf32>, vector<1x32xf32>, vector<1x32xf32>, vector<1x32xf32>, vector<1x32xf32>, vector<1x32xf32>, vector<1x32xf32>, vector<1x32xf32>, vector<1x32xf32>, vector<1x32xf32>, vector<1x32xf32> -> vector<1x512xf32>
    %116 = arith.truncf %115 : vector<1x512xf32> to vector<1x512xbf16>
    %c0_112 = arith.constant 0 : index
    %c0_113 = arith.constant 0 : index
    %117 = vector.load %arg7[%c0_112, %c0_113] : memref<512x128xbf16, #tpu.memory_space<vmem>>, vector<512x128xbf16>
    %cst_114 = arith.constant dense<0.000000e+00> : vector<1x128xf32>
    %118 = tpu.matmul %116, %117, %cst_114 {dimension_numbers = #tpu.dot_dimension_numbers<[1], [0], [0], [1], [0, 0, 1, 1], [], []>} : vector<1x512xbf16>, vector<512x128xbf16>, vector<1x128xf32> -> vector<1x128xf32>
    %c0_115 = arith.constant 0 : index
    %c0_116 = arith.constant 0 : index
    %119 = vector.load %arg8[%c0_115, %c0_116] : memref<2x128xbf16, #tpu.memory_space<vmem>>, vector<2x128xbf16>
    %120 = arith.extf %119 : vector<2x128xbf16> to vector<2x128xf32>
    %121 = arith.index_cast %arg0 : i32 to index
    %c0_117 = arith.constant 0 : index
    %122 = memref.load %arg1[%121, %c0_117] : memref<2x2xf32, #tpu.memory_space<smem>>
    %123 = vector.extract_strided_slice %120 {offsets = [0, 0], sizes = [1, 128], strides = [1, 1]} : vector<2x128xf32> to vector<1x128xf32>
    %124 = vector.broadcast %122 : f32 to vector<1x128xf32>
    %125 = arith.mulf %124, %123 : vector<1x128xf32>
    %126 = arith.addf %118, %125 : vector<1x128xf32>
    %127 = arith.index_cast %arg0 : i32 to index
    %c1_118 = arith.constant 1 : index
    %128 = memref.load %arg1[%127, %c1_118] : memref<2x2xf32, #tpu.memory_space<smem>>
    %129 = vector.extract_strided_slice %120 {offsets = [1, 0], sizes = [1, 128], strides = [1, 1]} : vector<2x128xf32> to vector<1x128xf32>
    %130 = vector.broadcast %128 : f32 to vector<1x128xf32>
    %131 = arith.mulf %130, %129 : vector<1x128xf32>
    %132 = arith.addf %126, %131 : vector<1x128xf32>
    %c0_119 = arith.constant 0 : index
    %c0_120 = arith.constant 0 : index
    %133 = vector.load %arg9[%c0_119, %c0_120] : memref<1x128xf32, #tpu.memory_space<vmem>>, vector<1x128xf32>
    %134 = arith.addf %132, %133 : vector<1x128xf32>
    %cst_121 = arith.constant 0.000000e+00 : f32
    %135 = vector.broadcast %cst_121 : f32 to vector<1x128xf32>
    %136 = arith.cmpf oge, %134, %135 : vector<1x128xf32>
    %cst_122 = arith.constant 1.000000e-01 : f32
    %137 = vector.broadcast %cst_122 : f32 to vector<1x128xf32>
    %138 = arith.mulf %137, %134 : vector<1x128xf32>
    %139 = arith.select %136, %134, %138 : vector<1x128xi1>, vector<1x128xf32>
    %140 = arith.truncf %139 : vector<1x128xf32> to vector<1x128xbf16>
    %c0_123 = arith.constant 0 : index
    %c0_124 = arith.constant 0 : index
    %141 = vector.load %arg10[%c0_123, %c0_124] : memref<128x64xbf16, #tpu.memory_space<vmem>>, vector<128x64xbf16>
    %cst_125 = arith.constant dense<0.000000e+00> : vector<1x64xf32>
    %142 = tpu.matmul %140, %141, %cst_125 {dimension_numbers = #tpu.dot_dimension_numbers<[1], [0], [0], [1], [0, 0, 1, 1], [], []>} : vector<1x128xbf16>, vector<128x64xbf16>, vector<1x64xf32> -> vector<1x64xf32>
    %c0_126 = arith.constant 0 : index
    %c0_127 = arith.constant 0 : index
    %143 = vector.load %arg11[%c0_126, %c0_127] : memref<1x64xf32, #tpu.memory_space<vmem>>, vector<1x64xf32>
    %144 = arith.addf %142, %143 : vector<1x64xf32>
    %cst_128 = arith.constant 0.000000e+00 : f32
    %145 = vector.broadcast %cst_128 : f32 to vector<1x64xf32>
    %146 = arith.cmpf oge, %144, %145 : vector<1x64xf32>
    %cst_129 = arith.constant 1.000000e-01 : f32
    %147 = vector.broadcast %cst_129 : f32 to vector<1x64xf32>
    %148 = arith.mulf %147, %144 : vector<1x64xf32>
    %149 = arith.select %146, %144, %148 : vector<1x64xi1>, vector<1x64xf32>
    %c0_130 = arith.constant 0 : index
    %c0_131 = arith.constant 0 : index
    %150 = vector.load %arg12[%c0_130, %c0_131] : memref<1x64xf32, #tpu.memory_space<vmem>>, vector<1x64xf32>
    %151 = arith.mulf %149, %150 : vector<1x64xf32>
    %cst_132 = arith.constant dense<0.000000e+00> : vector<1xf32>
    %152 = vector.multi_reduction <add>, %151, %cst_132 [1] : vector<1x64xf32> to vector<1xf32>
    %153 = vector.shape_cast %152 : vector<1xf32> to vector<1x1xf32>
    %c0_133 = arith.constant 0 : index
    %c0_134 = arith.constant 0 : index
    %154 = vector.load %arg13[%c0_133, %c0_134] : memref<1x1xf32, #tpu.memory_space<vmem>>, vector<1x1xf32>
    %155 = arith.addf %153, %154 : vector<1x1xf32>
    %cst_135 = arith.constant 0.000000e+00 : f32
    %156 = vector.broadcast %cst_135 : f32 to vector<1x1xf32>
    %157 = arith.subf %156, %155 : vector<1x1xf32>
    %158 = math.exp %157 : vector<1x1xf32>
    %cst_136 = arith.constant 1.000000e+00 : f32
    %159 = vector.broadcast %cst_136 : f32 to vector<1x1xf32>
    %160 = arith.addf %159, %158 : vector<1x1xf32>
    %cst_137 = arith.constant 1.000000e+00 : f32
    %161 = vector.broadcast %cst_137 : f32 to vector<1x1xf32>
    %162 = arith.divf %161, %160 : vector<1x1xf32>
    %163 = vector.shape_cast %162 : vector<1x1xf32> to vector<1x1x1xf32>
    %c0_138 = arith.constant 0 : index
    %c0_139 = arith.constant 0 : index
    %c0_140 = arith.constant 0 : index
    %164 = vector.load %arg14[%c0_138, %c0_139, %c0_140] : memref<1x1x1xf32, #tpu.memory_space<vmem>>, vector<1x1x1xf32>
    tpu.vector_store %arg14[%c0_138, %c0_139, %c0_140], %163 {strides = array<i32>} : memref<1x1x1xf32, #tpu.memory_space<vmem>>, vector<1x1x1xf32>,
    return
  }
  func.func @transform_0(%arg0: i32) -> (i32, i32) {
    %c0_i32 = arith.constant 0 : i32
    %c0_i32_0 = arith.constant 0 : i32
    %c0_i32_1 = arith.constant 0 : i32
    return %c0_i32, %c0_i32_0 : i32, i32
  }
  func.func @transform_1(%arg0: i32) -> (i32, i32, i32, i32) {
    %c0_i32 = arith.constant 0 : i32
    %c0_i32_0 = arith.constant 0 : i32
    %c0_i32_1 = arith.constant 0 : i32
    %c0_i32_2 = arith.constant 0 : i32
    return %arg0, %c0_i32, %c0_i32_0, %c0_i32_1 : i32, i32, i32, i32
  }
  func.func @transform_2(%arg0: i32) -> (i32, i32) {
    %c0_i32 = arith.constant 0 : i32
    %c0_i32_0 = arith.constant 0 : i32
    %c0_i32_1 = arith.constant 0 : i32
    return %c0_i32, %c0_i32_0 : i32, i32
  }
  func.func @transform_3(%arg0: i32) -> (i32, i32) {
    %c0_i32 = arith.constant 0 : i32
    %c0_i32_0 = arith.constant 0 : i32
    %c0_i32_1 = arith.constant 0 : i32
    return %c0_i32, %c0_i32_0 : i32, i32
  }
  func.func @transform_4(%arg0: i32) -> (i32, i32) {
    %c0_i32 = arith.constant 0 : i32
    %c0_i32_0 = arith.constant 0 : i32
    %c0_i32_1 = arith.constant 0 : i32
    return %c0_i32, %c0_i32_0 : i32, i32
  }
  func.func @transform_5(%arg0: i32) -> (i32, i32) {
    %c0_i32 = arith.constant 0 : i32
    %c0_i32_0 = arith.constant 0 : i32
    %c0_i32_1 = arith.constant 0 : i32
    return %c0_i32, %c0_i32_0 : i32, i32
  }
  func.func @transform_6(%arg0: i32) -> (i32, i32) {
    %c0_i32 = arith.constant 0 : i32
    %c0_i32_0 = arith.constant 0 : i32
    %c0_i32_1 = arith.constant 0 : i32
    return %c0_i32, %c0_i32_0 : i32, i32
  }
  func.func @transform_7(%arg0: i32) -> (i32, i32) {
    %c0_i32 = arith.constant 0 : i32
    %c0_i32_0 = arith.constant 0 : i32
    %c0_i32_1 = arith.constant 0 : i32
    return %c0_i32, %c0_i32_0 : i32, i32
  }
  func.func @transform_8(%arg0: i32) -> (i32, i32) {
    %c0_i32 = arith.constant 0 : i32
    %c0_i32_0 = arith.constant 0 : i32
    %c0_i32_1 = arith.constant 0 : i32
    return %c0_i32, %c0_i32_0 : i32, i32
  }
  func.func @transform_9(%arg0: i32) -> (i32, i32) {
    %c0_i32 = arith.constant 0 : i32
    %c0_i32_0 = arith.constant 0 : i32
    %c0_i32_1 = arith.constant 0 : i32
    return %c0_i32, %c0_i32_0 : i32, i32
  }
  func.func @transform_10(%arg0: i32) -> (i32, i32) {
    %c0_i32 = arith.constant 0 : i32
    %c0_i32_0 = arith.constant 0 : i32
    %c0_i32_1 = arith.constant 0 : i32
    return %c0_i32, %c0_i32_0 : i32, i32
  }
  func.func @transform_11(%arg0: i32) -> (i32, i32) {
    %c0_i32 = arith.constant 0 : i32
    %c0_i32_0 = arith.constant 0 : i32
    %c0_i32_1 = arith.constant 0 : i32
    return %c0_i32, %c0_i32_0 : i32, i32
  }
  func.func @transform_12(%arg0: i32) -> (i32, i32) {
    %c0_i32 = arith.constant 0 : i32
    %c0_i32_0 = arith.constant 0 : i32
    %c0_i32_1 = arith.constant 0 : i32
    return %c0_i32, %c0_i32_0 : i32, i32
  }
  func.func @transform_13(%arg0: i32) -> (i32, i32, i32) {
    %c0_i32 = arith.constant 0 : i32
    %c0_i32_0 = arith.constant 0 : i32
    %c0_i32_1 = arith.constant 0 : i32
    return %arg0, %c0_i32, %c0_i32_0 : i32, i32, i32
  }
}

</mosaic_0001>

<bundles_post_ra>
// kernel: discriminator_forward.1
= control target key start
LH: loop header
LB: loop body
LE: loop exit
PB: predicated region body
PF: predicated region fallthrough
CT: control target
= control target key end

     0   :  { %s6641_s0 = inlined_call_operand.vmem [shape: f32[2,2], index: 0, kind: input, shape index: {}]   ;;  %s6642_s1 = inlined_call_operand.vmem [shape: f32[2,16,16,3], index: 1, kind: input, shape index: {}]   ;;  %s6643_s2 = inlined_call_operand.vmem [shape: bf16[27,32], index: 2, kind: input, shape index: {}]   ;;  %s6644_s3 = inlined_call_operand.vmem [shape: f32[1,32], index: 3, kind: input, shape index: {}]   ;;  %s6645_s4 = inlined_call_operand.vmem [shape: bf16[288,32], index: 4, kind: input, shape index: {}]   ;;  %s6646_s5 = inlined_call_operand.vmem [shape: f32[1,32], index: 5, kind: input, shape index: {}]   ;;  %s6647_s6 = inlined_call_operand.vmem [shape: bf16[512,128], index: 6, kind: input, shape index: {}]   ;;  %s6648_s7 = inlined_call_operand.vmem [shape: bf16[2,128], index: 7, kind: input, shape index: {}]   ;;  %s6649_s8 = inlined_call_operand.vmem [shape: f32[1,128], index: 8, kind: input, shape index: {}]   ;;  %s6650_s9 = inlined_call_operand.vmem [shape: bf16[128,64], index: 9, kind: input, shape index: {}]   ;;  %s6651_s10 = inlined_call_operand.vmem [shape: f32[1,64], index: 10, kind: input, shape index: {}]   ;;  %s6652_s11 = inlined_call_operand.vmem [shape: f32[1,64], index: 11, kind: input, shape index: {}]   ;;  %s6653_s12 = inlined_call_operand.<no memory space> [shape: f32[1,1], index: 12, kind: input, shape index: {}]   ;;  %s6654_s13 = inlined_call_operand.vmem [shape: f32[2,1,1], index: 13, kind: output, shape index: {}]  }
   0x1   :  { %v18_v0 = vstv %s6653_s12 }
   0x2   :  { %19 = vst [vmem:[#allocation6] sm:$0x1] %v18_v0 }
   0x3   :  { %20 = vsyncpa [#allocation8], 0  ;;  %s5161_s27 = smov 0  }
   0x4 LB: > { %s5167_s28 = sadd.s32 4294967295, %s5071_s27   ;;  %p3875_p0 = scmp.ge.s32.totalorder %s5071_s27, 1  ;;  %s5071_s27 = sphi %s5161_s27, %s26_s27  }
   0x5   : > { %p335_p1 = scmp.lt.s32.totalorder %s5071_s27, 3  ;;  %s348_s30 = sshll.u32 %s6641_s0, 4  ;;  %s349_s30 = int_to_ptr.vmem [resolvable:$true] %s348_s30 }
   0x6   : > { %p4161_p3 = scmp.eq.s32.totalorder %s5167_s28, 0  ;;  %s5046_s15 = scalar_lea.vmem %s349_s30, 32 }
   0x7   : > { %p5174_p2 = pnand %p3875_p0, %p335_p1  ;;  %p5047_p6 = scmp.ne.s32.totalorder %s349_s30, %s5046_s15 }
   0x8   : > { %p5054_p10 = scmp.lt.s32.totalorder %s349_s30, %s349_s30  ;;  %p5055_p11 = scmp.lt.s32.totalorder %s5046_s15, %s5046_s15 }
   0x9   : > { %p4157_p4 = pneg %p5174_p2 }
   0xa   : > { %p5056_p12 = por %p5055_p11, %p5054_p10 }
   0xb   : > { %p4158_p5 = pnand %p4161_p3, %p4157_p4 }
   0xd   : > { %p5048_p7 = pneg %p4158_p5 }
   0xf   : > { %p5049_p8 = pnand %p5048_p7, %p5047_p6 }
  0x11   : > { %p5050_p9 = pneg %p5049_p8 }
  0x13   : > { %p5057_p13 = pnand %p5056_p12, %p5050_p9 }
  0x15   : > { %5060 = shalt.err (!%p5057_p13)
}
  0x16   : > { %s5073_s16 = smov [#allocation7]   ;;  %402 = sbr.rel (%p5174_p2) target bundleno = 1803 (0x70b), region = 72 }
  0x17   : > { %4160 = dma.vmem_to_smem (!%p4158_p5), %s349_s30, 32, %s5073_s16, [#allocation8]  }
  0x1d   : > { %5066 = dma.done.wait (%p4161_p3), [#allocation8], 32  }
  0x1e   : > { %5068 = vsyncadd (%p4161_p3), [#allocation8], 4294967264 }
  0x1f   : > { %408 = sfence }
  0x20   : > { %vm454_vm0 = vcmask 23552   ;;  %vm457_vm1 = vcmask 17408   ;;  %vm463_vm2 = vcmask 16384   ;;  %v5074_v1 = vmov 0.0   ;;  %p445_p0 = scmp.lt.s32.totalorder %s5167_s28, 1  ;;  %s5075_s22 = smov 3  }
  0x21   : > { %455 = vst.msk [vmem:[#allocation2] sm:$0xff] %vm454_vm0, %v5074_v1  ;;  %456 = vst.msk [vmem:[#allocation2 + $0x8] sm:$0xff] %vm454_vm0, %v5074_v1  ;;  %s5076_s23 = smov 6   ;;  %s5077_s24 = smov 9   ;;  %vm2228_vm3 = vcmask 1044480   ;;  %vm2229_vm4 = vcmask 1045504  }
  0x22   : > { %458 = vst.msk [vmem:[#allocation2 + $0x10] sm:$0x3] %vm457_vm1, %v5074_v1  ;;  %462 = vst.msk [vmem:[#allocation2 + $0x1a8] sm:$0x3] %vm457_vm1, %v5074_v1  ;;  %s5273_s17 = scalar_select %p445_p0, %s5167_s28, 1  ;;  %v5080_v49 = vmov 65535  }
  0x23   : > { %460 = vst.msk [vmem:[#allocation2 + $0x198] sm:$0xff] %vm454_vm0, %v5074_v1  ;;  %461 = vst.msk [vmem:[#allocation2 + $0x1a0] sm:$0xff] %vm454_vm0, %v5074_v1  ;;  %s5078_s25 = smov 12   ;;  %s5079_s26 = smov 15   ;;  %v2230_v50 = vsel %vm2228_vm3, 4294967295, %v5080_v49  ;;  %v4976_v53 = vld [vmem:[%s6643_s2] sm:$0xff]  }
  0x24   : > { %465 = vst.msk [vmem:[#allocation2 + $0x18] sm:$0x1] %vm463_vm2, %v5074_v1  ;;  %466 = vst.msk [vmem:[#allocation2 + $0x30] sm:$0x1] %vm463_vm2, %v5074_v1  ;;  %s3967_s18 = sshll.u32 %s5273_s17, 8  ;;  %v2231_v54 = vsel %vm2229_vm4, %v2230_v50, 0  ;;  %4085 = vmatprep.subr.bf16.mxu0 %v4976_v53 }
  0x25   : > { %467 = vst.msk [vmem:[#allocation2 + $0x48] sm:$0x1] %vm463_vm2, %v5074_v1  ;;  %468 = vst.msk [vmem:[#allocation2 + $0x60] sm:$0x1] %vm463_vm2, %v5074_v1  ;;  %s5279_s21 = scalar_lea.vmem %s6642_s1, %s3967_s18  ;;  %s5081_s30 = smov 18   ;;  %4086 = vmatpush3.bf16.msra.mxu0 %v4976_v53  ;;  %vm1910_vm5 = vcmask 48128  }
  0x26   : > { %469 = vst.msk [vmem:[#allocation2 + $0x78] sm:$0x1] %vm463_vm2, %v5074_v1  ;;  %470 = vst.msk [vmem:[#allocation2 + $0x90] sm:$0x1] %vm463_vm2, %v5074_v1  ;;  %v500_v2 = vld [vmem:[%s5279_s21] sm:$0xff]  ;;  %v501_v3 = vld [vmem:[%s5279_s21 + $0x8] sm:$0xff] }
  0x27   : > { %471 = vst.msk [vmem:[#allocation2 + $0xa8] sm:$0x1] %vm463_vm2, %v5074_v1  ;;  %472 = vst.msk [vmem:[#allocation2 + $0xc0] sm:$0x1] %vm463_vm2, %v5074_v1  ;;  %v502_v4 = vld [vmem:[%s5279_s21 + $0x10] sm:$0xff]  ;;  %v503_v10 = vld [vmem:[%s5279_s21 + $0x18] sm:$0xff] }
  0x28   : > { %473 = vst.msk [vmem:[#allocation2 + $0xd8] sm:$0x1] %vm463_vm2, %v5074_v1  ;;  %474 = vst.msk [vmem:[#allocation2 + $0xf0] sm:$0x1] %vm463_vm2, %v5074_v1  ;;  %v629_v5 = vld [vmem:[#allocation2 + $0x2] sm:$0xff]  ;;  %v506_v14 = vld [vmem:[%s5279_s21 + $0x30] sm:$0xff] }
  0x29   : > { %475 = vst.msk [vmem:[#allocation2 + $0x108] sm:$0x1] %vm463_vm2, %v5074_v1  ;;  %476 = vst.msk [vmem:[#allocation2 + $0x120] sm:$0x1] %vm463_vm2, %v5074_v1  ;;  %v597_v6 = vld [vmem:[#allocation2 + $0x1] sm:$0xff]  ;;  %v598_v7 = vld [vmem:[#allocation2 + $0x9] sm:$0xff] }
  0x2a   : > { %477 = vst.msk [vmem:[#allocation2 + $0x138] sm:$0x1] %vm463_vm2, %v5074_v1  ;;  %478 = vst.msk [vmem:[#allocation2 + $0x150] sm:$0x1] %vm463_vm2, %v5074_v1  ;;  %v4186_v9 = vpack.i.bf16 %v598_v7, %v597_v6  ;;  %v504_v11 = vld [vmem:[%s5279_s21 + $0x20] sm:$0xff]  ;;  %v505_v13 = vld [vmem:[%s5279_s21 + $0x28] sm:$0xff] }
  0x2b   : > { %479 = vst.msk [vmem:[#allocation2 + $0x168] sm:$0x1] %vm463_vm2, %v5074_v1  ;;  %480 = vst.msk [vmem:[#allocation2 + $0x180] sm:$0x1] %vm463_vm2, %v5074_v1  ;;  %v507_v15 = vld [vmem:[%s5279_s21 + $0x38] sm:$0xff]  ;;  %v508_v16 = vld [vmem:[%s5279_s21 + $0x40] sm:$0xff] }
  0x2c   : > { %483 = vst.msk [vmem:[#allocation2 + $0x29] sm:$0x1] %vm463_vm2, %v5074_v1  ;;  %484 = vst.msk [vmem:[#allocation2 + $0x41] sm:$0x1] %vm463_vm2, %v5074_v1  ;;  %4187 = vrot.lane.b32.xlu0 %v4186_v9, %s5075_s22  ;;  %v509_v17 = vld [vmem:[%s5279_s21 + $0x48] sm:$0xff]  ;;  %v510_v18 = vld [vmem:[%s5279_s21 + $0x50] sm:$0xff] }
  0x2d   : > { %485 = vst.msk [vmem:[#allocation2 + $0x59] sm:$0x1] %vm463_vm2, %v5074_v1  ;;  %486 = vst.msk [vmem:[#allocation2 + $0x71] sm:$0x1] %vm463_vm2, %v5074_v1  ;;  %v511_v19 = vld [vmem:[%s5279_s21 + $0x58] sm:$0xff]  ;;  %v512_v20 = vld [vmem:[%s5279_s21 + $0x60] sm:$0xff] }
  0x2e   : > { %487 = vst.msk [vmem:[#allocation2 + $0x89] sm:$0x1] %vm463_vm2, %v5074_v1  ;;  %488 = vst.msk [vmem:[#allocation2 + $0xa1] sm:$0x1] %vm463_vm2, %v5074_v1  ;;  %v513_v21 = vld [vmem:[%s5279_s21 + $0x68] sm:$0xff]  ;;  %v514_v22 = vld [vmem:[%s5279_s21 + $0x70] sm:$0xff] }
  0x2f   : > { %489 = vst.msk [vmem:[#allocation2 + $0xb9] sm:$0x1] %vm463_vm2, %v5074_v1  ;;  %490 = vst.msk [vmem:[#allocation2 + $0xd1] sm:$0x1] %vm463_vm2, %v5074_v1  ;;  %v515_v23 = vld [vmem:[%s5279_s21 + $0x78] sm:$0xff]  ;;  %v516_v24 = vld [vmem:[%s5279_s21 + $0x80] sm:$0xff] }
  0x30   : > { %491 = vst.msk [vmem:[#allocation2 + $0xe9] sm:$0x1] %vm463_vm2, %v5074_v1  ;;  %492 = vst.msk [vmem:[#allocation2 + $0x101] sm:$0x1] %vm463_vm2, %v5074_v1  ;;  %v517_v25 = vld [vmem:[%s5279_s21 + $0x88] sm:$0xff]  ;;  %v518_v51 = vld [vmem:[%s5279_s21 + $0x90] sm:$0xff] }
  0x31   : > { %493 = vst.msk [vmem:[#allocation2 + $0x119] sm:$0x1] %vm463_vm2, %v5074_v1  ;;  %494 = vst.msk [vmem:[#allocation2 + $0x131] sm:$0x1] %vm463_vm2, %v5074_v1  ;;  %v519_v52 = vld [vmem:[%s5279_s21 + $0x98] sm:$0xff]  ;;  %v520_v57 = vld [vmem:[%s5279_s21 + $0xa0] sm:$0xff] }
  0x32   : > { %495 = vst.msk [vmem:[#allocation2 + $0x149] sm:$0x1] %vm463_vm2, %v5074_v1  ;;  %496 = vst.msk [vmem:[#allocation2 + $0x161] sm:$0x1] %vm463_vm2, %v5074_v1  ;;  %v4977_v56 = vld [vmem:[%s6643_s2 + $0x8] sm:$0x3f]  }
  0x33   : > { %497 = vst.msk [vmem:[#allocation2 + $0x179] sm:$0x1] %vm463_vm2, %v5074_v1  ;;  %498 = vst.msk [vmem:[#allocation2 + $0x191] sm:$0x1] %vm463_vm2, %v5074_v1  ;;  %v521_v58 = vld [vmem:[%s5279_s21 + $0xa8] sm:$0xff]  ;;  %v2233_v59 = vand.u32 %v4977_v56, %v2231_v54  ;;  %s5082_s16 = smov 21  }
  0x34   : > { %482 = vst.msk [vmem:[#allocation2 + $0x11] sm:$0x1] %vm463_vm2, %v5074_v1  ;;  %499 = vst.msk [vmem:[#allocation2 + $0x1a9] sm:$0x1] %vm463_vm2, %v5074_v1  ;;  %s5083_s18 = smov 24   ;;  %v530_v50 = vld [vmem:[%s5279_s21 + $0xf0] sm:$0xff] }
  0x35   : > { %464 = vst.msk [vmem:[#allocation2] sm:$0x1] %vm463_vm2, %v5074_v1  ;;  %481 = vst.msk [vmem:[#allocation2 + $0x198] sm:$0x1] %vm463_vm2, %v5074_v1  ;;  %4087 = vmatprep.subr.bf16.mxu0 %v2233_v59  ;;  %vm1943_vm6 = vcmask 72704   ;;  %vm1976_vm7 = vcmask 97280  }
  0x36   : > { %533 = vst.msk [vmem:[#allocation2 + $0x19] sm:$0xff] %vm454_vm0, %v500_v2  ;;  %534 = vst.msk [vmem:[#allocation2 + $0x21] sm:$0xff] %vm454_vm0, %v501_v3  ;;  %4088 = vmatpush3.bf16.msra.mxu0 %v2233_v59  ;;  %v522_v2 = vld [vmem:[%s5279_s21 + $0xb0] sm:$0xff]  ;;  %v523_v3 = vld [vmem:[%s5279_s21 + $0xb8] sm:$0xff]  ;;  %vm2009_vm8 = vcmask 121856   ;;  %vm2042_vm9 = vcmask 146432  }
  0x37   : > { %535 = vst.msk [vmem:[#allocation2 + $0x31] sm:$0xff] %vm454_vm0, %v502_v4  ;;  %536 = vst.msk [vmem:[#allocation2 + $0x39] sm:$0xff] %vm454_vm0, %v503_v10  ;;  %v524_v10 = vld [vmem:[%s5279_s21 + $0xc0] sm:$0xff]  ;;  %vm2075_vm10 = vcmask 171008   ;;  %vm2108_vm11 = vcmask 195584   ;;  %vm2179_vm12 = vcmask 220160  }
  0x38   : > { %537 = vst.msk [vmem:[#allocation2 + $0x49] sm:$0xff] %vm454_vm0, %v504_v11  ;;  %538 = vst.msk [vmem:[#allocation2 + $0x51] sm:$0xff] %vm454_vm0, %v505_v13  ;;  %v525_v13 = vld [vmem:[%s5279_s21 + $0xc8] sm:$0xff]  ;;  %vm2508_vm13 = vcmask 261120   ;;  %vm2565_vm14 = vcmask 254976   ;;  %vm2570_vm15 = vcmask 253952  }
  0x39   : > { %539 = vst.msk [vmem:[#allocation2 + $0x61] sm:$0xff] %vm454_vm0, %v506_v14  ;;  %540 = vst.msk [vmem:[#allocation2 + $0x69] sm:$0xff] %vm454_vm0, %v507_v15  ;;  %s5086_s29 = smov 96  }
  0x3a   : > { %541 = vst.msk [vmem:[#allocation2 + $0x79] sm:$0xff] %vm454_vm0, %v508_v16  ;;  %542 = vst.msk [vmem:[#allocation2 + $0x81] sm:$0xff] %vm454_vm0, %v509_v17 }
  0x3b   : > { %v630_v8 = vld [vmem:[#allocation2 + $0xa] sm:$0xff]  ;;  %543 = vst.msk [vmem:[#allocation2 + $0x91] sm:$0xff] %vm454_vm0, %v510_v18  ;;  %544 = vst.msk [vmem:[#allocation2 + $0x99] sm:$0xff] %vm454_vm0, %v511_v19 }
  0x3c   : > { %v4191_v12 = vpack.i.bf16 %v630_v8, %v629_v5  ;;  %545 = vst.msk [vmem:[#allocation2 + $0xa9] sm:$0xff] %vm454_vm0, %v512_v20  ;;  %546 = vst.msk [vmem:[#allocation2 + $0xb1] sm:$0xff] %vm454_vm0, %v513_v21 }
  0x3d   : > { %547 = vst.msk [vmem:[#allocation2 + $0xc1] sm:$0xff] %vm454_vm0, %v514_v22  ;;  %548 = vst.msk [vmem:[#allocation2 + $0xc9] sm:$0xff] %vm454_vm0, %v515_v23  ;;  %v631_v26 = vld [vmem:[#allocation2 + $0x1a] sm:$0xff]  ;;  %v632_v27 = vld [vmem:[#allocation2 + $0x22] sm:$0xff] }
  0x3e   : > { %4192 = vrot.lane.b32.xlu1 %v4191_v12, %s5076_s23  ;;  %v599_v28 = vld [vmem:[#allocation2 + $0x19] sm:$0xff]  ;;  %549 = vst.msk [vmem:[#allocation2 + $0xd9] sm:$0xff] %vm454_vm0, %v516_v24  ;;  %550 = vst.msk [vmem:[#allocation2 + $0xe1] sm:$0xff] %vm454_vm0, %v517_v25  ;;  %v4201_v29 = vpack.i.bf16 %v632_v27, %v631_v26  ;;  %v600_v30 = vld [vmem:[#allocation2 + $0x21] sm:$0xff] }
  0x3f   : > { %v5319_v31 = vld [vmem:[#allocation2 + $0x30] sm:$0xff]  ;;  %v5321_v32 = vld [vmem:[#allocation2 + $0x18] sm:$0xff]  ;;  %v4196_v33 = vpack.i.bf16 %v600_v30, %v599_v28  ;;  %v5325_v35 = vld [vmem:[#allocation2 + $0x20] sm:$0xff]  ;;  %551 = vst.msk [vmem:[#allocation2 + $0xf1] sm:$0xff] %vm454_vm0, %v518_v51 }
  0x40   : > { %v5323_v34 = vld [vmem:[#allocation2 + $0x38] sm:$0xff]  ;;  %v4206_v37 = vpack.i.bf16 %v5325_v35, %v5321_v32  ;;  %v5337_v44 = vld [vmem:[#allocation2 + $0x48] sm:$0xff]  ;;  %v5339_v45 = vld [vmem:[#allocation2 + $0x50] sm:$0xff]  ;;  %552 = vst.msk [vmem:[#allocation2 + $0xf9] sm:$0xff] %vm454_vm0, %v519_v52 }
  0x41   : > { %v4211_v36 = vpack.i.bf16 %v5323_v34, %v5319_v31  ;;  %4197 = vrot.lane.b32.xlu0 %v4196_v33, %s5075_s22  ;;  %v695_v38 = vld [vmem:[#allocation2 + $0x31] sm:$0xff]  ;;  %v696_v39 = vld [vmem:[#allocation2 + $0x39] sm:$0xff]  ;;  %v4241_v46 = vpack.i.bf16 %v5339_v45, %v5337_v44  ;;  %v792_v47 = vld [vmem:[#allocation2 + $0x49] sm:$0xff]  ;;  %553 = vst.msk [vmem:[#allocation2 + $0x109] sm:$0xff] %vm454_vm0, %v520_v57 }
  0x42   : > { %4202 = vrot.lane.b32.xlu1 %v4201_v29, %s5076_s23  ;;  %v4221_v40 = vpack.i.bf16 %v696_v39, %v695_v38  ;;  %v727_v41 = vld [vmem:[#allocation2 + $0x32] sm:$0xff]  ;;  %v728_v42 = vld [vmem:[#allocation2 + $0x3a] sm:$0xff]  ;;  %554 = vst.msk [vmem:[#allocation2 + $0x111] sm:$0xff] %vm454_vm0, %v521_v58  ;;  %v824_v60 = vld [vmem:[#allocation2 + $0x4a] sm:$0xff] }
  0x43   : > { %v4231_v43 = vpack.i.bf16 %v728_v42, %v727_v41  ;;  %v793_v48 = vld [vmem:[#allocation2 + $0x51] sm:$0xff]  ;;  %v5365_v63 = vld [vmem:[#allocation2 + $0x60] sm:$0xff]  ;;  %v5367_v0 = vld [vmem:[#allocation2 + $0x68] sm:$0xff]  ;;  %555 = vst.msk [vmem:[#allocation2 + $0x121] sm:$0xff] %vm454_vm0, %v522_v2 }
  0x44   : > { %v4251_v55 = vpack.i.bf16 %v793_v48, %v792_v47  ;;  %v825_v61 = vld [vmem:[#allocation2 + $0x52] sm:$0xff]  ;;  %556 = vst.msk [vmem:[#allocation2 + $0x129] sm:$0xff] %vm454_vm0, %v523_v3  ;;  %v699_v4 = vld [vmem:[#allocation2 + $0x61] sm:$0xff]  ;;  %v700_v5 = vld [vmem:[#allocation2 + $0x69] sm:$0xff]  ;;  %v4291_v6 = vpack.i.bf16 %v5367_v0, %v5365_v63 }
  0x45   : > { %4207 = vrot.lane.b32.xlu0 %v4206_v37, %s5077_s24  ;;  %v4266_v62 = vpack.i.bf16 %v825_v61, %v824_v60  ;;  %v731_v7 = vld [vmem:[#allocation2 + $0x62] sm:$0xff]  ;;  %v732_v8 = vld [vmem:[#allocation2 + $0x6a] sm:$0xff]  ;;  %v4301_v9 = vpack.i.bf16 %v700_v5, %v699_v4  ;;  %v5382_v11 = vld [vmem:[#allocation2 + $0x78] sm:$0xff]  ;;  %557 = vst.msk [vmem:[#allocation2 + $0x139] sm:$0xff] %vm454_vm0, %v524_v10 }
  0x46   : > { %4212 = vrot.lane.b32.xlu1 %v4211_v36, %s5077_s24  ;;  %v5384_v12 = vld [vmem:[#allocation2 + $0x80] sm:$0xff]  ;;  %v4311_v14 = vpack.i.bf16 %v732_v8, %v731_v7  ;;  %558 = vst.msk [vmem:[#allocation2 + $0x141] sm:$0xff] %vm454_vm0, %v525_v13  ;;  %v526_v22 = vld [vmem:[%s5279_s21 + $0xd0] sm:$0xff]  ;;  %v672_v24 = vld [vmem:[#allocation2 + $0x98] sm:$0xff] }
  0x47   : > { %v796_v15 = vld [vmem:[#allocation2 + $0x79] sm:$0xff]  ;;  %v797_v16 = vld [vmem:[#allocation2 + $0x81] sm:$0xff]  ;;  %v4321_v17 = vpack.i.bf16 %v5384_v12, %v5382_v11  ;;  %v671_v23 = vld [vmem:[#allocation2 + $0x90] sm:$0xff]  ;;  %559 = vst.msk [vmem:[#allocation2 + $0x151] sm:$0xff] %vm454_vm0, %v526_v22 }
  0x48   : > { %v4331_v18 = vpack.i.bf16 %v797_v16, %v796_v15  ;;  %v828_v19 = vld [vmem:[#allocation2 + $0x7a] sm:$0xff]  ;;  %v829_v20 = vld [vmem:[#allocation2 + $0x82] sm:$0xff]  ;;  %v4371_v26 = vpack.i.bf16 %v672_v24, %v671_v23  ;;  %v703_v27 = vld [vmem:[#allocation2 + $0x91] sm:$0xff]  ;;  %563 = vst.msk [vmem:[#allocation2 + $0x181] sm:$0xff] %vm454_vm0, %v530_v50 }
  0x49   : > { %4217 = vrot.lane.b32.xlu0 %v4196_v33, %s5078_s25  ;;  %v4346_v21 = vpack.i.bf16 %v829_v20, %v828_v19  ;;  %v527_v25 = vld [vmem:[%s5279_s21 + $0xd8] sm:$0xff]  ;;  %v529_v37 = vld [vmem:[%s5279_s21 + $0xe8] sm:$0xff]  ;;  %v675_v52 = vld [vmem:[#allocation2 + $0xc0] sm:$0xff]  ;;  %2564 = vst.msk [vmem:[#allocation3] sm:$0xff] %vm2508_vm13, %v5074_v1 }
  0x4a   : > { %4222 = vrot.lane.b32.xlu1 %v4221_v40, %s5078_s25  ;;  %560 = vst.msk [vmem:[#allocation2 + $0x159] sm:$0xff] %vm454_vm0, %v527_v25  ;;  %v704_v28 = vld [vmem:[#allocation2 + $0x99] sm:$0xff]  ;;  %562 = vst.msk [vmem:[#allocation2 + $0x171] sm:$0xff] %vm454_vm0, %v529_v37  ;;  %v768_v39 = vld [vmem:[#allocation2 + $0xa8] sm:$0xff] }
  0x4b   : > { %v735_v30 = vld [vmem:[#allocation2 + $0x92] sm:$0xff]  ;;  %v736_v33 = vld [vmem:[#allocation2 + $0x9a] sm:$0xff]  ;;  %v800_v42 = vld [vmem:[#allocation2 + $0xa9] sm:$0xff]  ;;  %2568 = vst.msk [vmem:[#allocation3 + $0x90] sm:$0xff] %vm2508_vm13, %v5074_v1 }
  0x4c   : > { %v4391_v38 = vpack.i.bf16 %v736_v33, %v735_v30  ;;  %v832_v47 = vld [vmem:[#allocation2 + $0xaa] sm:$0xff]  ;;  %v833_v48 = vld [vmem:[#allocation2 + $0xb2] sm:$0xff]  ;;  %v739_v58 = vld [vmem:[#allocation2 + $0xc2] sm:$0xff]  ;;  %2566 = vst.msk [vmem:[#allocation3 + $0x8] sm:$0x3] %vm2565_vm14, %v5074_v1 }
  0x4d   : > { %4227 = vrot.lane.b32.xlu0 %v4201_v29, %s5079_s26  ;;  %v4381_v29 = vpack.i.bf16 %v704_v28, %v703_v27  ;;  %v4426_v49 = vpack.i.bf16 %v833_v48, %v832_v47  ;;  %v531_v51 = vld [vmem:[%s5279_s21 + $0xf8] sm:$0xff]  ;;  %v676_v53 = vld [vmem:[#allocation2 + $0xc8] sm:$0xff]  ;;  %v679_v19 = vld [vmem:[#allocation2 + $0xf0] sm:$0xff]  ;;  %2569 = vst.msk [vmem:[#allocation3 + $0x98] sm:$0x3] %vm2565_vm14, %v5074_v1 }
  0x4e   : > { %4232 = vrot.lane.b32.xlu1 %v4231_v43, %s5079_s26  ;;  %564 = vst.msk [vmem:[#allocation2 + $0x189] sm:$0xff] %vm454_vm0, %v531_v51  ;;  %v4451_v54 = vpack.i.bf16 %v676_v53, %v675_v52  ;;  %v708_v56 = vld [vmem:[#allocation2 + $0xc9] sm:$0xff]  ;;  %v772_v61 = vld [vmem:[#allocation2 + $0xd8] sm:$0xff]  ;;  %v565_v25 = vld [vmem:[#allocation2] sm:$0xff] }
  0x4f   : > { %v740_v59 = vld [vmem:[#allocation2 + $0xca] sm:$0xff]  ;;  %v804_v5 = vld [vmem:[#allocation2 + $0xd9] sm:$0xff]  ;;  %2581 = vst.msk [vmem:[#allocation3 + $0x9] sm:$0x1] %vm2570_vm15, %v5074_v1  ;;  %2582 = vst.msk [vmem:[#allocation3 + $0x19] sm:$0x1] %vm2570_vm15, %v5074_v1 }
  0x50   : > { %v4471_v60 = vpack.i.bf16 %v740_v59, %v739_v58  ;;  %v836_v13 = vld [vmem:[#allocation2 + $0xda] sm:$0xff]  ;;  %v566_v24 = vld [vmem:[#allocation2 + $0x8] sm:$0xff]  ;;  %v777_v48 = vld [vmem:[#allocation2 + $0x110] sm:$0xff]  ;;  %2571 = vst.msk [vmem:[#allocation3] sm:$0x1] %vm2570_vm15, %v5074_v1 }
  0x51   : > { %4237 = vrot.lane.b32.xlu0 %v4211_v36, %s5081_s30  ;;  %v528_v36 = vld [vmem:[%s5279_s21 + $0xe0] sm:$0xff]  ;;  %v680_v20 = vld [vmem:[#allocation2 + $0xf8] sm:$0xff]  ;;  %v776_v47 = vld [vmem:[#allocation2 + $0x108] sm:$0xff]  ;;  %2572 = vst.msk [vmem:[#allocation3 + $0x10] sm:$0x1] %vm2570_vm15, %v5074_v1  ;;  %s5084_s21 = smov 32  }
  0x52   : > { %4242 = vrot.lane.b32.xlu1 %v4241_v46, %s5081_s30  ;;  %561 = vst.msk [vmem:[#allocation2 + $0x169] sm:$0xff] %vm454_vm0, %v528_v36  ;;  %v711_v36 = vld [vmem:[#allocation2 + $0xf1] sm:$0xff]  ;;  %v712_v37 = vld [vmem:[#allocation2 + $0xf9] sm:$0xff]  ;;  %v5504_v58 = vpack.i.bf16 %v777_v48, %v776_v47 }
  0x53   : > { %2573 = vst.msk [vmem:[#allocation3 + $0x20] sm:$0x1] %vm2570_vm15, %v5074_v1  ;;  %2574 = vst.msk [vmem:[#allocation3 + $0x30] sm:$0x1] %vm2570_vm15, %v5074_v1 }
  0x54   : > { %2575 = vst.msk [vmem:[#allocation3 + $0x40] sm:$0x1] %vm2570_vm15, %v5074_v1  ;;  %2576 = vst.msk [vmem:[#allocation3 + $0x50] sm:$0x1] %vm2570_vm15, %v5074_v1 }
  0x55   : > { %4247 = vrot.lane.b32.xlu0 %v4221_v40, %s5082_s16  ;;  %2577 = vst.msk [vmem:[#allocation3 + $0x60] sm:$0x1] %vm2570_vm15, %v5074_v1  ;;  %2578 = vst.msk [vmem:[#allocation3 + $0x70] sm:$0x1] %vm2570_vm15, %v5074_v1 }
  0x56   : > { %4252 = vrot.lane.b32.xlu1 %v4251_v55, %s5082_s16  ;;  %2579 = vst.msk [vmem:[#allocation3 + $0x80] sm:$0x1] %vm2570_vm15, %v5074_v1  ;;  %2580 = vst.msk [vmem:[#allocation3 + $0x90] sm:$0x1] %vm2570_vm15, %v5074_v1 }
  0x57   : > { %2583 = vst.msk [vmem:[#allocation3 + $0x29] sm:$0x1] %vm2570_vm15, %v5074_v1  ;;  %2584 = vst.msk [vmem:[#allocation3 + $0x39] sm:$0x1] %vm2570_vm15, %v5074_v1 }
  0x58   : > { %2585 = vst.msk [vmem:[#allocation3 + $0x49] sm:$0x1] %vm2570_vm15, %v5074_v1  ;;  %2586 = vst.msk [vmem:[#allocation3 + $0x59] sm:$0x1] %vm2570_vm15, %v5074_v1 }
  0x59   : > { %4257 = vrot.lane.b32.xlu0 %v4231_v43, %s5083_s18  ;;  %2587 = vst.msk [vmem:[#allocation3 + $0x69] sm:$0x1] %vm2570_vm15, %v5074_v1  ;;  %2588 = vst.msk [vmem:[#allocation3 + $0x79] sm:$0x1] %vm2570_vm15, %v5074_v1 }
  0x5a   : > { %4262 = vrot.lane.b32.xlu1 %v4221_v40, %s5075_s22  ;;  %v769_v40 = vld [vmem:[#allocation2 + $0xb0] sm:$0xff]  ;;  %2589 = vst.msk [vmem:[#allocation3 + $0x89] sm:$0x1] %vm2570_vm15, %v5074_v1  ;;  %2590 = vst.msk [vmem:[#allocation3 + $0x99] sm:$0x1] %vm2570_vm15, %v5074_v1 }
  0x5b   : > { %v4401_v41 = vpack.i.bf16 %v769_v40, %v768_v39 }
  0x5d   : > { %4267 = vrot.lane.b32.xlu0 %v4266_v62, %s5083_s18 }
  0x5e   : > { %4272 = vrot.lane.b32.xlu1 %v4251_v55, %s5075_s22 }
  0x61   : > { %4277 = vrot.lane.b32.xlu0 %v4231_v43, %s5076_s23  ;;  %v801_v43 = vld [vmem:[#allocation2 + $0xb1] sm:$0xff] }
  0x62   : > { %4282 = vrot.lane.b32.xlu1 %v4266_v62, %s5076_s23 }
  0x65   : > { %4287 = vrot.lane.b32.xlu0 %v4241_v46, %s5077_s24  ;;  %v4411_v46 = vpack.i.bf16 %v801_v43, %v800_v42 }
  0x66   : > { %4292 = vrot.lane.b32.xlu1 %v4291_v6, %s5077_s24 }
  0x69   : > { %4297 = vrot.lane.b32.xlu0 %v4251_v55, %s5078_s25  ;;  %v707_v55 = vld [vmem:[#allocation2 + $0xc1] sm:$0xff] }
  0x6a   : > { %4302 = vrot.lane.b32.xlu1 %v4301_v9, %s5078_s25  ;;  %v4461_v57 = vpack.i.bf16 %v708_v56, %v707_v55  ;;  %v5496_v56 = vpack.i.bf16 %v712_v37, %v711_v36 }
  0x6d   : > { %4307 = vrot.lane.b32.xlu0 %v4266_v62, %s5079_s26  ;;  %v773_v62 = vld [vmem:[#allocation2 + $0xe0] sm:$0xff] }
  0x6e   : > { %4312 = vrot.lane.b32.xlu1 %v4311_v14, %s5079_s26  ;;  %v5440_v3 = vpack.i.bf16 %v773_v62, %v772_v61 }
  0x71   : > { %4317 = vrot.lane.b32.xlu0 %v4291_v6, %s5081_s30  ;;  %v805_v6 = vld [vmem:[#allocation2 + $0xe1] sm:$0xff] }
  0x72   : > { %4322 = vrot.lane.b32.xlu1 %v4321_v17, %s5081_s30  ;;  %v5445_v7 = vpack.i.bf16 %v805_v6, %v804_v5 }
  0x75   : > { %4327 = vrot.lane.b32.xlu0 %v4301_v9, %s5082_s16 }
  0x76   : > { %4332 = vrot.lane.b32.xlu1 %v4331_v18, %s5082_s16 }
  0x79   : > { %4337 = vrot.lane.b32.xlu0 %v4311_v14, %s5083_s18 }
  0x7a   : > { %4342 = vrot.lane.b32.xlu1 %v4301_v9, %s5075_s22 }
  0x7d   : > { %4347 = vrot.lane.b32.xlu0 %v4346_v21, %s5083_s18 }
  0x7e   : > { %4352 = vrot.lane.b32.xlu1 %v4331_v18, %s5075_s22 }
  0x81   : > { %4357 = vrot.lane.b32.xlu0 %v4311_v14, %s5076_s23  ;;  %v837_v14 = vld [vmem:[#allocation2 + $0xe2] sm:$0xff] }
  0x82   : > { %4362 = vrot.lane.b32.xlu1 %v4346_v21, %s5076_s23  ;;  %v5459_v16 = vpack.i.bf16 %v837_v14, %v836_v13 }
  0x85   : > { %4367 = vrot.lane.b32.xlu0 %v4321_v17, %s5077_s24 }
  0x86   : > { %4372 = vrot.lane.b32.xlu1 %v4371_v26, %s5077_s24 }
  0x89   : > { %4377 = vrot.lane.b32.xlu0 %v4331_v18, %s5078_s25 }
  0x8a   : > { %4382 = vrot.lane.b32.xlu1 %v4381_v29, %s5078_s25 }
  0x8d   : > { %4387 = vrot.lane.b32.xlu0 %v4346_v21, %s5079_s26 }
  0x8e   : > { %4392 = vrot.lane.b32.xlu1 %v4391_v38, %s5079_s26 }
  0x91   : > { %4397 = vrot.lane.b32.xlu0 %v4371_v26, %s5081_s30 }
  0x92   : > { %4402 = vrot.lane.b32.xlu1 %v4401_v41, %s5081_s30 }
  0x95   : > { %4407 = vrot.lane.b32.xlu0 %v4381_v29, %s5082_s16 }
  0x96   : > { %4412 = vrot.lane.b32.xlu1 %v4411_v46, %s5082_s16 }
  0x99   : > { %4417 = vrot.lane.b32.xlu0 %v4391_v38, %s5083_s18 }
  0x9a   : > { %4422 = vrot.lane.b32.xlu1 %v4381_v29, %s5075_s22  ;;  %v5475_v29 = vpack.i.bf16 %v680_v20, %v679_v19 }
  0x9d   : > { %4427 = vrot.lane.b32.xlu0 %v4426_v49, %s5083_s18 }
  0x9e   : > { %4432 = vrot.lane.b32.xlu1 %v4411_v46, %s5075_s22  ;;  %v4188_v4 = vpop.permute.xlu0 %4187 }
  0x9f   : > { %v4190_v21 = vunpack.i.h.bf16 %v4188_v4  ;;  %v4189_v22 = vunpack.i.l.bf16 %v4188_v4 }
  0xa1   : > { %4437 = vrot.lane.b32.xlu0 %v4391_v38, %s5076_s23  ;;  %v743_v38 = vld [vmem:[#allocation2 + $0xf2] sm:$0xff]  ;;  %v1879_v39 = vsel %vm454_vm0, %v566_v24, %v4190_v21  ;;  %v1878_v40 = vsel %vm454_vm0, %v565_v25, %v4189_v22 }
  0xa2   : > { %4442 = vrot.lane.b32.xlu1 %v4426_v49, %s5076_s23 }
  0xa5   : > { %4447 = vrot.lane.b32.xlu0 %v4401_v41, %s5077_s24 }
  0xa6   : > { %4452 = vrot.lane.b32.xlu1 %v4451_v54, %s5077_s24 }
  0xa9   : > { %4457 = vrot.lane.b32.xlu0 %v4411_v46, %s5078_s25  ;;  %v744_v46 = vld [vmem:[#allocation2 + $0xfa] sm:$0xff] }
  0xaa   : > { %4462 = vrot.lane.b32.xlu1 %v4461_v57, %s5078_s25 }
  0xad   : > { %4467 = vrot.lane.b32.xlu0 %v4426_v49, %s5079_s26 }
  0xae   : > { %4472 = vrot.lane.b32.xlu1 %v4471_v60, %s5079_s26 }
  0xb0   : > { %v5438_v2 = vpop.permute.xlu1 %4192 }
  0xb1   : > { %4477 = vrot.lane.b32.xlu0 %v4451_v54, %s5081_s30  ;;  %v4195_v30 = vunpack.i.h.bf16 %v5438_v2  ;;  %v4194_v33 = vunpack.i.l.bf16 %v5438_v2 }
  0xb2   : > { %4482 = vrot.lane.b32.xlu1 %v5440_v3, %s5081_s30 }
  0xb3   : > { %v4198_v9 = vpop.permute.xlu0 %4197 }
  0xb4   : > { %v5448_v8 = vpop.permute.xlu1 %4202  ;;  %v4200_v26 = vunpack.i.h.bf16 %v4198_v9  ;;  %v4199_v27 = vunpack.i.l.bf16 %v4198_v9 }
  0xb5   : > { %4487 = vrot.lane.b32.xlu0 %v4461_v57, %s5082_s16  ;;  %v4205_v41 = vunpack.i.h.bf16 %v5448_v8  ;;  %v4204_v42 = vunpack.i.l.bf16 %v5448_v8 }
  0xb6   : > { %4492 = vrot.lane.b32.xlu1 %v5445_v7, %s5082_s16  ;;  %v1880_v49 = vsel %vm454_vm0, %v5321_v32, %v4199_v27  ;;  %v1881_v50 = vsel %vm454_vm0, %v5325_v35, %v4200_v26  ;;  %v1911_v32 = vsel %vm1910_vm5, %v1878_v40, %v4194_v33  ;;  %v5502_v35 = vpack.i.bf16 %v744_v46, %v743_v38  ;;  %v808_v38 = vld [vmem:[#allocation2 + $0x109] sm:$0xff] }
  0xb7   : > { %v5455_v15 = vpop.permute.xlu0 %4207  ;;  %v1913_v59 = vsel %vm1910_vm5, %v1880_v49, %v4204_v42 }
  0xb8   : > { %v5453_v10 = vpop.permute.xlu1 %4212  ;;  %v4210_v54 = vunpack.i.h.bf16 %v5455_v15  ;;  %v4209_v55 = vunpack.i.l.bf16 %v5455_v15 }
  0xb9   : > { %4497 = vrot.lane.b32.xlu0 %v4471_v60, %s5083_s18  ;;  %v4215_v51 = vunpack.i.h.bf16 %v5453_v10  ;;  %v4214_v52 = vunpack.i.l.bf16 %v5453_v10 }
  0xba   : > { %4502 = vrot.lane.b32.xlu1 %v4461_v57, %s5075_s22  ;;  %v1912_v57 = vsel %vm1910_vm5, %v1879_v39, %v4195_v30  ;;  %v1944_v10 = vsel %vm1943_vm6, %v1911_v32, %v4209_v55  ;;  %v809_v39 = vld [vmem:[#allocation2 + $0x111] sm:$0xff] }
  0xbb   : > { %v5463_v18 = vpop.permute.xlu0 %4217  ;;  %v1946_v4 = vsel %vm1943_vm6, %v1913_v59, %v4214_v52  ;;  %v1945_v9 = vsel %vm1943_vm6, %v1912_v57, %v4210_v54  ;;  %v5548_v54 = vpack.i.bf16 %v809_v39, %v808_v38 }
  0xbc   : > { %v5461_v17 = vpop.permute.xlu1 %4222  ;;  %v4220_v61 = vunpack.i.h.bf16 %v5463_v18  ;;  %v4219_v62 = vunpack.i.l.bf16 %v5463_v18 }
  0xbd   : > { %4507 = vrot.lane.b32.xlu0 %v5459_v16, %s5083_s18  ;;  %v4225_v15 = vunpack.i.h.bf16 %v5461_v17  ;;  %v4224_v18 = vunpack.i.l.bf16 %v5461_v17 }
  0xbe   : > { %4512 = vrot.lane.b32.xlu1 %v5445_v7, %s5075_s22  ;;  %v1977_v21 = vsel %vm1976_vm7, %v1944_v10, %v4219_v62  ;;  %v1978_v22 = vsel %vm1976_vm7, %v1945_v9, %v4220_v61 }
  0xbf   : > { %v5471_v28 = vpop.permute.xlu0 %4227  ;;  %v1979_v46 = vsel %vm1976_vm7, %v1946_v4, %v4224_v18  ;;  %v684_v18 = vld [vmem:[#allocation2 + $0x128] sm:$0xff] }
  0xc0   : > { %v5469_v23 = vpop.permute.xlu1 %4232  ;;  %v4229_v6 = vunpack.i.l.bf16 %v5471_v28 }
  0xc1   : > { %4517 = vrot.lane.b32.xlu0 %v4471_v60, %s5076_s23  ;;  %v1914_v60 = vsel %vm1910_vm5, %v1881_v50, %v4205_v41  ;;  %v4235_v24 = vunpack.i.h.bf16 %v5469_v23  ;;  %v4234_v25 = vunpack.i.l.bf16 %v5469_v23 }
  0xc2   : > { %4522 = vrot.lane.b32.xlu1 %v5459_v16, %s5076_s23  ;;  %v1947_v5 = vsel %vm1943_vm6, %v1914_v60, %v4215_v51  ;;  %v2010_v27 = vsel %vm2009_vm8, %v1977_v21, %v4229_v6  ;;  %v716_v21 = vld [vmem:[#allocation2 + $0x129] sm:$0xff] }
  0xc3   : > { %v4238_v53 = vpop.permute.xlu0 %4237  ;;  %v1980_v47 = vsel %vm1976_vm7, %v1947_v5, %v4225_v15  ;;  %v2012_v51 = vsel %vm2009_vm8, %v1979_v46, %v4234_v25  ;;  %v683_v15 = vld [vmem:[#allocation2 + $0x120] sm:$0xff] }
  0xc4   : > { %v5484_v43 = vpop.permute.xlu1 %4242  ;;  %v4240_v13 = vunpack.i.h.bf16 %v4238_v53  ;;  %v4239_v14 = vunpack.i.l.bf16 %v4238_v53  ;;  %v2013_v52 = vsel %vm2009_vm8, %v1980_v47, %v4235_v24 }
  0xc5   : > { %4527 = vrot.lane.b32.xlu0 %v5440_v3, %s5077_s24  ;;  %v4230_v3 = vunpack.i.h.bf16 %v5471_v28  ;;  %v4245_v17 = vunpack.i.h.bf16 %v5484_v43  ;;  %v4244_v30 = vunpack.i.l.bf16 %v5484_v43 }
  0xc6   : > { %4532 = vrot.lane.b32.xlu1 %v5475_v29, %s5077_s24  ;;  %v2043_v37 = vsel %vm2042_vm9, %v2010_v27, %v4239_v14  ;;  %v5588_v27 = vpack.i.bf16 %v684_v18, %v683_v15 }
  0xc7   : > { %v4248_v8 = vpop.permute.xlu0 %4247  ;;  %v2011_v28 = vsel %vm2009_vm8, %v1978_v22, %v4230_v3  ;;  %v2045_v55 = vsel %vm2042_vm9, %v2012_v51, %v4244_v30  ;;  %v2046_v32 = vsel %vm2042_vm9, %v2013_v52, %v4245_v17  ;;  %v747_v22 = vld [vmem:[#allocation2 + $0x122] sm:$0xff]  ;;  %v780_v17 = vld [vmem:[#allocation2 + $0x138] sm:$0xff] }
  0xc8   : > { %v4253_v2 = vpop.permute.xlu1 %4252  ;;  %v4250_v19 = vunpack.i.h.bf16 %v4248_v8  ;;  %v4249_v20 = vunpack.i.l.bf16 %v4248_v8  ;;  %v2044_v23 = vsel %vm2042_vm9, %v2011_v28, %v4240_v13  ;;  %v840_v8 = vld [vmem:[#allocation2 + $0x10a] sm:$0xff]  ;;  %v781_v30 = vld [vmem:[#allocation2 + $0x140] sm:$0xff] }
  0xc9   : > { %4537 = vrot.lane.b32.xlu0 %v5445_v7, %s5078_s25  ;;  %v4255_v40 = vunpack.i.h.bf16 %v4253_v2  ;;  %v4254_v41 = vunpack.i.l.bf16 %v4253_v2  ;;  %v748_v28 = vld [vmem:[#allocation2 + $0x12a] sm:$0xff]  ;;  %v5600_v47 = vpack.i.bf16 %v781_v30, %v780_v17 }
  0xca   : > { %4542 = vrot.lane.b32.xlu1 %v5496_v56, %s5078_s25  ;;  %v2076_v42 = vsel %vm2075_vm10, %v2043_v37, %v4249_v20  ;;  %v2077_v43 = vsel %vm2075_vm10, %v2044_v23, %v4250_v19  ;;  %v715_v20 = vld [vmem:[#allocation2 + $0x121] sm:$0xff]  ;;  %v5598_v46 = vpack.i.bf16 %v748_v28, %v747_v22 }
  0xcb   : > { %v4258_v33 = vpop.permute.xlu0 %4257  ;;  %v2078_v60 = vsel %vm2075_vm10, %v2045_v55, %v4254_v41  ;;  %v2079_v61 = vsel %vm2075_vm10, %v2046_v32, %v4255_v40  ;;  %v5596_v40 = vpack.i.bf16 %v716_v21, %v715_v20  ;;  %v813_v28 = vld [vmem:[#allocation2 + $0x141] sm:$0xff] }
  0xcc   : > { %v5526_v26 = vpop.permute.xlu1 %4262  ;;  %v4260_v7 = vunpack.i.h.bf16 %v4258_v33  ;;  %v4259_v36 = vunpack.i.l.bf16 %v4258_v33 }
  0xcd   : > { %4547 = vrot.lane.b32.xlu0 %v5459_v16, %s5079_s26  ;;  %v4265_v33 = vunpack.i.h.bf16 %v5526_v26 }
  0xce   : > { %4552 = vrot.lane.b32.xlu1 %v5502_v35, %s5079_s26  ;;  %v2109_v49 = vsel %vm2108_vm11, %v2076_v42, %v4259_v36  ;;  %v2110_v50 = vsel %vm2108_vm11, %v2077_v43, %v4260_v7  ;;  %v4264_v7 = vunpack.i.l.bf16 %v5526_v26 }
  0xcf   : > { %v4268_v53 = vpop.permute.xlu0 %4267  ;;  %v2141_v16 = vpack.c.bf16 %v2110_v50, %v2109_v49  ;;  %v1883_v50 = vsel %vm454_vm0, %v5323_v34, %v4265_v33 }
  0xd0   : > { %v5542_v48 = vpop.permute.xlu1 %4272  ;;  %v4270_v57 = vunpack.i.h.bf16 %v4268_v53  ;;  %v4269_v59 = vunpack.i.l.bf16 %v4268_v53  ;;  %v1882_v51 = vsel %vm454_vm0, %v5319_v31, %v4264_v7 }
  0xd1   : > { %4557 = vrot.lane.b32.xlu0 %v5475_v29, %s5081_s30  ;;  %4089 = vmatprep.mubr.msk.bf16.mxu0 %vm2179_vm12, %v2141_v16  ;;  %v841_v29 = vld [vmem:[#allocation2 + $0x112] sm:$0xff]  ;;  %v4275_v24 = vunpack.i.h.bf16 %v5542_v48  ;;  %v4274_v25 = vunpack.i.l.bf16 %v5542_v48 }
  0xd2   : > { %4562 = vrot.lane.b32.xlu1 %v5504_v58, %s5081_s30  ;;  %v2111_v62 = vsel %vm2108_vm11, %v2078_v60, %v4269_v59  ;;  %v2112_v2 = vsel %vm2108_vm11, %v2079_v61, %v4270_v57  ;;  %v5570_v10 = vpack.i.bf16 %v841_v29, %v840_v8 }
  0xd3   : > { %v4278_v5 = vpop.permute.xlu0 %4277  ;;  %v2142_v3 = vpack.c.bf16 %v2112_v2, %v2111_v62  ;;  %v1885_v26 = vsel %vm454_vm0, %v5339_v45, %v4275_v24  ;;  %v1884_v48 = vsel %vm454_vm0, %v5337_v44, %v4274_v25 }
  0xd4   : > { %v4283_v4 = vpop.permute.xlu1 %4282  ;;  %v4280_v23 = vunpack.i.h.bf16 %v4278_v5  ;;  %v4279_v38 = vunpack.i.l.bf16 %v4278_v5 }
  0xd5   : > { %4567 = vrot.lane.b32.xlu0 %v5496_v56, %s5082_s16  ;;  %4090 = vmatmul.mubr.msk.bf16.vlgmr.msra.gmra.mrb[0].mxu0 %vm2179_vm12, %v2142_v3  ;;  %v4285_v36 = vunpack.i.h.bf16 %v4283_v4  ;;  %v4284_v37 = vunpack.i.l.bf16 %v4283_v4 }
  0xd6   : > { %4572 = vrot.lane.b32.xlu1 %v5548_v54, %s5082_s16  ;;  %v1916_v44 = vsel %vm1910_vm5, %v1883_v50, %v4280_v23  ;;  %v1915_v45 = vsel %vm1910_vm5, %v1882_v51, %v4279_v38 }
  0xd7   : > { %v4288_v9 = vpop.permute.xlu0 %4287  ;;  %v1917_v52 = vsel %vm1910_vm5, %v1884_v48, %v4284_v37  ;;  %v1918_v53 = vsel %vm1910_vm5, %v1885_v26, %v4285_v36 }
  0xd8   : > { %v4293_v6 = vpop.permute.xlu1 %4292  ;;  %v4289_v49 = vunpack.i.l.bf16 %v4288_v9 }
  0xd9   : > { %4577 = vrot.lane.b32.xlu0 %v5502_v35, %s5083_s18  ;;  %v4295_v41 = vunpack.i.h.bf16 %v4293_v6  ;;  %v4294_v42 = vunpack.i.l.bf16 %v4293_v6 }
  0xda   : > { %4582 = vrot.lane.b32.xlu1 %v5496_v56, %s5075_s22 }
  0xdb   : > { %v5574_v14 = vpop.permute.xlu0 %4297  ;;  %v1950_v34 = vsel %vm1943_vm6, %v1917_v52, %v4294_v42  ;;  %v1951_v31 = vsel %vm1943_vm6, %v1918_v53, %v4295_v41 }
  0xdc   : > { %v5572_v13 = vpop.permute.xlu1 %4302  ;;  %v4300_v16 = vunpack.i.h.bf16 %v5574_v14  ;;  %v4299_v55 = vunpack.i.l.bf16 %v5574_v14 }
  0xdd   : > { %4587 = vrot.lane.b32.xlu0 %v5570_v10, %s5083_s18  ;;  %v4305_v4 = vunpack.i.h.bf16 %v5572_v13  ;;  %v4304_v5 = vunpack.i.l.bf16 %v5572_v13 }
  0xde   : > { %4592 = vrot.lane.b32.xlu1 %v5548_v54, %s5075_s22 }
  0xdf   : > { %v5582_v56 = vpop.permute.xlu0 %4307  ;;  %v1983_v36 = vsel %vm1976_vm7, %v1950_v34, %v4304_v5  ;;  %v1984_v37 = vsel %vm1976_vm7, %v1951_v31, %v4305_v4  ;;  %v844_v34 = vld [vmem:[#allocation2 + $0x13a] sm:$0xff]  ;;  %v751_v5 = vld [vmem:[#allocation2 + $0x152] sm:$0xff] }
  0xe0   : > { %v5580_v19 = vpop.permute.xlu1 %4312  ;;  %v4310_v57 = vunpack.i.h.bf16 %v5582_v56  ;;  %v4309_v59 = vunpack.i.l.bf16 %v5582_v56  ;;  %v720_v4 = vld [vmem:[#allocation2 + $0x159] sm:$0xff] }
  0xe1   : > { %4597 = vrot.lane.b32.xlu0 %v5502_v35, %s5076_s23  ;;  %v4290_v35 = vunpack.i.h.bf16 %v4288_v9  ;;  %v4315_v9 = vunpack.i.h.bf16 %v5580_v19  ;;  %v4314_v14 = vunpack.i.l.bf16 %v5580_v19  ;;  %v812_v19 = vld [vmem:[#allocation2 + $0x139] sm:$0xff] }
  0xe2   : > { %4602 = vrot.lane.b32.xlu1 %v5570_v10, %s5076_s23  ;;  %v5658_v48 = vpack.i.bf16 %v813_v28, %v812_v19 }
  0xe3   : > { %v4318_v43 = vpop.permute.xlu0 %4317  ;;  %v1949_v61 = vsel %vm1943_vm6, %v1916_v44, %v4290_v35  ;;  %v2016_v41 = vsel %vm2009_vm8, %v1983_v36, %v4314_v14  ;;  %v2017_v42 = vsel %vm2009_vm8, %v1984_v37, %v4315_v9  ;;  %v784_v9 = vld [vmem:[#allocation2 + $0x168] sm:$0xff]  ;;  %v785_v14 = vld [vmem:[#allocation2 + $0x170] sm:$0xff] }
  0xe4   : > { %v5594_v39 = vpop.permute.xlu1 %4322  ;;  %v4320_v62 = vunpack.i.h.bf16 %v4318_v43  ;;  %v4319_v2 = vunpack.i.l.bf16 %v4318_v43  ;;  %v1982_v29 = vsel %vm1976_vm7, %v1949_v61, %v4300_v16  ;;  %v688_v61 = vld [vmem:[#allocation2 + $0x158] sm:$0xff] }
  0xe5   : > { %4607 = vrot.lane.b32.xlu0 %v5504_v58, %s5077_s24  ;;  %v1948_v58 = vsel %vm1943_vm6, %v1915_v45, %v4289_v49  ;;  %v2015_v56 = vsel %vm2009_vm8, %v1982_v29, %v4310_v57  ;;  %v4325_v13 = vunpack.i.h.bf16 %v5594_v39  ;;  %v4324_v20 = vunpack.i.l.bf16 %v5594_v39  ;;  %v752_v29 = vld [vmem:[#allocation2 + $0x15a] sm:$0xff] }
  0xe6   : > { %4612 = vrot.lane.b32.xlu1 %v5588_v27, %s5077_s24  ;;  %v1981_v8 = vsel %vm1976_vm7, %v1948_v58, %v4299_v55  ;;  %v2048_v22 = vsel %vm2042_vm9, %v2015_v56, %v4320_v62  ;;  %v687_v58 = vld [vmem:[#allocation2 + $0x150] sm:$0xff] }
  0xe7   : > { %v4328_v60 = vpop.permute.xlu0 %4327  ;;  %v2014_v18 = vsel %vm2009_vm8, %v1981_v8, %v4309_v59  ;;  %v2050_v35 = vsel %vm2042_vm9, %v2017_v42, %v4325_v13  ;;  %v5698_v8 = vpack.i.bf16 %v688_v61, %v687_v58 }
  0xe8   : > { %v4333_v32 = vpop.permute.xlu1 %4332  ;;  %v4330_v3 = vunpack.i.h.bf16 %v4328_v60  ;;  %v4329_v6 = vunpack.i.l.bf16 %v4328_v60 }
  0xe9   : > { %4617 = vrot.lane.b32.xlu0 %v5548_v54, %s5078_s25  ;;  %v2047_v54 = vsel %vm2042_vm9, %v2014_v18, %v4319_v2  ;;  %v4335_v17 = vunpack.i.h.bf16 %v4333_v32  ;;  %v4334_v30 = vunpack.i.l.bf16 %v4333_v32  ;;  %v719_v2 = vld [vmem:[#allocation2 + $0x151] sm:$0xff] }
  0xea   : > { %4622 = vrot.lane.b32.xlu1 %v5596_v40, %s5078_s25  ;;  %v2080_v33 = vsel %vm2075_vm10, %v2047_v54, %v4329_v6  ;;  %v2081_v7 = vsel %vm2075_vm10, %v2048_v22, %v4330_v3 }
  0xeb   : > { %v4338_v21 = vpop.permute.xlu0 %4337  ;;  %v2083_v52 = vsel %vm2075_vm10, %v2050_v35, %v4335_v17  ;;  %v5708_v17 = vpack.i.bf16 %v752_v29, %v751_v5 }
  0xec   : > { %v5636_v15 = vpop.permute.xlu1 %4342  ;;  %v4340_v24 = vunpack.i.h.bf16 %v4338_v21  ;;  %v4339_v25 = vunpack.i.l.bf16 %v4338_v21 }
  0xed   : > { %4627 = vrot.lane.b32.xlu0 %v5570_v10, %s5079_s26  ;;  %v2049_v10 = vsel %vm2042_vm9, %v2016_v41, %v4324_v20  ;;  %v4345_v18 = vunpack.i.h.bf16 %v5636_v15  ;;  %v4344_v56 = vunpack.i.l.bf16 %v5636_v15 }
  0xee   : > { %4632 = vrot.lane.b32.xlu1 %v5598_v46, %s5079_s26  ;;  %v2113_v23 = vsel %vm2108_vm11, %v2080_v33, %v4339_v25  ;;  %v2114_v38 = vsel %vm2108_vm11, %v2081_v7, %v4340_v24  ;;  %v2082_v51 = vsel %vm2075_vm10, %v2049_v10, %v4334_v30  ;;  %v5706_v24 = vpack.i.bf16 %v720_v4, %v719_v2  ;;  %v817_v4 = vld [vmem:[#allocation2 + $0x171] sm:$0xff] }
  0xef   : > { %v4348_v43 = vpop.permute.xlu0 %4347  ;;  %v2143_v26 = vpack.c.bf16 %v2114_v38, %v2113_v23  ;;  %v5710_v30 = vpack.i.bf16 %v785_v14, %v784_v9  ;;  %v1887_v36 = vsel %vm454_vm0, %v5367_v0, %v4345_v18  ;;  %v1886_v37 = vsel %vm454_vm0, %v5365_v63, %v4344_v56 }
  0xf0   : > { %v5654_v39 = vpop.permute.xlu1 %4352  ;;  %v4350_v49 = vunpack.i.h.bf16 %v4348_v43  ;;  %v4349_v50 = vunpack.i.l.bf16 %v4348_v43 }
  0xf1   : > { %4637 = vrot.lane.b32.xlu0 %v5588_v27, %s5081_s30  ;;  %4093 = vmatprep.mubr.msk.bf16.mxu0 %vm2179_vm12, %v2143_v26  ;;  %v845_v27 = vld [vmem:[#allocation2 + $0x142] sm:$0xff]  ;;  %v4355_v3 = vunpack.i.h.bf16 %v5654_v39  ;;  %v4354_v6 = vunpack.i.l.bf16 %v5654_v39 }
  0xf2   : > { %4642 = vrot.lane.b32.xlu1 %v5600_v47, %s5081_s30  ;;  %v2116_v53 = vsel %vm2108_vm11, %v2083_v52, %v4350_v49  ;;  %v2115_v44 = vsel %vm2108_vm11, %v2082_v51, %v4349_v50  ;;  %v5680_v57 = vpack.i.bf16 %v845_v27, %v844_v34 }
  0xf3   : > { %v4358_v16 = vpop.permute.xlu0 %4357  ;;  %v2144_v55 = vpack.c.bf16 %v2116_v53, %v2115_v44  ;;  %v1889_v15 = vsel %vm454_vm0, %v5384_v12, %v4355_v3  ;;  %v1888_v33 = vsel %vm454_vm0, %v5382_v11, %v4354_v6 }
  0xf4   : > { %v4363_v45 = vpop.permute.xlu1 %4362  ;;  %v4360_v21 = vunpack.i.h.bf16 %v4358_v16  ;;  %v4359_v54 = vunpack.i.l.bf16 %v4358_v16 }
  0xf5   : > { %4647 = vrot.lane.b32.xlu0 %v5596_v40, %s5082_s16  ;;  %4094 = vmatmul.mubr.msk.bf16.gmra.mrb[4].mxu0 %vm2179_vm12, %v2144_v55  ;;  %v4365_v13 = vunpack.i.h.bf16 %v4363_v45  ;;  %v4364_v20 = vunpack.i.l.bf16 %v4363_v45 }
  0xf6   : > { %4652 = vrot.lane.b32.xlu1 %v5658_v48, %s5082_s16  ;;  %v1920_v11 = vsel %vm1910_vm5, %v1887_v36, %v4360_v21  ;;  %v1919_v12 = vsel %vm1910_vm5, %v1886_v37, %v4359_v54 }
  0xf7   : > { %v4368_v31 = vpop.permute.xlu0 %4367  ;;  %v1921_v23 = vsel %vm1910_vm5, %v1888_v33, %v4364_v20  ;;  %v1922_v38 = vsel %vm1910_vm5, %v1889_v15, %v4365_v13 }
  0xf8   : > { %v4373_v32 = vpop.permute.xlu1 %4372  ;;  %v4369_v7 = vunpack.i.l.bf16 %v4368_v31 }
  0xf9   : > { %4657 = vrot.lane.b32.xlu0 %v5598_v46, %s5083_s18  ;;  %v4375_v25 = vunpack.i.h.bf16 %v4373_v32  ;;  %v4374_v19 = vunpack.i.l.bf16 %v4373_v32 }
  0xfa   : > { %4662 = vrot.lane.b32.xlu1 %v5596_v40, %s5075_s22 }
  0xfb   : > { %v5684_v60 = vpop.permute.xlu0 %4377  ;;  %v1954_v0 = vsel %vm1943_vm6, %v1921_v23, %v4374_v19  ;;  %v1955_v63 = vsel %vm1943_vm6, %v1922_v38, %v4375_v25 }
  0xfc   : > { %v5682_v59 = vpop.permute.xlu1 %4382  ;;  %v4380_v39 = vunpack.i.h.bf16 %v5684_v60  ;;  %v4379_v41 = vunpack.i.l.bf16 %v5684_v60 }
  0xfd   : > { %4667 = vrot.lane.b32.xlu0 %v5680_v57, %s5083_s18  ;;  %v4385_v51 = vunpack.i.h.bf16 %v5682_v59  ;;  %v4384_v52 = vunpack.i.l.bf16 %v5682_v59 }
  0xfe   : > { %4672 = vrot.lane.b32.xlu1 %v5658_v48, %s5075_s22 }
  0xff   : > { %v5692_v40 = vpop.permute.xlu0 %4387  ;;  %v1987_v9 = vsel %vm1976_vm7, %v1954_v0, %v4384_v52  ;;  %v1988_v14 = vsel %vm1976_vm7, %v1955_v63, %v4385_v51  ;;  %v691_v63 = vld [vmem:[#allocation2 + $0x180] sm:$0xff] }
 0x100   : > { %v5690_v62 = vpop.permute.xlu1 %4392  ;;  %v4390_v43 = vunpack.i.h.bf16 %v5692_v40  ;;  %v4389_v26 = vunpack.i.l.bf16 %v5692_v40 }
 0x101   : > { %4677 = vrot.lane.b32.xlu0 %v5598_v46, %s5076_s23  ;;  %v4370_v46 = vunpack.i.h.bf16 %v4368_v31  ;;  %v4395_v55 = vunpack.i.h.bf16 %v5690_v62  ;;  %v4394_v32 = vunpack.i.l.bf16 %v5690_v62  ;;  %v816_v62 = vld [vmem:[#allocation2 + $0x169] sm:$0xff] }
 0x102   : > { %4682 = vrot.lane.b32.xlu1 %v5680_v57, %s5076_s23  ;;  %v5768_v25 = vpack.i.bf16 %v817_v4, %v816_v62 }
 0x103   : > { %v4398_v28 = vpop.permute.xlu0 %4397  ;;  %v1953_v35 = vsel %vm1943_vm6, %v1920_v11, %v4370_v46  ;;  %v2020_v20 = vsel %vm2009_vm8, %v1987_v9, %v4394_v32  ;;  %v2021_v21 = vsel %vm2009_vm8, %v1988_v14, %v4395_v55 }
 0x104   : > { %v5704_v22 = vpop.permute.xlu1 %4402  ;;  %v4400_v49 = vunpack.i.h.bf16 %v4398_v28  ;;  %v4399_v50 = vunpack.i.l.bf16 %v4398_v28  ;;  %v1986_v16 = vsel %vm1976_vm7, %v1953_v35, %v4380_v39  ;;  %v755_v35 = vld [vmem:[#allocation2 + $0x182] sm:$0xff] }
 0x105   : > { %4687 = vrot.lane.b32.xlu0 %v5600_v47, %s5077_s24  ;;  %v1952_v47 = vsel %vm1943_vm6, %v1919_v12, %v4369_v7  ;;  %v2019_v31 = vsel %vm2009_vm8, %v1986_v16, %v4390_v43  ;;  %v4405_v59 = vunpack.i.h.bf16 %v5704_v22  ;;  %v4404_v60 = vunpack.i.l.bf16 %v5704_v22  ;;  %v849_v12 = vld [vmem:[#allocation2 + $0x172] sm:$0xff]  ;;  %v692_v43 = vld [vmem:[#allocation2 + $0x188] sm:$0xff] }
 0x106   : > { %4692 = vrot.lane.b32.xlu1 %v5698_v8, %s5077_s24  ;;  %v1985_v45 = vsel %vm1976_vm7, %v1952_v47, %v4379_v41  ;;  %v2052_v61 = vsel %vm2042_vm9, %v2019_v31, %v4400_v49  ;;  %v756_v49 = vld [vmem:[#allocation2 + $0x18a] sm:$0xff]  ;;  %v5822_v16 = vld [vmem:[#allocation2 + $0x1a1] sm:$0xff] }
 0x107   : > { %v4408_v10 = vpop.permute.xlu0 %4407  ;;  %v2018_v27 = vsel %vm2009_vm8, %v1985_v45, %v4389_v26  ;;  %v2054_v19 = vsel %vm2042_vm9, %v2021_v21, %v4405_v59  ;;  %v5820_v45 = vld [vmem:[#allocation2 + $0x199] sm:$0xff]  ;;  %v580_v31 = vld [vmem:[#allocation2 + $0xb0] sm:$0xff]  ;;  %v5834_v4 = vpack.i.bf16 %v756_v49, %v755_v35 }
 0x108   : > { %v4413_v42 = vpop.permute.xlu1 %4412  ;;  %v4410_v53 = vunpack.i.h.bf16 %v4408_v10  ;;  %v4409_v44 = vunpack.i.l.bf16 %v4408_v10  ;;  %v724_v10 = vld [vmem:[#allocation2 + $0x189] sm:$0xff] }
 0x109   : > { %4697 = vrot.lane.b32.xlu0 %v5658_v48, %s5078_s25  ;;  %v2051_v48 = vsel %vm2042_vm9, %v2018_v27, %v4399_v50  ;;  %v4415_v5 = vunpack.i.h.bf16 %v4413_v42  ;;  %v4414_v3 = vunpack.i.l.bf16 %v4413_v42  ;;  %v5810_v50 = vld [vmem:[#allocation2 + $0x198] sm:$0xff]  ;;  %v579_v27 = vld [vmem:[#allocation2 + $0xa8] sm:$0xff] }
 0x10a   : > { %4702 = vrot.lane.b32.xlu1 %v5706_v24, %s5078_s25  ;;  %v2084_v6 = vsel %vm2075_vm10, %v2051_v48, %v4409_v44  ;;  %v2085_v29 = vsel %vm2075_vm10, %v2052_v61, %v4410_v53  ;;  %v5816_v53 = vpack.i.bf16 %v692_v43, %v691_v63  ;;  %v5818_v44 = vld [vmem:[#allocation2 + $0x1a0] sm:$0xff]  ;;  %v578_v48 = vld [vmem:[#allocation2 + $0x98] sm:$0xff] }
 0x10b   : > { %v4418_v58 = vpop.permute.xlu0 %4417  ;;  %v2087_v46 = vsel %vm2075_vm10, %v2054_v19, %v4415_v5 }
 0x10c   : > { %v5746_v34 = vpop.permute.xlu1 %4422  ;;  %v4420_v40 = vunpack.i.h.bf16 %v4418_v58  ;;  %v4419_v2 = vunpack.i.l.bf16 %v4418_v58  ;;  %v577_v58 = vld [vmem:[#allocation2 + $0x90] sm:$0xff] }
 0x10d   : > { %4707 = vrot.lane.b32.xlu0 %v5680_v57, %s5079_s26  ;;  %v2053_v57 = vsel %vm2042_vm9, %v2020_v20, %v4404_v60  ;;  %v4425_v55 = vunpack.i.h.bf16 %v5746_v34  ;;  %v4424_v32 = vunpack.i.l.bf16 %v5746_v34 }
 0x10e   : > { %4712 = vrot.lane.b32.xlu1 %v5708_v17, %s5079_s26  ;;  %v2117_v18 = vsel %vm2108_vm11, %v2084_v6, %v4419_v2  ;;  %v2118_v56 = vsel %vm2108_vm11, %v2085_v29, %v4420_v40  ;;  %v2086_v33 = vsel %vm2075_vm10, %v2053_v57, %v4414_v3  ;;  %v4811_v6 = vpack.i.bf16 %v5822_v16, %v5820_v45 }
 0x10f   : > { %v4428_v54 = vpop.permute.xlu0 %4427  ;;  %v2145_v22 = vpack.c.bf16 %v2118_v56, %v2117_v18  ;;  %v1891_v56 = vsel %vm454_vm0, %v578_v48, %v4425_v55 }
 0x110   : > { %v5764_v13 = vpop.permute.xlu1 %4432  ;;  %v4430_v28 = vunpack.i.h.bf16 %v4428_v54  ;;  %v4429_v15 = vunpack.i.l.bf16 %v4428_v54 }
 0x111   : > { %4717 = vrot.lane.b32.xlu0 %v5698_v8, %s5081_s30  ;;  %4097 = vmatprep.mubr.msk.bf16.mxu0 %vm2179_vm12, %v2145_v22  ;;  %v848_v8 = vld [vmem:[#allocation2 + $0x16a] sm:$0xff]  ;;  %v4435_v51 = vunpack.i.h.bf16 %v5764_v13  ;;  %v4434_v52 = vunpack.i.l.bf16 %v5764_v13  ;;  %v1890_v13 = vsel %vm454_vm0, %v577_v58, %v4424_v32 }
 0x112   : > { %4722 = vrot.lane.b32.xlu1 %v5710_v30, %s5081_s30  ;;  %v2120_v7 = vsel %vm2108_vm11, %v2087_v46, %v4430_v28  ;;  %v2119_v36 = vsel %vm2108_vm11, %v2086_v33, %v4429_v15  ;;  %v5796_v41 = vpack.i.bf16 %v849_v12, %v848_v8 }
 0x113   : > { %v5781_v23 = vpop.permute.xlu0 %4437  ;;  %v2146_v38 = vpack.c.bf16 %v2120_v7, %v2119_v36  ;;  %v1893_v29 = vsel %vm454_vm0, %v580_v31, %v4435_v51  ;;  %v1892_v9 = vsel %vm454_vm0, %v579_v27, %v4434_v52 }
 0x114   : > { %v4443_v37 = vpop.permute.xlu1 %4442  ;;  %v4440_v61 = vunpack.i.h.bf16 %v5781_v23  ;;  %v4439_v40 = vunpack.i.l.bf16 %v5781_v23 }
 0x115   : > { %4727 = vrot.lane.b32.xlu0 %v5706_v24, %s5082_s16  ;;  %4098 = vmatmul.mubr.msk.bf16.gmra.mrb[8].mxu0 %vm2179_vm12, %v2146_v38  ;;  %v4445_v59 = vunpack.i.h.bf16 %v4443_v37  ;;  %v4444_v60 = vunpack.i.l.bf16 %v4443_v37 }
 0x116   : > { %4732 = vrot.lane.b32.xlu1 %v5768_v25, %s5082_s16  ;;  %v1924_v54 = vsel %vm1910_vm5, %v1891_v56, %v4440_v61  ;;  %v1923_v22 = vsel %vm1910_vm5, %v1890_v13, %v4439_v40  ;;  %v852_v13 = vld [vmem:[#allocation2 + $0x19a] sm:$0xff] }
 0x117   : > { %v5790_v39 = vpop.permute.xlu0 %4447  ;;  %v1925_v20 = vsel %vm1910_vm5, %v1892_v9, %v4444_v60  ;;  %v1926_v21 = vsel %vm1910_vm5, %v1893_v29, %v4445_v59 }
 0x118   : > { %v5788_v11 = vpop.permute.xlu1 %4452  ;;  %v4450_v14 = vunpack.i.h.bf16 %v5790_v39  ;;  %v4449_v18 = vunpack.i.l.bf16 %v5790_v39 }
 0x119   : > { %4737 = vrot.lane.b32.xlu0 %v5708_v17, %s5083_s18  ;;  %v4455_v34 = vunpack.i.h.bf16 %v5788_v11  ;;  %v4454_v5 = vunpack.i.l.bf16 %v5788_v11 }
 0x11a   : > { %4742 = vrot.lane.b32.xlu1 %v5706_v24, %s5075_s22  ;;  %v723_v24 = vld [vmem:[#allocation2 + $0x181] sm:$0xff]  ;;  %v1957_v37 = vsel %vm1943_vm6, %v1924_v54, %v4450_v14 }
 0x11b   : > { %v5800_v0 = vpop.permute.xlu0 %4457  ;;  %v5832_v62 = vpack.i.bf16 %v724_v10, %v723_v24  ;;  %v1958_v15 = vsel %vm1943_vm6, %v1925_v20, %v4454_v5  ;;  %v1959_v33 = vsel %vm1943_vm6, %v1926_v21, %v4455_v34  ;;  %v853_v20 = vld [vmem:[#allocation2 + $0x1a2] sm:$0xff] }
 0x11c   : > { %v5798_v42 = vpop.permute.xlu1 %4462  ;;  %v4460_v57 = vunpack.i.h.bf16 %v5800_v0  ;;  %v4459_v19 = vunpack.i.l.bf16 %v5800_v0 }
 0x11d   : > { %4747 = vrot.lane.b32.xlu0 %v5796_v41, %s5083_s18  ;;  %v4465_v11 = vunpack.i.h.bf16 %v5798_v42  ;;  %v4464_v8 = vunpack.i.l.bf16 %v5798_v42 }
 0x11e   : > { %4752 = vrot.lane.b32.xlu1 %v5768_v25, %s5075_s22  ;;  %v1990_v63 = vsel %vm1976_vm7, %v1957_v37, %v4460_v57  ;;  %v582_v37 = vld [vmem:[#allocation2 + $0xc8] sm:$0xff]  ;;  %s5085_s22 = smov 64  }
 0x11f   : > { %v5808_v47 = vpop.permute.xlu0 %4467  ;;  %v1991_v60 = vsel %vm1976_vm7, %v1958_v15, %v4464_v8  ;;  %v1992_v58 = vsel %vm1976_vm7, %v1959_v33, %v4465_v11  ;;  %v583_v33 = vld [vmem:[#allocation2 + $0xd8] sm:$0xff] }
 0x120   : > { %v5806_v26 = vpop.permute.xlu1 %4472  ;;  %v4470_v46 = vunpack.i.h.bf16 %v5808_v47  ;;  %v4469_v7 = vunpack.i.l.bf16 %v5808_v47 }
 0x121   : > { %4757 = vrot.lane.b32.xlu0 %v5708_v17, %s5076_s23  ;;  %v4801_v17 = vpack.i.bf16 %v5818_v44, %v5810_v50  ;;  %v4475_v43 = vunpack.i.h.bf16 %v5806_v26  ;;  %v4474_v24 = vunpack.i.l.bf16 %v5806_v26 }
 0x122   : > { %4762 = vrot.lane.b32.xlu1 %v5796_v41, %s5076_s23  ;;  %v2023_v35 = vsel %vm2009_vm8, %v1990_v63, %v4470_v46  ;;  %v584_v46 = vld [vmem:[#allocation2 + $0xe0] sm:$0xff] }
 0x123   : > { %v4478_v3 = vpop.permute.xlu0 %4477  ;;  %v2025_v34 = vsel %vm2009_vm8, %v1992_v58, %v4475_v43 }
 0x124   : > { %v5830_v2 = vpop.permute.xlu1 %4482  ;;  %v4480_v23 = vunpack.i.h.bf16 %v4478_v3  ;;  %v4479_v38 = vunpack.i.l.bf16 %v4478_v3 }
 0x125   : > { %4767 = vrot.lane.b32.xlu0 %v5710_v30, %s5077_s24  ;;  %v1956_v30 = vsel %vm1943_vm6, %v1923_v22, %v4449_v18  ;;  %v4485_v42 = vunpack.i.h.bf16 %v5830_v2  ;;  %v4484_v49 = vunpack.i.l.bf16 %v5830_v2  ;;  %v2024_v2 = vsel %vm2009_vm8, %v1991_v60, %v4474_v24 }
 0x126   : > { %4772 = vrot.lane.b32.xlu1 %v5816_v53, %s5077_s24  ;;  %v1989_v0 = vsel %vm1976_vm7, %v1956_v30, %v4459_v19  ;;  %v2056_v52 = vsel %vm2042_vm9, %v2023_v35, %v4480_v23  ;;  %v4821_v22 = vpack.i.bf16 %v853_v20, %v852_v13  ;;  %v581_v30 = vld [vmem:[#allocation2 + $0xc0] sm:$0xff] }
 0x127   : > { %v4488_v36 = vpop.permute.xlu0 %4487  ;;  %v2022_v47 = vsel %vm2009_vm8, %v1989_v0, %v4469_v7  ;;  %v2057_v29 = vsel %vm2042_vm9, %v2024_v2, %v4484_v49 }
 0x128   : > { %v4493_v28 = vpop.permute.xlu1 %4492  ;;  %v4490_v12 = vunpack.i.h.bf16 %v4488_v36  ;;  %v4489_v39 = vunpack.i.l.bf16 %v4488_v36 }
 0x129   : > { %4777 = vrot.lane.b32.xlu0 %v5768_v25, %s5078_s25  ;;  %v2055_v25 = vsel %vm2042_vm9, %v2022_v47, %v4479_v38  ;;  %v4495_v26 = vunpack.i.h.bf16 %v4493_v28  ;;  %v4494_v27 = vunpack.i.l.bf16 %v4493_v28 }
 0x12a   : > { %4782 = vrot.lane.b32.xlu1 %v5832_v62, %s5078_s25  ;;  %v2088_v31 = vsel %vm2075_vm10, %v2055_v25, %v4489_v39  ;;  %v2089_v59 = vsel %vm2075_vm10, %v2056_v52, %v4490_v12 }
 0x12b   : > { %v4498_v51 = vpop.permute.xlu0 %4497  ;;  %v2090_v18 = vsel %vm2075_vm10, %v2057_v29, %v4494_v27 }
 0x12c   : > { %v5874_v10 = vpop.permute.xlu1 %4502  ;;  %v4500_v55 = vunpack.i.h.bf16 %v4498_v51  ;;  %v4499_v32 = vunpack.i.l.bf16 %v4498_v51 }
 0x12d   : > { %4787 = vrot.lane.b32.xlu0 %v5796_v41, %s5079_s26  ;;  %v2058_v41 = vsel %vm2042_vm9, %v2025_v34, %v4485_v42  ;;  %v4504_v15 = vunpack.i.l.bf16 %v5874_v10 }
 0x12e   : > { %4792 = vrot.lane.b32.xlu1 %v5834_v4, %s5079_s26  ;;  %v2121_v48 = vsel %vm2108_vm11, %v2088_v31, %v4499_v32  ;;  %v2122_v61 = vsel %vm2108_vm11, %v2089_v59, %v4500_v55  ;;  %v2091_v56 = vsel %vm2075_vm10, %v2058_v41, %v4495_v26 }
 0x12f   : > { %v2147_v5 = vpack.c.bf16 %v2122_v61, %v2121_v48  ;;  %v4508_v3 = vpop.permute.xlu0 %4507  ;;  %v1894_v47 = vsel %vm454_vm0, %v581_v30, %v4504_v15 }
 0x130   : > { %v5892_v40 = vpop.permute.xlu1 %4512  ;;  %v4510_v9 = vunpack.i.h.bf16 %v4508_v3  ;;  %v4509_v14 = vunpack.i.l.bf16 %v4508_v3 }
 0x131   : > { %4797 = vrot.lane.b32.xlu0 %v5816_v53, %s5081_s30  ;;  %4101 = vmatprep.mubr.msk.bf16.mxu0 %vm2179_vm12, %v2147_v5 }
 0x132   : > { %4802 = vrot.lane.b32.xlu1 %v4801_v17, %s5081_s30  ;;  %v2124_v50 = vsel %vm2108_vm11, %v2091_v56, %v4510_v9  ;;  %v2123_v44 = vsel %vm2108_vm11, %v2090_v18, %v4509_v14  ;;  %s452_s30 = scalar_lea.vmem %s6654_s13, %s5273_s17 }
 0x133   : > { %v2148_v21 = vpack.c.bf16 %v2124_v50, %v2123_v44  ;;  %v5915_v54 = vpop.permute.xlu0 %4517 }
 0x134   : > { %v5913_v17 = vpop.permute.xlu1 %4522  ;;  %v4520_v23 = vunpack.i.h.bf16 %v5915_v54  ;;  %v4519_v38 = vunpack.i.l.bf16 %v5915_v54 }
 0x135   : > { %4807 = vrot.lane.b32.xlu0 %v5832_v62, %s5082_s16  ;;  %4102 = vmatmul.mubr.msk.bf16.gmra.mrb[12].mxu0 %vm2179_vm12, %v2148_v21  ;;  %v4515_v62 = vunpack.i.h.bf16 %v5892_v40  ;;  %v4525_v7 = vunpack.i.h.bf16 %v5913_v17  ;;  %v4524_v36 = vunpack.i.l.bf16 %v5913_v17 }
 0x136   : > { %4812 = vrot.lane.b32.xlu1 %v4811_v6, %s5082_s16  ;;  %v4514_v6 = vunpack.i.l.bf16 %v5892_v40  ;;  %v1927_v51 = vsel %vm1910_vm5, %v1894_v47, %v4519_v38 }
 0x137   : > { %v5926_v57 = vpop.permute.xlu0 %4527  ;;  %v1897_v0 = vsel %vm454_vm0, %v584_v46, %v4515_v62 }
 0x138   : > { %v5924_v53 = vpop.permute.xlu1 %4532  ;;  %v1896_v63 = vsel %vm454_vm0, %v583_v33, %v4514_v6  ;;  %v4530_v43 = vunpack.i.h.bf16 %v5926_v57  ;;  %v4529_v24 = vunpack.i.l.bf16 %v5926_v57  ;;  %v1930_v42 = vsel %vm1910_vm5, %v1897_v0, %v4525_v7 }
 0x139   : > { %4817 = vrot.lane.b32.xlu0 %v5834_v4, %s5083_s18  ;;  %v4505_v4 = vunpack.i.h.bf16 %v5874_v10  ;;  %v4535_v8 = vunpack.i.h.bf16 %v5924_v53  ;;  %v4534_v12 = vunpack.i.l.bf16 %v5924_v53  ;;  %v1929_v35 = vsel %vm1910_vm5, %v1896_v63, %v4524_v36 }
 0x13a   : > { %4822 = vrot.lane.b32.xlu1 %v4821_v22, %s5083_s18  ;;  %v1960_v60 = vsel %vm1943_vm6, %v1927_v51, %v4529_v24 }
 0x13b   : > { %v5933_v28 = vpop.permute.xlu0 %4537  ;;  %v1895_v10 = vsel %vm454_vm0, %v582_v37, %v4505_v4  ;;  %v1962_v32 = vsel %vm1943_vm6, %v1929_v35, %v4534_v12  ;;  %v1963_v26 = vsel %vm1943_vm6, %v1930_v42, %v4535_v8 }
 0x13c   : > { %v5931_v19 = vpop.permute.xlu1 %4542  ;;  %v1928_v49 = vsel %vm1910_vm5, %v1895_v10, %v4520_v23  ;;  %v4540_v25 = vunpack.i.h.bf16 %v5933_v28  ;;  %v4539_v52 = vunpack.i.l.bf16 %v5933_v28 }
 0x13d   : > { %v1961_v58 = vsel %vm1943_vm6, %v1928_v49, %v4530_v43  ;;  %v4545_v40 = vunpack.i.h.bf16 %v5931_v19  ;;  %v4544_v2 = vunpack.i.l.bf16 %v5931_v19 }
 0x13e   : > { %v1993_v3 = vsel %vm1976_vm7, %v1960_v60, %v4539_v52  ;;  %v1994_v29 = vsel %vm1976_vm7, %v1961_v58, %v4540_v25  ;;  %v587_v52 = vld [vmem:[#allocation2 + $0x108] sm:$0xff] }
 0x13f   : > { %v5937_v16 = vpop.permute.xlu0 %4547  ;;  %v1995_v28 = vsel %vm1976_vm7, %v1962_v32, %v4544_v2 }
 0x140   : > { %v5935_v45 = vpop.permute.xlu1 %4552  ;;  %v4550_v27 = vunpack.i.h.bf16 %v5937_v16  ;;  %v4549_v31 = vunpack.i.l.bf16 %v5937_v16 }
 0x141   : > { %v4555_v41 = vunpack.i.h.bf16 %v5935_v45  ;;  %v4554_v9 = vunpack.i.l.bf16 %v5935_v45  ;;  %v1996_v45 = vsel %vm1976_vm7, %v1963_v26, %v4545_v40 }
 0x142   : > { %v2026_v18 = vsel %vm2009_vm8, %v1993_v3, %v4549_v31  ;;  %v2027_v56 = vsel %vm2009_vm8, %v1994_v29, %v4550_v27  ;;  %v585_v27 = vld [vmem:[#allocation2 + $0xf0] sm:$0xff]  ;;  %v586_v31 = vld [vmem:[#allocation2 + $0xf8] sm:$0xff] }
 0x143   : > { %v4558_v39 = vpop.permute.xlu0 %4557  ;;  %v2028_v4 = vsel %vm2009_vm8, %v1995_v28, %v4554_v9  ;;  %v2029_v15 = vsel %vm2009_vm8, %v1996_v45, %v4555_v41 }
 0x144   : > { %v4563_v11 = vpop.permute.xlu1 %4562  ;;  %v4560_v48 = vunpack.i.h.bf16 %v4558_v39  ;;  %v4559_v61 = vunpack.i.l.bf16 %v4558_v39 }
 0x145   : > { %v4565_v13 = vunpack.i.h.bf16 %v4563_v11  ;;  %v4564_v20 = vunpack.i.l.bf16 %v4563_v11 }
 0x146   : > { %v2059_v44 = vsel %vm2042_vm9, %v2026_v18, %v4559_v61  ;;  %v2060_v17 = vsel %vm2042_vm9, %v2027_v56, %v4560_v48 }
 0x147   : > { %v4568_v59 = vpop.permute.xlu0 %4567  ;;  %v2061_v7 = vsel %vm2042_vm9, %v2028_v4, %v4564_v20  ;;  %v2062_v36 = vsel %vm2042_vm9, %v2029_v15, %v4565_v13 }
 0x148   : > { %v4573_v55 = vpop.permute.xlu1 %4572  ;;  %v4570_v34 = vunpack.i.h.bf16 %v4568_v59  ;;  %v4569_v5 = vunpack.i.l.bf16 %v4568_v59 }
 0x149   : > { %v4575_v22 = vunpack.i.h.bf16 %v4573_v55  ;;  %v4574_v53 = vunpack.i.l.bf16 %v4573_v55  ;;  %v588_v55 = vld [vmem:[#allocation2 + $0x110] sm:$0xff] }
 0x14a   : > { %v2092_v57 = vsel %vm2075_vm10, %v2059_v44, %v4569_v5  ;;  %v2093_v19 = vsel %vm2075_vm10, %v2060_v17, %v4570_v34 }
 0x14b   : > { %v4578_v50 = vpop.permute.xlu0 %4577  ;;  %v2094_v23 = vsel %vm2075_vm10, %v2061_v7, %v4574_v53  ;;  %v2095_v38 = vsel %vm2075_vm10, %v2062_v36, %v4575_v22 }
 0x14c   : > { %v6015_v14 = vpop.permute.xlu1 %4582  ;;  %v4580_v21 = vunpack.i.h.bf16 %v4578_v50  ;;  %v4579_v54 = vunpack.i.l.bf16 %v4578_v50 }
 0x14d   : > { %v4585_v51 = vunpack.i.h.bf16 %v6015_v14  ;;  %v4584_v25 = vunpack.i.l.bf16 %v6015_v14 }
 0x14e   : > { %v2125_v16 = vsel %vm2108_vm11, %v2092_v57, %v4579_v54  ;;  %v2126_v62 = vsel %vm2108_vm11, %v2093_v19, %v4580_v21 }
 0x14f   : > { %v2149_v33 = vpack.c.bf16 %v2126_v62, %v2125_v16  ;;  %v4588_v46 = vpop.permute.xlu0 %4587  ;;  %v1899_v29 = vsel %vm454_vm0, %v586_v31, %v4585_v51  ;;  %v1898_v41 = vsel %vm454_vm0, %v585_v27, %v4584_v25 }
 0x150   : > { %v4593_v6 = vpop.permute.xlu1 %4592  ;;  %v4590_v30 = vunpack.i.h.bf16 %v4588_v46  ;;  %v4589_v37 = vunpack.i.l.bf16 %v4588_v46 }
 0x151   : > { %4105 = vmatprep.mubr.msk.bf16.mxu0 %vm2179_vm12, %v2149_v33  ;;  %v4595_v42 = vunpack.i.h.bf16 %v4593_v6  ;;  %v4594_v49 = vunpack.i.l.bf16 %v4593_v6 }
 0x152   : > { %v2128_v11 = vsel %vm2108_vm11, %v2095_v38, %v4590_v30  ;;  %v2127_v8 = vsel %vm2108_vm11, %v2094_v23, %v4589_v37 }
 0x153   : > { %v2150_v39 = vpack.c.bf16 %v2128_v11, %v2127_v8  ;;  %v4598_v0 = vpop.permute.xlu0 %4597  ;;  %v1901_v2 = vsel %vm454_vm0, %v588_v55, %v4595_v42  ;;  %v1900_v34 = vsel %vm454_vm0, %v587_v52, %v4594_v49 }
 0x154   : > { %v4603_v12 = vpop.permute.xlu1 %4602  ;;  %v4600_v59 = vunpack.i.h.bf16 %v4598_v0  ;;  %v4599_v60 = vunpack.i.l.bf16 %v4598_v0 }
 0x155   : > { %4106 = vmatmul.mubr.msk.bf16.gmra.mrb[16].mxu0 %vm2179_vm12, %v2150_v39  ;;  %v4605_v32 = vunpack.i.h.bf16 %v4603_v12  ;;  %v4604_v26 = vunpack.i.l.bf16 %v4603_v12 }
 0x156   : > { %v1932_v18 = vsel %vm1910_vm5, %v1899_v29, %v4600_v59  ;;  %v1931_v56 = vsel %vm1910_vm5, %v1898_v41, %v4599_v60 }
 0x157   : > { %v4608_v43 = vpop.permute.xlu0 %4607  ;;  %v1933_v9 = vsel %vm1910_vm5, %v1900_v34, %v4604_v26  ;;  %v1934_v14 = vsel %vm1910_vm5, %v1901_v2, %v4605_v32 }
 0x158   : > { %v4613_v63 = vpop.permute.xlu1 %4612  ;;  %v4610_v5 = vunpack.i.h.bf16 %v4608_v43  ;;  %v4609_v3 = vunpack.i.l.bf16 %v4608_v43 }
 0x159   : > { %v4615_v48 = vunpack.i.h.bf16 %v4613_v63  ;;  %v4614_v61 = vunpack.i.l.bf16 %v4613_v63 }
 0x15a   : > { %v1964_v53 = vsel %vm1943_vm6, %v1931_v56, %v4609_v3  ;;  %v1965_v57 = vsel %vm1943_vm6, %v1932_v18, %v4610_v5 }
 0x15b   : > { %v4618_v10 = vpop.permute.xlu0 %4617  ;;  %v1966_v44 = vsel %vm1943_vm6, %v1933_v9, %v4614_v61  ;;  %v1967_v17 = vsel %vm1943_vm6, %v1934_v14, %v4615_v48 }
 0x15c   : > { %v6037_v24 = vpop.permute.xlu1 %4622  ;;  %v4620_v13 = vunpack.i.h.bf16 %v4618_v10  ;;  %v4619_v20 = vunpack.i.l.bf16 %v4618_v10 }
 0x15d   : > { %v4625_v45 = vunpack.i.h.bf16 %v6037_v24  ;;  %v4624_v16 = vunpack.i.l.bf16 %v6037_v24 }
 0x15e   : > { %v1997_v4 = vsel %vm1976_vm7, %v1964_v53, %v4619_v20  ;;  %v1998_v15 = vsel %vm1976_vm7, %v1965_v57, %v4620_v13 }
 0x15f   : > { %v4628_v35 = vpop.permute.xlu0 %4627  ;;  %v1999_v10 = vsel %vm1976_vm7, %v1966_v44, %v4624_v16  ;;  %v589_v44 = vld [vmem:[#allocation2 + $0x120] sm:$0xff]  ;;  %v5041_v16 = vld [vmem:[#allocation2 + $0x138] sm:$0xff] }
 0x160   : > { %v6039_v47 = vpop.permute.xlu1 %4632  ;;  %v4630_v21 = vunpack.i.h.bf16 %v4628_v35  ;;  %v4629_v54 = vunpack.i.l.bf16 %v4628_v35 }
 0x161   : > { %v4635_v33 = vunpack.i.h.bf16 %v6039_v47  ;;  %v4634_v46 = vunpack.i.l.bf16 %v6039_v47  ;;  %v2000_v47 = vsel %vm1976_vm7, %v1967_v17, %v4625_v45  ;;  %v590_v17 = vld [vmem:[#allocation2 + $0x128] sm:$0xff] }
 0x162   : > { %v2030_v36 = vsel %vm2009_vm8, %v1997_v4, %v4629_v54  ;;  %v2031_v30 = vsel %vm2009_vm8, %v1998_v15, %v4630_v21 }
 0x163   : > { %v4638_v40 = vpop.permute.xlu0 %4637  ;;  %v2032_v51 = vsel %vm2009_vm8, %v1999_v10, %v4634_v46  ;;  %v2033_v25 = vsel %vm2009_vm8, %v2000_v47, %v4635_v33 }
 0x164   : > { %v4643_v58 = vpop.permute.xlu1 %4642  ;;  %v4640_v19 = vunpack.i.h.bf16 %v4638_v40  ;;  %v4639_v28 = vunpack.i.l.bf16 %v4638_v40 }
 0x165   : > { %v4645_v37 = vunpack.i.h.bf16 %v4643_v58  ;;  %v4644_v23 = vunpack.i.l.bf16 %v4643_v58 }
 0x166   : > { %v2063_v11 = vsel %vm2042_vm9, %v2030_v36, %v4639_v28  ;;  %v2064_v8 = vsel %vm2042_vm9, %v2031_v30, %v4640_v19  ;;  %v5040_v28 = vld [vmem:[#allocation2 + $0x140] sm:$0xff] }
 0x167   : > { %v4648_v22 = vpop.permute.xlu0 %4647  ;;  %v2065_v32 = vsel %vm2042_vm9, %v2032_v51, %v4644_v23  ;;  %v2066_v26 = vsel %vm2042_vm9, %v2033_v25, %v4645_v37 }
 0x168   : > { %v4653_v50 = vpop.permute.xlu1 %4652  ;;  %v4650_v62 = vunpack.i.h.bf16 %v4648_v22  ;;  %v4649_v6 = vunpack.i.l.bf16 %v4648_v22 }
 0x169   : > { %v4655_v0 = vunpack.i.h.bf16 %v4653_v50  ;;  %v4654_v63 = vunpack.i.l.bf16 %v4653_v50 }
 0x16a   : > { %v2096_v43 = vsel %vm2075_vm10, %v2063_v11, %v4649_v6  ;;  %v2097_v24 = vsel %vm2075_vm10, %v2064_v8, %v4650_v62 }
 0x16b   : > { %v4658_v38 = vpop.permute.xlu0 %4657  ;;  %v2098_v59 = vsel %vm2075_vm10, %v2065_v32, %v4654_v63  ;;  %v2099_v60 = vsel %vm2075_vm10, %v2066_v26, %v4655_v0 }
 0x16c   : > { %v6061_v7 = vpop.permute.xlu1 %4662  ;;  %v4660_v12 = vunpack.i.h.bf16 %v4658_v38  ;;  %v4659_v39 = vunpack.i.l.bf16 %v4658_v38 }
 0x16d   : > { %v4665_v56 = vunpack.i.h.bf16 %v6061_v7  ;;  %v4664_v13 = vunpack.i.l.bf16 %v6061_v7 }
 0x16e   : > { %v2129_v35 = vsel %vm2108_vm11, %v2096_v43, %v4659_v39  ;;  %v2130_v42 = vsel %vm2108_vm11, %v2097_v24, %v4660_v12 }
 0x16f   : > { %v2151_v52 = vpack.c.bf16 %v2130_v42, %v2129_v35  ;;  %v4668_v55 = vpop.permute.xlu0 %4667  ;;  %v1903_v15 = vsel %vm454_vm0, %v590_v17, %v4665_v56  ;;  %v1902_v33 = vsel %vm454_vm0, %v589_v44, %v4664_v13 }
 0x170   : > { %v4673_v49 = vpop.permute.xlu1 %4672  ;;  %v4670_v27 = vunpack.i.h.bf16 %v4668_v55  ;;  %v4669_v31 = vunpack.i.l.bf16 %v4668_v55 }
 0x171   : > { %4109 = vmatprep.mubr.msk.bf16.mxu0 %vm2179_vm12, %v2151_v52  ;;  %v4675_v14 = vunpack.i.h.bf16 %v4673_v49  ;;  %v4674_v18 = vunpack.i.l.bf16 %v4673_v49 }
 0x172   : > { %v2132_v58 = vsel %vm2108_vm11, %v2099_v60, %v4670_v27  ;;  %v2131_v48 = vsel %vm2108_vm11, %v2098_v59, %v4669_v31 }
 0x173   : > { %v2152_v40 = vpack.c.bf16 %v2132_v58, %v2131_v48  ;;  %v4678_v2 = vpop.permute.xlu0 %4677  ;;  %v1905_v45 = vsel %vm454_vm0, %v5040_v28, %v4675_v14  ;;  %v1904_v62 = vsel %vm454_vm0, %v5041_v16, %v4674_v18 }
 0x174   : > { %v4683_v61 = vpop.permute.xlu1 %4682  ;;  %v4680_v21 = vunpack.i.h.bf16 %v4678_v2  ;;  %v4679_v54 = vunpack.i.l.bf16 %v4678_v2 }
 0x175   : > { %4110 = vmatmul.mubr.msk.bf16.gmra.mrb[20].mxu0 %vm2179_vm12, %v2152_v40  ;;  %v4685_v20 = vunpack.i.h.bf16 %v4683_v61  ;;  %v4684_v50 = vunpack.i.l.bf16 %v4683_v61 }
 0x176   : > { %v1936_v36 = vsel %vm1910_vm5, %v1903_v15, %v4680_v21  ;;  %v1935_v30 = vsel %vm1910_vm5, %v1902_v33, %v4679_v54 }
 0x177   : > { %v4688_v5 = vpop.permute.xlu0 %4687  ;;  %v1937_v46 = vsel %vm1910_vm5, %v1904_v62, %v4684_v50  ;;  %v1938_v7 = vsel %vm1910_vm5, %v1905_v45, %v4685_v20 }
 0x178   : > { %v4693_v34 = vpop.permute.xlu1 %4692  ;;  %v4690_v6 = vunpack.i.h.bf16 %v4688_v5  ;;  %v4689_v4 = vunpack.i.l.bf16 %v4688_v5 }
 0x179   : > { %v4695_v53 = vunpack.i.h.bf16 %v4693_v34  ;;  %v4694_v57 = vunpack.i.l.bf16 %v4693_v34 }
 0x17a   : > { %v1968_v63 = vsel %vm1943_vm6, %v1935_v30, %v4689_v4  ;;  %v1969_v43 = vsel %vm1943_vm6, %v1936_v36, %v4690_v6 }
 0x17b   : > { %v4698_v29 = vpop.permute.xlu0 %4697  ;;  %v1970_v11 = vsel %vm1943_vm6, %v1937_v46, %v4694_v57  ;;  %v1971_v8 = vsel %vm1943_vm6, %v1938_v7, %v4695_v53 }
 0x17c   : > { %v6083_v3 = vpop.permute.xlu1 %4702  ;;  %v4700_v37 = vunpack.i.h.bf16 %v4698_v29  ;;  %v4699_v23 = vunpack.i.l.bf16 %v4698_v29 }
 0x17d   : > { %v4705_v47 = vunpack.i.h.bf16 %v6083_v3  ;;  %v4704_v35 = vunpack.i.l.bf16 %v6083_v3 }
 0x17e   : > { %v2001_v51 = vsel %vm1976_vm7, %v1968_v63, %v4699_v23  ;;  %v2002_v25 = vsel %vm1976_vm7, %v1969_v43, %v4700_v37  ;;  %v5044_v63 = vld [vmem:[#allocation2 + $0x168] sm:$0xff] }
 0x17f   : > { %v4708_v9 = vpop.permute.xlu0 %4707  ;;  %v2003_v29 = vsel %vm1976_vm7, %v1970_v11, %v4704_v35  ;;  %v5042_v11 = vld [vmem:[#allocation2 + $0x158] sm:$0xff]  ;;  %v5045_v35 = vld [vmem:[#allocation2 + $0x150] sm:$0xff] }
 0x180   : > { %v6085_v41 = vpop.permute.xlu1 %4712  ;;  %v4710_v12 = vunpack.i.h.bf16 %v4708_v9  ;;  %v4709_v39 = vunpack.i.l.bf16 %v4708_v9 }
 0x181   : > { %v4715_v52 = vunpack.i.h.bf16 %v6085_v41  ;;  %v4714_v55 = vunpack.i.l.bf16 %v6085_v41  ;;  %v2004_v41 = vsel %vm1976_vm7, %v1971_v8, %v4705_v47 }
 0x182   : > { %v2034_v26 = vsel %vm2009_vm8, %v2001_v51, %v4709_v39  ;;  %v2035_v27 = vsel %vm2009_vm8, %v2002_v25, %v4710_v12  ;;  %v5043_v39 = vld [vmem:[#allocation2 + $0x170] sm:$0xff] }
 0x183   : > { %v4718_v19 = vpop.permute.xlu0 %4717  ;;  %v2036_v56 = vsel %vm2009_vm8, %v2003_v29, %v4714_v55  ;;  %v2037_v13 = vsel %vm2009_vm8, %v2004_v41, %v4715_v52 }
 0x184   : > { %v4723_v22 = vpop.permute.xlu1 %4722  ;;  %v4720_v24 = vunpack.i.h.bf16 %v4718_v19  ;;  %v4719_v10 = vunpack.i.l.bf16 %v4718_v19 }
 0x185   : > { %v4725_v31 = vunpack.i.h.bf16 %v4723_v22  ;;  %v4724_v59 = vunpack.i.l.bf16 %v4723_v22 }
 0x186   : > { %v2067_v58 = vsel %vm2042_vm9, %v2034_v26, %v4719_v10  ;;  %v2068_v48 = vsel %vm2042_vm9, %v2035_v27, %v4720_v24 }
 0x187   : > { %v4728_v0 = vpop.permute.xlu0 %4727  ;;  %v2069_v44 = vsel %vm2042_vm9, %v2036_v56, %v4724_v59  ;;  %v2070_v17 = vsel %vm2042_vm9, %v2037_v13, %v4725_v31 }
 0x188   : > { %v4733_v38 = vpop.permute.xlu1 %4732  ;;  %v4730_v42 = vunpack.i.h.bf16 %v4728_v0  ;;  %v4729_v49 = vunpack.i.l.bf16 %v4728_v0 }
 0x189   : > { %v4735_v2 = vunpack.i.h.bf16 %v4733_v38  ;;  %v4734_v34 = vunpack.i.l.bf16 %v4733_v38 }
 0x18a   : > { %v2100_v5 = vsel %vm2075_vm10, %v2067_v58, %v4729_v49  ;;  %v2101_v3 = vsel %vm2075_vm10, %v2068_v48, %v4730_v42 }
 0x18b   : > { %v4738_v60 = vpop.permute.xlu0 %4737  ;;  %v2102_v22 = vsel %vm2075_vm10, %v2069_v44, %v4734_v34  ;;  %v2103_v53 = vsel %vm2075_vm10, %v2070_v17, %v4735_v2 }
 0x18c   : > { %v4743_v32 = vpop.permute.xlu1 %4742  ;;  %v4740_v61 = vunpack.i.h.bf16 %v4738_v60  ;;  %v4739_v40 = vunpack.i.l.bf16 %v4738_v60 }
 0x18d   : > { %v4745_v4 = vunpack.i.h.bf16 %v4743_v32  ;;  %v4744_v36 = vunpack.i.l.bf16 %v4743_v32 }
 0x18e   : > { %v2133_v9 = vsel %vm2108_vm11, %v2100_v5, %v4739_v40  ;;  %v2134_v14 = vsel %vm2108_vm11, %v2101_v3, %v4740_v61 }
 0x18f   : > { %v2153_v20 = vpack.c.bf16 %v2134_v14, %v2133_v9  ;;  %v4748_v50 = vpop.permute.xlu0 %4747  ;;  %v1907_v8 = vsel %vm454_vm0, %v5042_v11, %v4745_v4  ;;  %v1906_v42 = vsel %vm454_vm0, %v5045_v35, %v4744_v36 }
 0x190   : > { %v4753_v18 = vpop.permute.xlu1 %4752  ;;  %v4750_v21 = vunpack.i.h.bf16 %v4748_v50  ;;  %v4749_v54 = vunpack.i.l.bf16 %v4748_v50 }
 0x191   : > { %4113 = vmatprep.mubr.msk.bf16.mxu0 %vm2179_vm12, %v2153_v20  ;;  %v4755_v33 = vunpack.i.h.bf16 %v4753_v18  ;;  %v4754_v46 = vunpack.i.l.bf16 %v4753_v18 }
 0x192   : > { %v2136_v57 = vsel %vm2108_vm11, %v2103_v53, %v4750_v21  ;;  %v2135_v19 = vsel %vm2108_vm11, %v2102_v22, %v4749_v54  ;;  %v6147_v21 = vld [vmem:[%s6644_s3] ss:$0 sm:$0xff] }
 0x193   : > { %v2154_v45 = vpack.c.bf16 %v2136_v57, %v2135_v19  ;;  %v4758_v16 = vpop.permute.xlu0 %4757  ;;  %v1909_v0 = vsel %vm454_vm0, %v5043_v39, %v4755_v33  ;;  %v1908_v43 = vsel %vm454_vm0, %v5044_v63, %v4754_v46 }
 0x194   : > { %v4763_v28 = vpop.permute.xlu1 %4762  ;;  %v4760_v23 = vunpack.i.h.bf16 %v4758_v16  ;;  %v4759_v38 = vunpack.i.l.bf16 %v4758_v16 }
 0x195   : > { %4114 = vmatmul.mubr.msk.bf16.gmra.mrb[24].mxu0 %vm2179_vm12, %v2154_v45  ;;  %v4765_v30 = vunpack.i.h.bf16 %v4763_v28  ;;  %v4764_v37 = vunpack.i.l.bf16 %v4763_v28 }
 0x196   : > { %v1940_v52 = vsel %vm1910_vm5, %v1907_v8, %v4760_v23  ;;  %v1939_v55 = vsel %vm1910_vm5, %v1906_v42, %v4759_v38 }
 0x197   : > { %v4768_v6 = vpop.permute.xlu0 %4767  ;;  %v1941_v49 = vsel %vm1910_vm5, %v1908_v43, %v4764_v37  ;;  %v1942_v51 = vsel %vm1910_vm5, %v1909_v0, %v4765_v30 }
 0x198   : > { %v4773_v62 = vpop.permute.xlu1 %4772  ;;  %v4769_v25 = vunpack.i.l.bf16 %v4768_v6  ;;  %v4770_v32 = vunpack.i.h.bf16 %v4768_v6 }
 0x199   : > { %v4775_v24 = vunpack.i.h.bf16 %v4773_v62  ;;  %v4774_v10 = vunpack.i.l.bf16 %v4773_v62 }
 0x19a   : > { %v1972_v5 = vsel %vm1943_vm6, %v1939_v55, %v4769_v25  ;;  %v1973_v9 = vsel %vm1943_vm6, %v1940_v52, %v4770_v32 }
 0x19b   : > { %v4778_v7 = vpop.permute.xlu0 %4777  ;;  %v1974_v48 = vsel %vm1943_vm6, %v1941_v49, %v4774_v10  ;;  %v1975_v61 = vsel %vm1943_vm6, %v1942_v51, %v4775_v24 }
 0x19c   : > { %v4783_v15 = vpop.permute.xlu1 %4782  ;;  %v4780_v31 = vunpack.i.h.bf16 %v4778_v7  ;;  %v4779_v59 = vunpack.i.l.bf16 %v4778_v7 }
 0x19d   : > { %v4784_v26 = vunpack.i.l.bf16 %v4783_v15  ;;  %v4785_v27 = vunpack.i.h.bf16 %v4783_v15 }
 0x19e   : > { %v2005_v20 = vsel %vm1976_vm7, %v1972_v5, %v4779_v59  ;;  %v2006_v50 = vsel %vm1976_vm7, %v1973_v9, %v4780_v31  ;;  %v2608_v5 = vld [vmem:[#allocation3 + $0x1] sm:$0xff] }
 0x19f   : > { %v4788_v47 = vpop.permute.xlu0 %4787  ;;  %v2007_v14 = vsel %vm1976_vm7, %v1974_v48, %v4784_v26  ;;  %v2008_v13 = vsel %vm1976_vm7, %v1975_v61, %v4785_v27 }
 0x1a0   : > { %v4793_v12 = vpop.permute.xlu1 %4792  ;;  %v4789_v2 = vunpack.i.l.bf16 %v4788_v47  ;;  %v4790_v3 = vunpack.i.h.bf16 %v4788_v47 }
 0x1a1   : > { %v4794_v60 = vunpack.i.l.bf16 %v4793_v12  ;;  %v4795_v40 = vunpack.i.h.bf16 %v4793_v12 }
 0x1a2   : > { %v2038_v22 = vsel %vm2009_vm8, %v2005_v20, %v4789_v2  ;;  %v2039_v28 = vsel %vm2009_vm8, %v2006_v50, %v4790_v3 }
 0x1a3   : > { %v4798_v34 = vpop.permute.xlu0 %4797  ;;  %v2040_v44 = vsel %vm2009_vm8, %v2007_v14, %v4794_v60  ;;  %v2041_v54 = vsel %vm2009_vm8, %v2008_v13, %v4795_v40 }
 0x1a4   : > { %v4803_v58 = vpop.permute.xlu1 %4802  ;;  %v4800_v18 = vunpack.i.h.bf16 %v4798_v34  ;;  %v4799_v56 = vunpack.i.l.bf16 %v4798_v34 }
 0x1a5   : > { %v4805_v29 = vunpack.i.h.bf16 %v4803_v58  ;;  %v4804_v41 = vunpack.i.l.bf16 %v4803_v58 }
 0x1a6   : > { %v2071_v4 = vsel %vm2042_vm9, %v2038_v22, %v4799_v56  ;;  %v2072_v15 = vsel %vm2042_vm9, %v2039_v28, %v4800_v18  ;;  %v2616_v18 = vld [vmem:[#allocation3 + $0x2] sm:$0xff] }
 0x1a7   : > { %v4808_v19 = vpop.permute.xlu0 %4807  ;;  %v2073_v45 = vsel %vm2042_vm9, %v2040_v44, %v4804_v41  ;;  %v2074_v16 = vsel %vm2042_vm9, %v2041_v54, %v4805_v29 }
 0x1a8   : > { %v4813_v17 = vpop.permute.xlu1 %4812  ;;  %v4810_v62 = vunpack.i.h.bf16 %v4808_v19  ;;  %v4091_v6 = vpop.f32.mrb[0].mxu0  ;;  %v4809_v33 = vunpack.i.l.bf16 %v4808_v19 }
 0x1a9   : > { %v4815_v53 = vunpack.i.h.bf16 %v4813_v17  ;;  %v4814_v57 = vunpack.i.l.bf16 %v4813_v17  ;;  %v2278_v46 = vadd.f32 %v4091_v6, %v6147_v21  ;;  %v2269_v7 = vpop.f32.mrb[1].mxu0 }
 0x1aa   : > { %v2105_v37 = vsel %vm2075_vm10, %v2072_v15, %v4810_v62  ;;  %v2270_v23 = vadd.f32 %v6147_v21, %v2269_v7  ;;  %v4092_v38 = vpop.f32.mrb[2].mxu0  ;;  %v2104_v55 = vsel %vm2075_vm10, %v2071_v4, %v4809_v33  ;;  %v4978_v7 = vld [vmem:[%s6645_s4 + $0x40] sm:$0xff]  }
 0x1ab   : > { %v2106_v36 = vsel %vm2075_vm10, %v2073_v45, %v4814_v57  ;;  %v2107_v30 = vsel %vm2075_vm10, %v2074_v16, %v4815_v53  ;;  %vm2398_vm0 = vcmp.ge.f32.partialorder %v2278_v46, 0.0  ;;  %v2430_v8 = vmul.f32 0.1, %v2278_v46  ;;  %v4818_v0 = vpop.permute.xlu0 %4817  ;;  %v2272_v63 = vpop.f32.mrb[3].mxu0  ;;  %3986 = vmatprep.subr.bf16.mxu1 %v4978_v7 }
 0x1ac   : > { %v4823_v11 = vpop.permute.xlu1 %4822  ;;  %v2281_v12 = vadd.f32 %v4092_v38, %v6147_v21  ;;  %vm2396_vm1 = vcmp.ge.f32.partialorder %v2270_v23, 0.0  ;;  %v2428_v43 = vmul.f32 0.1, %v2270_v23  ;;  %v4820_v10 = vunpack.i.h.bf16 %v4818_v0 }
 0x1ad   : > { %v4825_v39 = vunpack.i.h.bf16 %v4823_v11  ;;  %v4824_v24 = vunpack.i.l.bf16 %v4823_v11  ;;  %v2462_v47 = vsel %vm2398_vm0, %v2278_v46, %v2430_v8  ;;  %v4819_v25 = vunpack.i.l.bf16 %v4818_v0  ;;  %v4980_v0 = vld [vmem:[%s6645_s4 + $0x48] sm:$0xff]  }
 0x1ae   : > { %vm2399_vm2 = vcmp.ge.f32.partialorder %v2281_v12, 0.0  ;;  %v2431_v35 = vmul.f32 0.1, %v2281_v12  ;;  %v2460_v49 = vsel %vm2396_vm1, %v2270_v23, %v2428_v43  ;;  %v2138_v52 = vsel %vm2108_vm11, %v2105_v37, %v4820_v10 }
 0x1af   : > { %v2140_v42 = vsel %vm2108_vm11, %v2107_v30, %v4825_v39  ;;  %v2139_v51 = vsel %vm2108_vm11, %v2106_v36, %v4824_v24  ;;  %v2492_v32 = vmax.f32 %v2460_v49, %v2462_v47  ;;  %v2273_v26 = vadd.f32 %v6147_v21, %v2272_v63  ;;  %v4979_v36 = vld [vmem:[%s6645_s4] sm:$0xff]   ;;  %v4981_v24 = vld [vmem:[%s6645_s4 + $0x8] sm:$0xff]  }
 0x1b0   : > { %v2156_v27 = vpack.c.bf16 %v2140_v42, %v2139_v51  ;;  %v2137_v31 = vsel %vm2108_vm11, %v2104_v55, %v4819_v25  ;;  %v2463_v59 = vsel %vm2399_vm2, %v2281_v12, %v2431_v35  ;;  %3987 = vmatpush3.bf16.msra.mxu1 %v4979_v36 }
 0x1b1   : > { %2509 = vst.msk [vmem:[#allocation4] sm:$0xff] %vm2508_vm13, %v2492_v32  ;;  %v2155_v60 = vpack.c.bf16 %v2138_v52, %v2137_v31  ;;  %vm2397_vm3 = vcmp.ge.f32.partialorder %v2273_v26, 0.0  ;;  %v2429_v58 = vmul.f32 0.1, %v2273_v26  ;;  %3988 = vmatprep.subr.bf16.mxu1 %v4980_v0  ;;  %v4982_v52 = vld [vmem:[%s6645_s4 + $0x50] sm:$0xff]  }
 0x1b3   : > { %v2461_v48 = vsel %vm2397_vm3, %v2273_v26, %v2429_v58  ;;  %4117 = vmatprep.mubr.msk.bf16.mxu0 %vm2179_vm12, %v2155_v60  ;;  %v4983_v26 = vld [vmem:[%s6645_s4 + $0x10] sm:$0xff]   ;;  %v4984_v58 = vld [vmem:[%s6645_s4 + $0x58] sm:$0xff]  }
 0x1b4   : > { %v2493_v61 = vmax.f32 %v2461_v48, %v2463_v59  ;;  %4118 = vmatmul.mubr.msk.bf16.gmra.mrb[28].mxu0 %vm2179_vm12, %v2156_v27  ;;  %3989 = vmatpush3.bf16.msra.mxu1 %v4981_v24  ;;  %v4985_v48 = vld [vmem:[%s6645_s4 + $0x18] sm:$0xff]  }
 0x1b5   : > { %3990 = vmatprep.subr.bf16.mxu1 %v4982_v52 }
 0x1b6   : > { %2510 = vst.msk [vmem:[#allocation4 + $0x8] sm:$0xff] %vm2508_vm13, %v2493_v61  ;;  %v4986_v61 = vld [vmem:[%s6645_s4 + $0x60] sm:$0xff]  }
 0x1b8   : > { %3991 = vmatpush3.bf16.msra.mxu1 %v4983_v26 }
 0x1b9   : > { %3992 = vmatprep.subr.bf16.mxu1 %v4984_v58 }
 0x1bc   : > { %3993 = vmatpush3.bf16.msra.mxu1 %v4985_v48 }
 0x1bd   : > { %v2525_v40 = vld [vmem:[#allocation4] ss:$2 sm:$0xff]  ;;  %v2541_v2 = vld [vmem:[#allocation4 + $0x1] ss:$2 sm:$0xff]  ;;  %3994 = vmatprep.subr.bf16.mxu1 %v4986_v61 }
 0x1be   : > { %v2556_v34 = vmax.f32 %v2525_v40, %v2541_v2  ;;  %v4987_v40 = vld [vmem:[%s6645_s4 + $0x20] sm:$0xff]   ;;  %v4988_v2 = vld [vmem:[%s6645_s4 + $0x68] sm:$0xff]  }
 0x1c0   : > { %2592 = vst.msk [vmem:[#allocation3 + $0x11] sm:$0xff] %vm2508_vm13, %v2556_v34  ;;  %3995 = vmatpush3.bf16.msra.mxu1 %v4987_v40 }
 0x1c1   : > { %3996 = vmatprep.subr.bf16.mxu1 %v4988_v2 }
 0x1c7   : > { %v6173_v3 = vld [vmem:[#allocation3 + $0x11] sm:$0xff] }
 0x1c8   : > { %v4826_v29 = vpack.i.bf16 %v6173_v3, %v2608_v5  ;;  %v4095_v41 = vpop.f32.mrb[4].mxu0  ;;  %v2617_v56 = vld [vmem:[#allocation3 + $0x12] sm:$0xff] }
 0x1c9   : > { %v2294_v9 = vadd.f32 %v4095_v41, %v6147_v21  ;;  %v2285_v14 = vpop.f32.mrb[5].mxu0  ;;  %v4831_v53 = vpack.i.bf16 %v2617_v56, %v2616_v18  ;;  %v6193_v37 = vld [vmem:[#allocation3 + $0x10] sm:$0xff]  ;;  %v4992_v18 = vld [vmem:[%s6645_s4 + $0x78] sm:$0xff]  }
 0x1ca   : > { %4827 = vrot.lane.b32.xlu1 %v4826_v29, %s5084_s21  ;;  %v2286_v13 = vadd.f32 %v6147_v21, %v2285_v14  ;;  %v4096_v20 = vpop.f32.mrb[6].mxu0  ;;  %v4989_v29 = vld [vmem:[%s6645_s4 + $0x28] sm:$0xff]   ;;  %v4991_v14 = vld [vmem:[%s6645_s4 + $0x30] sm:$0xff]  }
 0x1cb   : > { %vm2402_vm4 = vcmp.ge.f32.partialorder %v2294_v9, 0.0  ;;  %v2434_v50 = vmul.f32 0.1, %v2294_v9  ;;  %v2297_v44 = vadd.f32 %v4096_v20, %v6147_v21  ;;  %v2288_v17 = vpop.f32.mrb[7].mxu0  ;;  %3997 = vmatpush3.bf16.msra.mxu1 %v4989_v29 }
 0x1cc   : > { %vm2400_vm5 = vcmp.ge.f32.partialorder %v2286_v13, 0.0  ;;  %v2432_v54 = vmul.f32 0.1, %v2286_v13  ;;  %v2289_v22 = vadd.f32 %v6147_v21, %v2288_v17 }
 0x1cd   : > { %v2466_v57 = vsel %vm2402_vm4, %v2294_v9, %v2434_v50  ;;  %vm2403_vm6 = vcmp.ge.f32.partialorder %v2297_v44, 0.0  ;;  %v2435_v19 = vmul.f32 0.1, %v2297_v44  ;;  %v4990_v9 = vld [vmem:[%s6645_s4 + $0x70] sm:$0xff]  }
 0x1ce   : > { %v2464_v28 = vsel %vm2400_vm5, %v2286_v13, %v2432_v54  ;;  %vm2401_vm7 = vcmp.ge.f32.partialorder %v2289_v22, 0.0  ;;  %v2433_v45 = vmul.f32 0.1, %v2289_v22  ;;  %4832 = vrot.lane.b32.xlu1 %v4831_v53, %s5085_s22  ;;  %3998 = vmatprep.subr.bf16.mxu1 %v4990_v9 }
 0x1cf   : > { %v2494_v16 = vmax.f32 %v2464_v28, %v2466_v57  ;;  %v2467_v62 = vsel %vm2403_vm6, %v2297_v44, %v2435_v19  ;;  %3999 = vmatpush3.bf16.msra.mxu1 %v4991_v14 }
 0x1d0   : > { %v2465_v6 = vsel %vm2401_vm7, %v2289_v22, %v2433_v45  ;;  %4000 = vmatprep.subr.bf16.mxu1 %v4992_v18 }
 0x1d1   : > { %2511 = vst.msk [vmem:[#allocation4 + $0x10] sm:$0xff] %vm2508_vm13, %v2494_v16  ;;  %v2495_v4 = vmax.f32 %v2465_v6, %v2467_v62 }
 0x1d3   : > { %2512 = vst.msk [vmem:[#allocation4 + $0x18] sm:$0xff] %vm2508_vm13, %v2495_v4 }
 0x1da   : > { %v2527_v15 = vld [vmem:[#allocation4 + $0x10] ss:$2 sm:$0xff]  ;;  %v2543_v33 = vld [vmem:[#allocation4 + $0x11] ss:$2 sm:$0xff] }
 0x1db   : > { %v2557_v46 = vmax.f32 %v2527_v15, %v2543_v33 }
 0x1dd   : > { %2593 = vst.msk [vmem:[#allocation3 + $0x21] sm:$0xff] %vm2508_vm13, %v2557_v46 }
 0x1e4   : > { %v6191_v30 = vld [vmem:[#allocation3 + $0x22] sm:$0xff] }
 0x1e5   : > { %v6195_v23 = vld [vmem:[#allocation3 + $0x20] sm:$0xff]  ;;  %v4836_v38 = vpack.i.bf16 %v6191_v30, %v2617_v56  ;;  %v4993_v56 = vld [vmem:[%s6645_s4 + $0x38] sm:$0xff]  }
 0x1e6   : > { %v4841_v11 = vpack.i.bf16 %v6195_v23, %v6193_v37  ;;  %v6251_v13 = vld [vmem:[#allocation3 + $0x21] sm:$0xff]  ;;  %4001 = vmatpush3.bf16.msra.mxu1 %v4993_v56 }
 0x1e7   : > { %4837 = vrot.lane.b32.xlu0 %v4836_v38, %s5084_s21 }
 0x1e8   : > { %4842 = vrot.lane.b32.xlu1 %v4841_v11, %s5086_s29  ;;  %v4099_v8 = vpop.f32.mrb[8].mxu0 }
 0x1e9   : > { %v2310_v12 = vadd.f32 %v4099_v8, %v6147_v21  ;;  %v2301_v39 = vpop.f32.mrb[9].mxu0 }
 0x1ea   : > { %v2302_v63 = vadd.f32 %v6147_v21, %v2301_v39  ;;  %v4100_v43 = vpop.f32.mrb[10].mxu0 }
 0x1eb   : > { %vm2406_vm8 = vcmp.ge.f32.partialorder %v2310_v12, 0.0  ;;  %v2438_v10 = vmul.f32 0.1, %v2310_v12  ;;  %v2313_v47 = vadd.f32 %v4100_v43, %v6147_v21  ;;  %v2304_v35 = vpop.f32.mrb[11].mxu0 }
 0x1ec   : > { %vm2404_vm9 = vcmp.ge.f32.partialorder %v2302_v63, 0.0  ;;  %v2436_v42 = vmul.f32 0.1, %v2302_v63  ;;  %v2305_v49 = vadd.f32 %v6147_v21, %v2304_v35 }
 0x1ed   : > { %v2470_v51 = vsel %vm2406_vm8, %v2310_v12, %v2438_v10  ;;  %vm2407_vm10 = vcmp.ge.f32.partialorder %v2313_v47, 0.0  ;;  %v2439_v25 = vmul.f32 0.1, %v2313_v47 }
 0x1ee   : > { %v2468_v55 = vsel %vm2404_vm9, %v2302_v63, %v2436_v42  ;;  %vm2405_vm11 = vcmp.ge.f32.partialorder %v2305_v49, 0.0  ;;  %v2437_v32 = vmul.f32 0.1, %v2305_v49 }
 0x1ef   : > { %v2496_v27 = vmax.f32 %v2468_v55, %v2470_v51  ;;  %v2471_v31 = vsel %vm2407_vm10, %v2313_v47, %v2439_v25 }
 0x1f0   : > { %v2469_v59 = vsel %vm2405_vm11, %v2305_v49, %v2437_v32 }
 0x1f1   : > { %2513 = vst.msk [vmem:[#allocation4 + $0x20] sm:$0xff] %vm2508_vm13, %v2496_v27  ;;  %v2497_v60 = vmax.f32 %v2469_v59, %v2471_v31 }
 0x1f3   : > { %2514 = vst.msk [vmem:[#allocation4 + $0x28] sm:$0xff] %vm2508_vm13, %v2497_v60 }
 0x1fa   : > { %v2529_v34 = vld [vmem:[#allocation4 + $0x20] ss:$2 sm:$0xff]  ;;  %v2545_v5 = vld [vmem:[#allocation4 + $0x21] ss:$2 sm:$0xff] }
 0x1fb   : > { %v2558_v41 = vmax.f32 %v2529_v34, %v2545_v5 }
 0x1fd   : > { %2594 = vst.msk [vmem:[#allocation3 + $0x31] sm:$0xff] %vm2508_vm13, %v2558_v41 }
 0x204   : > { %v6253_v20 = vld [vmem:[#allocation3 + $0x30] sm:$0xff] }
 0x205   : > { %v6255_v50 = vld [vmem:[#allocation3 + $0x31] sm:$0xff]  ;;  %v4846_v17 = vpack.i.bf16 %v6253_v20, %v6195_v23 }
 0x206   : > { %v6257_v44 = vld [vmem:[#allocation3 + $0x32] sm:$0xff]  ;;  %v4856_v54 = vpack.i.bf16 %v6255_v50, %v6251_v13 }
 0x207   : > { %v2917_v22 = vpack.c.bf16 %v6257_v44, %v6191_v30  ;;  %4847 = vrot.lane.b32.xlu0 %v4846_v17, %s5085_s22  ;;  %v4861_v28 = vpack.i.bf16 %v6257_v44, %v6191_v30 }
 0x208   : > { %4857 = vrot.lane.b32.xlu1 %v4856_v54, %s5084_s21  ;;  %v4103_v53 = vpop.f32.mrb[12].mxu0 }
 0x209   : > { %v2326_v57 = vadd.f32 %v4103_v53, %v6147_v21  ;;  %v2317_v19 = vpop.f32.mrb[13].mxu0 }
 0x20a   : > { %v2318_v45 = vadd.f32 %v6147_v21, %v2317_v19  ;;  %v4104_v16 = vpop.f32.mrb[14].mxu0 }
 0x20b   : > { %vm2410_vm12 = vcmp.ge.f32.partialorder %v2326_v57, 0.0  ;;  %v2442_v62 = vmul.f32 0.1, %v2326_v57  ;;  %v2329_v6 = vadd.f32 %v4104_v16, %v6147_v21  ;;  %v2320_v4 = vpop.f32.mrb[15].mxu0  ;;  %4852 = vrot.lane.b32.xlu0 %v4856_v54, %s5086_s29 }
 0x20c   : > { %4862 = vrot.lane.b32.xlu1 %v4861_v28, %s5085_s22  ;;  %vm2408_vm14 = vcmp.ge.f32.partialorder %v2318_v45, 0.0  ;;  %v2440_v15 = vmul.f32 0.1, %v2318_v45  ;;  %v2321_v33 = vadd.f32 %v6147_v21, %v2320_v4 }
 0x20d   : > { %v2474_v46 = vsel %vm2410_vm12, %v2326_v57, %v2442_v62  ;;  %vm2411_vm15 = vcmp.ge.f32.partialorder %v2329_v6, 0.0  ;;  %v2443_v7 = vmul.f32 0.1, %v2329_v6 }
 0x20e   : > { %v2472_v36 = vsel %vm2408_vm14, %v2318_v45, %v2440_v15  ;;  %vm2409_vm0 = vcmp.ge.f32.partialorder %v2321_v33, 0.0  ;;  %v2441_v38 = vmul.f32 0.1, %v2321_v33  ;;  %vm2873_vm14 = vcmask 523264  }
 0x20f   : > { %v2498_v11 = vmax.f32 %v2472_v36, %v2474_v46  ;;  %v2475_v8 = vsel %vm2411_vm15, %v2329_v6, %v2443_v7  ;;  %vm2882_vm15 = vcmask 785408  }
 0x210   : > { %v2473_v12 = vsel %vm2409_vm0, %v2321_v33, %v2441_v38 }
 0x211   : > { %2515 = vst.msk [vmem:[#allocation4 + $0x30] sm:$0xff] %vm2508_vm13, %v2498_v11  ;;  %v2499_v39 = vmax.f32 %v2473_v12, %v2475_v8 }
 0x213   : > { %2516 = vst.msk [vmem:[#allocation4 + $0x38] sm:$0xff] %vm2508_vm13, %v2499_v39 }
 0x21a   : > { %v2531_v0 = vld [vmem:[#allocation4 + $0x30] ss:$2 sm:$0xff]  ;;  %v2547_v63 = vld [vmem:[#allocation4 + $0x31] ss:$2 sm:$0xff] }
 0x21b   : > { %v2559_v43 = vmax.f32 %v2531_v0, %v2547_v63 }
 0x21d   : > { %2595 = vst.msk [vmem:[#allocation3 + $0x41] sm:$0xff] %vm2508_vm13, %v2559_v43 }
 0x224   : > { %v6278_v24 = vld [vmem:[#allocation3 + $0x42] sm:$0xff] }
 0x225   : > { %v6280_v10 = vld [vmem:[#allocation3 + $0x40] sm:$0xff]  ;;  %v4866_v47 = vpack.i.bf16 %v6278_v24, %v6257_v44 }
 0x226   : > { %v4871_v35 = vpack.i.bf16 %v6280_v10, %v6253_v20  ;;  %v6295_v9 = vld [vmem:[#allocation3 + $0x41] sm:$0xff] }
 0x227   : > { %4867 = vrot.lane.b32.xlu0 %v4866_v47, %s5084_s21 }
 0x228   : > { %4872 = vrot.lane.b32.xlu1 %v4871_v35, %s5086_s29  ;;  %v4107_v42 = vpop.f32.mrb[16].mxu0 }
 0x229   : > { %v2342_v49 = vadd.f32 %v4107_v42, %v6147_v21  ;;  %v2333_v51 = vpop.f32.mrb[17].mxu0 }
 0x22a   : > { %v2334_v25 = vadd.f32 %v6147_v21, %v2333_v51  ;;  %v4108_v52 = vpop.f32.mrb[18].mxu0 }
 0x22b   : > { %vm2414_vm1 = vcmp.ge.f32.partialorder %v2342_v49, 0.0  ;;  %v2446_v55 = vmul.f32 0.1, %v2342_v49  ;;  %v2345_v32 = vadd.f32 %v4108_v52, %v6147_v21  ;;  %v2336_v26 = vpop.f32.mrb[19].mxu0 }
 0x22c   : > { %vm2412_vm2 = vcmp.ge.f32.partialorder %v2334_v25, 0.0  ;;  %v2444_v27 = vmul.f32 0.1, %v2334_v25  ;;  %v2337_v31 = vadd.f32 %v6147_v21, %v2336_v26 }
 0x22d   : > { %v2478_v59 = vsel %vm2414_vm1, %v2342_v49, %v2446_v55  ;;  %vm2415_vm3 = vcmp.ge.f32.partialorder %v2345_v32, 0.0  ;;  %v2447_v60 = vmul.f32 0.1, %v2345_v32 }
 0x22e   : > { %v2476_v58 = vsel %vm2412_vm2, %v2334_v25, %v2444_v27  ;;  %vm2413_vm4 = vcmp.ge.f32.partialorder %v2337_v31, 0.0  ;;  %v2445_v48 = vmul.f32 0.1, %v2337_v31 }
 0x22f   : > { %v2500_v61 = vmax.f32 %v2476_v58, %v2478_v59  ;;  %v2479_v40 = vsel %vm2415_vm3, %v2345_v32, %v2447_v60 }
 0x230   : > { %v2477_v2 = vsel %vm2413_vm4, %v2337_v31, %v2445_v48 }
 0x231   : > { %2517 = vst.msk [vmem:[#allocation4 + $0x40] sm:$0xff] %vm2508_vm13, %v2500_v61  ;;  %v2501_v34 = vmax.f32 %v2477_v2, %v2479_v40 }
 0x233   : > { %2518 = vst.msk [vmem:[#allocation4 + $0x48] sm:$0xff] %vm2508_vm13, %v2501_v34 }
 0x23a   : > { %v2533_v5 = vld [vmem:[#allocation4 + $0x40] ss:$2 sm:$0xff]  ;;  %v2549_v29 = vld [vmem:[#allocation4 + $0x41] ss:$2 sm:$0xff] }
 0x23b   : > { %v2560_v41 = vmax.f32 %v2533_v5, %v2549_v29 }
 0x23c   : > { %v4828_v48 = vpop.permute.xlu1 %4827 }
 0x23d   : > { %2596 = vst.msk [vmem:[#allocation3 + $0x51] sm:$0xff] %vm2508_vm13, %v2560_v41 }
 0x244   : > { %v6297_v14 = vld [vmem:[#allocation3 + $0x50] sm:$0xff] }
 0x245   : > { %v6299_v18 = vld [vmem:[#allocation3 + $0x51] sm:$0xff]  ;;  %v4876_v17 = vpack.i.bf16 %v6297_v14, %v6280_v10 }
 0x246   : > { %v6301_v56 = vld [vmem:[#allocation3 + $0x52] sm:$0xff]  ;;  %v4886_v54 = vpack.i.bf16 %v6299_v18, %v6295_v9 }
 0x247   : > { %v2920_v53 = vpack.c.bf16 %v6301_v56, %v6278_v24  ;;  %4877 = vrot.lane.b32.xlu0 %v4876_v17, %s5085_s22  ;;  %v4891_v45 = vpack.i.bf16 %v6301_v56, %v6278_v24 }
 0x248   : > { %4887 = vrot.lane.b32.xlu1 %v4886_v54, %s5084_s21  ;;  %v4111_v57 = vpop.f32.mrb[20].mxu0 }
 0x249   : > { %v2358_v19 = vadd.f32 %v4111_v57, %v6147_v21  ;;  %v2349_v28 = vpop.f32.mrb[21].mxu0 }
 0x24a   : > { %v2350_v16 = vadd.f32 %v6147_v21, %v2349_v28  ;;  %v4112_v62 = vpop.f32.mrb[22].mxu0  ;;  %v4830_v28 = vunpack.i.h.bf16 %v4828_v48 }
 0x24b   : > { %vm2418_vm5 = vcmp.ge.f32.partialorder %v2358_v19, 0.0  ;;  %v2450_v6 = vmul.f32 0.1, %v2358_v19  ;;  %v2361_v4 = vadd.f32 %v4112_v62, %v6147_v21  ;;  %v2352_v15 = vpop.f32.mrb[23].mxu0  ;;  %4882 = vrot.lane.b32.xlu0 %v4886_v54, %s5086_s29  ;;  %v4833_v54 = vpop.permute.xlu1 %4832 }
 0x24c   : > { %4892 = vrot.lane.b32.xlu1 %v4891_v45, %s5085_s22  ;;  %vm2416_vm6 = vcmp.ge.f32.partialorder %v2350_v16, 0.0  ;;  %v2448_v33 = vmul.f32 0.1, %v2350_v16  ;;  %v2353_v46 = vadd.f32 %v6147_v21, %v2352_v15  ;;  %v4829_v45 = vunpack.i.l.bf16 %v4828_v48 }
 0x24d   : > { %v2482_v7 = vsel %vm2418_vm5, %v2358_v19, %v2450_v6  ;;  %vm2419_vm7 = vcmp.ge.f32.partialorder %v2361_v4, 0.0  ;;  %v2451_v36 = vmul.f32 0.1, %v2361_v4  ;;  %v4835_v62 = vunpack.i.h.bf16 %v4833_v54 }
 0x24e   : > { %v2480_v38 = vsel %vm2416_vm6, %v2350_v16, %v2448_v33  ;;  %vm2417_vm8 = vcmp.ge.f32.partialorder %v2353_v46, 0.0  ;;  %v2449_v11 = vmul.f32 0.1, %v2353_v46  ;;  %v2600_v16 = vld [vmem:[#allocation3] sm:$0xff]  ;;  %v4834_v6 = vunpack.i.l.bf16 %v4833_v54 }
 0x24f   : > { %v2502_v8 = vmax.f32 %v2480_v38, %v2482_v7  ;;  %v2483_v12 = vsel %vm2419_vm7, %v2361_v4, %v2451_v36 }
 0x250   : > { %v2481_v39 = vsel %vm2417_vm8, %v2353_v46, %v2449_v11 }
 0x251   : > { %2519 = vst.msk [vmem:[#allocation4 + $0x50] sm:$0xff] %vm2508_vm13, %v2502_v8  ;;  %v2503_v0 = vmax.f32 %v2481_v39, %v2483_v12  ;;  %v2865_v39 = vsel %vm2508_vm13, %v2600_v16, %v4829_v45 }
 0x253   : > { %2520 = vst.msk [vmem:[#allocation4 + $0x58] sm:$0xff] %vm2508_vm13, %v2503_v0  ;;  %v2866_v0 = vsel %vm2508_vm13, %v6193_v37, %v4830_v28 }
 0x259   : > { %v4838_v57 = vpop.permute.xlu0 %4837 }
 0x25a   : > { %v2535_v63 = vld [vmem:[#allocation4 + $0x50] ss:$2 sm:$0xff]  ;;  %v2551_v43 = vld [vmem:[#allocation4 + $0x51] ss:$2 sm:$0xff]  ;;  %v4843_v19 = vpop.permute.xlu1 %4842  ;;  %v4840_v15 = vunpack.i.h.bf16 %v4838_v57  ;;  %v4839_v33 = vunpack.i.l.bf16 %v4838_v57 }
 0x25b   : > { %v2561_v47 = vmax.f32 %v2535_v63, %v2551_v43  ;;  %v4845_v46 = vunpack.i.h.bf16 %v4843_v19  ;;  %v4844_v38 = vunpack.i.l.bf16 %v4843_v19  ;;  %v2874_v63 = vsel %vm2873_vm14, %v2865_v39, %v4834_v6 }
 0x25c   : > { %v2875_v43 = vsel %vm2873_vm14, %v2866_v0, %v4835_v62 }
 0x25d   : > { %2597 = vst.msk [vmem:[#allocation3 + $0x61] sm:$0xff] %vm2508_vm13, %v2561_v47 }
 0x264   : > { %v6322_v35 = vld [vmem:[#allocation3 + $0x62] sm:$0xff] }
 0x265   : > { %v6324_v42 = vld [vmem:[#allocation3 + $0x60] sm:$0xff]  ;;  %v4896_v49 = vpack.i.bf16 %v6322_v35, %v6301_v56 }
 0x266   : > { %v4901_v51 = vpack.i.bf16 %v6324_v42, %v6297_v14 }
 0x267   : > { %4897 = vrot.lane.b32.xlu0 %v4896_v49, %s5084_s21 }
 0x268   : > { %4902 = vrot.lane.b32.xlu1 %v4901_v51, %s5086_s29  ;;  %v4115_v25 = vpop.f32.mrb[24].mxu0 }
 0x269   : > { %v2374_v52 = vadd.f32 %v4115_v25, %v6147_v21  ;;  %v2365_v55 = vpop.f32.mrb[25].mxu0  ;;  %v2891_v25 = vsel %vm2508_vm13, %v6173_v3, %v4839_v33 }
 0x26a   : > { %v2366_v32 = vadd.f32 %v6147_v21, %v2365_v55  ;;  %v4116_v26 = vpop.f32.mrb[26].mxu0 }
 0x26b   : > { %vm2422_vm9 = vcmp.ge.f32.partialorder %v2374_v52, 0.0  ;;  %v2454_v27 = vmul.f32 0.1, %v2374_v52  ;;  %v2377_v31 = vadd.f32 %v4116_v26, %v6147_v21  ;;  %v2368_v59 = vpop.f32.mrb[27].mxu0  ;;  %v2884_v26 = vsel %vm2882_vm15, %v2875_v43, %v4845_v46 }
 0x26c   : > { %vm2420_vm10 = vcmp.ge.f32.partialorder %v2366_v32, 0.0  ;;  %v2452_v60 = vmul.f32 0.1, %v2366_v32  ;;  %v2369_v58 = vadd.f32 %v6147_v21, %v2368_v59 }
 0x26d   : > { %v2486_v61 = vsel %vm2422_vm9, %v2374_v52, %v2454_v27  ;;  %vm2423_vm11 = vcmp.ge.f32.partialorder %v2377_v31, 0.0  ;;  %v2455_v40 = vmul.f32 0.1, %v2377_v31  ;;  %v2892_v52 = vsel %vm2508_vm13, %v6251_v13, %v4840_v15 }
 0x26e   : > { %v2484_v2 = vsel %vm2420_vm10, %v2366_v32, %v2452_v60  ;;  %vm2421_vm12 = vcmp.ge.f32.partialorder %v2369_v58, 0.0  ;;  %v2453_v34 = vmul.f32 0.1, %v2369_v58  ;;  %v2883_v32 = vsel %vm2882_vm15, %v2874_v63, %v4844_v38 }
 0x26f   : > { %v2504_v5 = vmax.f32 %v2484_v2, %v2486_v61  ;;  %v2487_v29 = vsel %vm2423_vm11, %v2377_v31, %v2455_v40  ;;  %v2915_v60 = vpack.c.bf16 %v2884_v26, %v2883_v32  ;;  %v4994_v2 = vld [vmem:[%s6645_s4 + $0x80] sm:$0xff]  }
 0x270   : > { %v2485_v41 = vsel %vm2421_vm12, %v2369_v58, %v2453_v34  ;;  %v6354_v58 = vld [vmem:[#allocation3 + $0x61] sm:$0xff]  ;;  %4121 = vmatprep.subr.bf16.mxu1 %v4994_v2 }
 0x271   : > { %2521 = vst.msk [vmem:[#allocation4 + $0x60] sm:$0xff] %vm2508_vm13, %v2504_v5  ;;  %v2505_v17 = vmax.f32 %v2485_v41, %v2487_v29 }
 0x273   : > { %2522 = vst.msk [vmem:[#allocation4 + $0x68] sm:$0xff] %vm2508_vm13, %v2505_v17 }
 0x279   : > { %v4848_v4 = vpop.permute.xlu0 %4847 }
 0x27a   : > { %v2537_v7 = vld [vmem:[#allocation4 + $0x60] ss:$2 sm:$0xff]  ;;  %v2553_v36 = vld [vmem:[#allocation4 + $0x61] ss:$2 sm:$0xff]  ;;  %v4850_v8 = vunpack.i.h.bf16 %v4848_v4  ;;  %v4849_v12 = vunpack.i.l.bf16 %v4848_v4 }
 0x27b   : > { %v2562_v11 = vmax.f32 %v2537_v7, %v2553_v36 }
 0x27c   : > { %v2899_v55 = vsel %vm2873_vm14, %v2891_v25, %v4849_v12  ;;  %v2900_v37 = vsel %vm2873_vm14, %v2892_v52, %v4850_v8  ;;  %v4995_v12 = vld [vmem:[%s6645_s4 + $0x88] sm:$0xff]  }
 0x27d   : > { %2598 = vst.msk [vmem:[#allocation3 + $0x71] sm:$0xff] %vm2508_vm13, %v2562_v11  ;;  %v4853_v47 = vpop.permute.xlu0 %4852  ;;  %v2664_v25 = vld [vmem:[#allocation3 + $0x91] sm:$0xff] }
 0x27e   : > { %v4855_v49 = vunpack.i.h.bf16 %v4853_v47  ;;  %v4854_v51 = vunpack.i.l.bf16 %v4853_v47  ;;  %v2656_v47 = vld [vmem:[#allocation3 + $0x90] sm:$0xff] }
 0x280   : > { %v2907_v27 = vsel %vm2882_vm15, %v2899_v55, %v4854_v51  ;;  %v2908_v31 = vsel %vm2882_vm15, %v2900_v37, %v4855_v49  ;;  %v4858_v55 = vpop.permute.xlu1 %4857 }
 0x281   : > { %v2916_v59 = vpack.c.bf16 %v2908_v31, %v2907_v27  ;;  %v4860_v26 = vunpack.i.h.bf16 %v4858_v55  ;;  %v4859_v27 = vunpack.i.l.bf16 %v4858_v55 }
 0x283   : > { %3122 = vmatprep.mubr.bf16.mxu1 %v2916_v59 }
 0x284   : > { %3123 = vmatmul.mubr.bf16.vlgmr.msra.gmra.mrb[0].mxu1 %v2915_v60  ;;  %v6356_v3 = vld [vmem:[#allocation3 + $0x70] sm:$0xff]  ;;  %v4863_v37 = vpop.permute.xlu1 %4862 }
 0x285   : > { %v6358_v13 = vld [vmem:[#allocation3 + $0x71] sm:$0xff]  ;;  %v4906_v61 = vpack.i.bf16 %v6356_v3, %v6324_v42  ;;  %4122 = vmatpush3.bf16.msra.mxu1 %v4994_v2  ;;  %v4865_v59 = vunpack.i.h.bf16 %v4863_v37  ;;  %v4864_v60 = vunpack.i.l.bf16 %v4863_v37 }
 0x286   : > { %v6360_v48 = vld [vmem:[#allocation3 + $0x72] sm:$0xff]  ;;  %v4916_v40 = vpack.i.bf16 %v6358_v13, %v6354_v58  ;;  %4123 = vmatprep.subr.bf16.mxu1 %v4995_v12 }
 0x287   : > { %v2923_v34 = vpack.c.bf16 %v6360_v48, %v6322_v35  ;;  %v4119_v5 = vpop.f32.mrb[28].mxu0  ;;  %4907 = vrot.lane.b32.xlu0 %v4906_v61, %s5085_s22  ;;  %v4921_v57 = vpack.i.bf16 %v6360_v48, %v6322_v35 }
 0x288   : > { %4917 = vrot.lane.b32.xlu1 %v4916_v40, %s5084_s21  ;;  %v2390_v29 = vadd.f32 %v4119_v5, %v6147_v21  ;;  %v2381_v41 = vpop.f32.mrb[29].mxu0 }
 0x289   : > { %v2382_v17 = vadd.f32 %v6147_v21, %v2381_v41  ;;  %v4120_v54 = vpop.f32.mrb[30].mxu0  ;;  %4124 = vmatpush3.bf16.msra.mxu1 %v4995_v12 }
 0x28a   : > { %vm2426_vm0 = vcmp.ge.f32.partialorder %v2390_v29, 0.0  ;;  %v2458_v19 = vmul.f32 0.1, %v2390_v29  ;;  %v2393_v28 = vadd.f32 %v4120_v54, %v6147_v21  ;;  %v2384_v45 = vpop.f32.mrb[31].mxu0  ;;  %v2868_v54 = vsel %vm2508_vm13, %v6253_v20, %v4860_v26 }
 0x28b   : > { %vm2424_vm1 = vcmp.ge.f32.partialorder %v2382_v17, 0.0  ;;  %v2456_v16 = vmul.f32 0.1, %v2382_v17  ;;  %v2385_v62 = vadd.f32 %v6147_v21, %v2384_v45  ;;  %4912 = vrot.lane.b32.xlu0 %v4916_v40, %s5086_s29 }
 0x28c   : > { %4922 = vrot.lane.b32.xlu1 %v4921_v57, %s5085_s22  ;;  %v2490_v6 = vsel %vm2426_vm0, %v2390_v29, %v2458_v19  ;;  %vm2427_vm2 = vcmp.ge.f32.partialorder %v2393_v28, 0.0  ;;  %v2459_v4 = vmul.f32 0.1, %v2393_v28  ;;  %v2867_v57 = vsel %vm2508_vm13, %v6195_v23, %v4859_v27 }
 0x28d   : > { %v2488_v15 = vsel %vm2424_vm1, %v2382_v17, %v2456_v16  ;;  %vm2425_vm3 = vcmp.ge.f32.partialorder %v2385_v62, 0.0  ;;  %v2457_v33 = vmul.f32 0.1, %v2385_v62  ;;  %v2876_v19 = vsel %vm2873_vm14, %v2867_v57, %v4864_v60 }
 0x28e   : > { %v2506_v46 = vmax.f32 %v2488_v15, %v2490_v6  ;;  %v2491_v7 = vsel %vm2427_vm2, %v2393_v28, %v2459_v4  ;;  %v2877_v28 = vsel %vm2873_vm14, %v2868_v54, %v4865_v59  ;;  %vm3812_vm0 = vcmask 0  }
 0x28f   : > { %v2489_v36 = vsel %vm2425_vm3, %v2385_v62, %v2457_v33 }
 0x290   : > { %2523 = vst.msk [vmem:[#allocation4 + $0x70] sm:$0xff] %vm2508_vm13, %v2506_v46  ;;  %v2507_v38 = vmax.f32 %v2489_v36, %v2491_v7 }
 0x292   : > { %2524 = vst.msk [vmem:[#allocation4 + $0x78] sm:$0xff] %vm2508_vm13, %v2507_v38 }
 0x299   : > { %v2539_v11 = vld [vmem:[#allocation4 + $0x70] ss:$2 sm:$0xff]  ;;  %v2555_v21 = vld [vmem:[#allocation4 + $0x71] ss:$2 sm:$0xff]  ;;  %v4868_v32 = vpop.permute.xlu0 %4867 }
 0x29a   : > { %v2563_v8 = vmax.f32 %v2539_v11, %v2555_v21  ;;  %v4873_v31 = vpop.permute.xlu1 %4872  ;;  %v4870_v40 = vunpack.i.h.bf16 %v4868_v32  ;;  %v4869_v2 = vunpack.i.l.bf16 %v4868_v32 }
 0x29b   : > { %v4875_v5 = vunpack.i.h.bf16 %v4873_v31  ;;  %v4874_v29 = vunpack.i.l.bf16 %v4873_v31 }
 0x29c   : > { %2599 = vst.msk [vmem:[#allocation3 + $0x81] sm:$0xff] %vm2508_vm13, %v2563_v8  ;;  %v2894_v16 = vsel %vm2508_vm13, %v6295_v9, %v4870_v40  ;;  %v2893_v62 = vsel %vm2508_vm13, %v6255_v50, %v4869_v2 }
 0x29d   : > { %v2885_v33 = vsel %vm2882_vm15, %v2876_v19, %v4874_v29  ;;  %v2886_v23 = vsel %vm2882_vm15, %v2877_v28, %v4875_v5 }
 0x29e   : > { %v2918_v38 = vpack.c.bf16 %v2886_v23, %v2885_v33 }
 0x2a3   : > { %v6387_v39 = vld [vmem:[#allocation3 + $0x82] sm:$0xff] }
 0x2a4   : > { %v2631_v0 = vld [vmem:[#allocation3 + $0x80] sm:$0xff]  ;;  %v4926_v63 = vpack.i.bf16 %v6387_v39, %v6360_v48 }
 0x2a5   : > { %v4941_v43 = vpack.i.bf16 %v2631_v0, %v6356_v3  ;;  %v4931_v49 = vpack.i.bf16 %v2656_v47, %v2631_v0  ;;  %v6394_v51 = vld [vmem:[#allocation3 + $0x81] sm:$0xff] }
 0x2a6   : > { %4927 = vrot.lane.b32.xlu0 %v4926_v63, %s5084_s21  ;;  %v4936_v52 = vpack.i.bf16 %v2664_v25, %v6394_v51 }
 0x2a7   : > { %4942 = vrot.lane.b32.xlu1 %v4941_v43, %s5086_s29 }
 0x2aa   : > { %4932 = vrot.lane.b32.xlu0 %v4931_v49, %s5085_s22 }
 0x2ae   : > { %4937 = vrot.lane.b32.xlu0 %v4936_v52, %s5086_s29 }
 0x2b9   : > { %v4878_v61 = vpop.permute.xlu0 %4877 }
 0x2ba   : > { %v4880_v41 = vunpack.i.h.bf16 %v4878_v61  ;;  %v4879_v17 = vunpack.i.l.bf16 %v4878_v61  ;;  %v4888_v9 = vpop.permute.xlu1 %4887 }
 0x2bb   : > { %v4890_v21 = vunpack.i.h.bf16 %v4888_v9  ;;  %v4889_v8 = vunpack.i.l.bf16 %v4888_v9 }
 0x2bc   : > { %v2901_v15 = vsel %vm2873_vm14, %v2893_v62, %v4879_v17  ;;  %v2902_v20 = vsel %vm2873_vm14, %v2894_v16, %v4880_v41 }
 0x2bd   : > { %v4883_v45 = vpop.permute.xlu0 %4882  ;;  %v2870_v32 = vsel %vm2508_vm13, %v6297_v14, %v4890_v21  ;;  %v2869_v26 = vsel %vm2508_vm13, %v6280_v10, %v4889_v8 }
 0x2be   : > { %v4885_v6 = vunpack.i.h.bf16 %v4883_v45  ;;  %v4884_v4 = vunpack.i.l.bf16 %v4883_v45  ;;  %v4893_v50 = vpop.permute.xlu1 %4892 }
 0x2bf   : > { %v4895_v0 = vunpack.i.h.bf16 %v4893_v50  ;;  %v4894_v63 = vunpack.i.l.bf16 %v4893_v50 }
 0x2c0   : > { %v2909_v46 = vsel %vm2882_vm15, %v2901_v15, %v4884_v4  ;;  %v2910_v7 = vsel %vm2882_vm15, %v2902_v20, %v4885_v6 }
 0x2c1   : > { %v2919_v36 = vpack.c.bf16 %v2910_v7, %v2909_v46  ;;  %v2878_v27 = vsel %vm2873_vm14, %v2869_v26, %v4894_v63  ;;  %v2879_v31 = vsel %vm2873_vm14, %v2870_v32, %v4895_v0 }
 0x2c3   : > { %3130 = vmatprep.mubr.bf16.mxu1 %v2919_v36 }
 0x2c4   : > { %3131 = vmatmul.mubr.bf16.gmra.mrb[4].mxu1 %v2918_v38 }
 0x2d9   : > { %v4898_v11 = vpop.permute.xlu0 %4897 }
 0x2da   : > { %v4903_v12 = vpop.permute.xlu1 %4902  ;;  %v4900_v47 = vunpack.i.h.bf16 %v4898_v11  ;;  %v4899_v49 = vunpack.i.l.bf16 %v4898_v11 }
 0x2db   : > { %v4905_v25 = vunpack.i.h.bf16 %v4903_v12  ;;  %v4904_v52 = vunpack.i.l.bf16 %v4903_v12 }
 0x2dc   : > { %v2896_v60 = vsel %vm2508_vm13, %v6354_v58, %v4900_v47  ;;  %v2895_v61 = vsel %vm2508_vm13, %v6299_v18, %v4899_v49 }
 0x2dd   : > { %v2887_v29 = vsel %vm2882_vm15, %v2878_v27, %v4904_v52  ;;  %v2888_v10 = vsel %vm2882_vm15, %v2879_v31, %v4905_v25  ;;  %v4998_v27 = vld [vmem:[%s6647_s6 + $0x48] sm:$0xff]  }
 0x2de   : > { %v2921_v57 = vpack.c.bf16 %v2888_v10, %v2887_v29  ;;  %v4999_v31 = vld [vmem:[%s6647_s6 + $0x8] sm:$0xff]   ;;  %v5002_v29 = vld [vmem:[%s6647_s6 + $0x58] sm:$0xff]   ;;  %v5013_v10 = vld [vmem:[%s6647_s6 + $0x90] sm:$0xff]  }
 0x2f9   : > { %v4908_v43 = vpop.permute.xlu0 %4907 }
 0x2fa   : > { %v4910_v55 = vunpack.i.h.bf16 %v4908_v43  ;;  %v4909_v37 = vunpack.i.l.bf16 %v4908_v43  ;;  %v4918_v58 = vpop.permute.xlu1 %4917 }
 0x2fb   : > { %v4920_v28 = vunpack.i.h.bf16 %v4918_v58  ;;  %v4919_v45 = vunpack.i.l.bf16 %v4918_v58  ;;  %v5005_v58 = vld [vmem:[%s6647_s6 + $0x20] sm:$0xff]  }
 0x2fc   : > { %v2903_v5 = vsel %vm2873_vm14, %v2895_v61, %v4909_v37  ;;  %v2904_v14 = vsel %vm2873_vm14, %v2896_v60, %v4910_v55  ;;  %v5007_v60 = vld [vmem:[%s6647_s6 + $0x80] sm:$0xff]   ;;  %v5000_v61 = vld [vmem:[%s6647_s6 + $0x50] sm:$0xff]  }
 0x2fd   : > { %v4913_v59 = vpop.permute.xlu0 %4912  ;;  %v2872_v36 = vsel %vm2508_vm13, %v6356_v3, %v4920_v28  ;;  %v2871_v38 = vsel %vm2508_vm13, %v6324_v42, %v4919_v45  ;;  %v5015_v28 = vld [vmem:[%s6647_s6 + $0x70] sm:$0xff]  }
 0x2fe   : > { %v4915_v40 = vunpack.i.h.bf16 %v4913_v59  ;;  %v4914_v2 = vunpack.i.l.bf16 %v4913_v59  ;;  %v4923_v18 = vpop.permute.xlu1 %4922  ;;  %v5006_v59 = vld [vmem:[%s6647_s6 + $0xc0] sm:$0xff]  }
 0x2ff   : > { %v4925_v62 = vunpack.i.h.bf16 %v4923_v18  ;;  %v4924_v6 = vunpack.i.l.bf16 %v4923_v18  ;;  %4054 = vmatprep.subr.bf16.mxu1 %v5006_v59  ;;  %v5009_v18 = vld [vmem:[%s6647_s6 + $0x68] sm:$0xff]  }
 0x300   : > { %v2911_v41 = vsel %vm2882_vm15, %v2903_v5, %v4914_v2  ;;  %v2912_v17 = vsel %vm2882_vm15, %v2904_v14, %v4915_v40  ;;  %v5008_v40 = vld [vmem:[%s6647_s6 + $0xc8] sm:$0xff]   ;;  %v5001_v5 = vld [vmem:[%s6647_s6 + $0x10] sm:$0xff]  }
 0x301   : > { %v2922_v54 = vpack.c.bf16 %v2912_v17, %v2911_v41  ;;  %v2880_v9 = vsel %vm2873_vm14, %v2871_v38, %v4924_v6  ;;  %v2881_v50 = vsel %vm2873_vm14, %v2872_v36, %v4925_v62  ;;  %v5010_v2 = vld [vmem:[%s6647_s6 + $0x88] sm:$0xff]   ;;  %v5012_v14 = vld [vmem:[%s6647_s6 + $0xd0] sm:$0xff]   ;;  %v5003_v41 = vld [vmem:[%s6647_s6 + $0x18] sm:$0xff]  }
 0x302   : > { %v5014_v17 = vld [vmem:[%s6647_s6 + $0xd8] sm:$0xff]   ;;  %v3901_v38 = vld [vmem:[%s6646_s5] ss:$0 sm:$0xff] }
 0x303   : > { %3138 = vmatprep.mubr.bf16.mxu1 %v2922_v54  ;;  %v5004_v54 = vld [vmem:[%s6647_s6 + $0x60] sm:$0xff]  }
 0x304   : > { %3139 = vmatmul.mubr.bf16.gmra.mrb[8].mxu1 %v2921_v57  ;;  %v5016_v57 = vld [vmem:[%s6647_s6 + $0x98] sm:$0xff]  }
 0x318   : > { %v4928_v19 = vpop.permute.xlu0 %4927 }
 0x319   : > { %v4943_v16 = vpop.permute.xlu1 %4942  ;;  %v4930_v15 = vunpack.i.h.bf16 %v4928_v19  ;;  %v4929_v20 = vunpack.i.l.bf16 %v4928_v19  ;;  %v5011_v19 = vld [vmem:[%s6647_s6 + $0x28] sm:$0xff]  }
 0x31a   : > { %v4945_v33 = vunpack.i.h.bf16 %v4943_v16  ;;  %v4944_v23 = vunpack.i.l.bf16 %v4943_v16 }
 0x31b   : > { %v2898_v21 = vsel %vm2508_vm13, %v6394_v51, %v4930_v15  ;;  %v2897_v8 = vsel %vm2508_vm13, %v6358_v13, %v4929_v20  ;;  %v2672_v13 = vld [vmem:[#allocation3 + $0x92] sm:$0xff] }
 0x31c   : > { %v4933_v4 = vpop.permute.xlu0 %4932  ;;  %v2889_v43 = vsel %vm2882_vm15, %v2880_v9, %v4944_v23  ;;  %v2890_v42 = vsel %vm2882_vm15, %v2881_v50, %v4945_v33  ;;  %v2926_v51 = vpack.c.bf16 %v2672_v13, %v6387_v39  ;;  %v4997_v39 = vld [vmem:[%s6647_s6] sm:$0xff]  }
 0x31d   : > { %v4935_v46 = vunpack.i.h.bf16 %v4933_v4  ;;  %v4934_v7 = vunpack.i.l.bf16 %v4933_v4  ;;  %v2924_v52 = vpack.c.bf16 %v2890_v42, %v2889_v43 }
 0x31f   : > { %v2905_v63 = vsel %vm2873_vm14, %v2897_v8, %v4934_v7  ;;  %v2906_v3 = vsel %vm2873_vm14, %v2898_v21, %v4935_v46 }
 0x320   : > { %v4938_v11 = vpop.permute.xlu0 %4937 }
 0x321   : > { %v4940_v12 = vunpack.i.h.bf16 %v4938_v11  ;;  %v4939_v0 = vunpack.i.l.bf16 %v4938_v11 }
 0x323   : > { %v2913_v47 = vsel %vm2882_vm15, %v2905_v63, %v4939_v0  ;;  %v2914_v49 = vsel %vm2882_vm15, %v2906_v3, %v4940_v12 }
 0x324   : > { %v2925_v25 = vpack.c.bf16 %v2914_v49, %v2913_v47 }
 0x326   : > { %3146 = vmatprep.mubr.bf16.mxu1 %v2925_v25 }
 0x327   : > { %3147 = vmatmul.mubr.bf16.gmra.mrb[12].mxu1 %v2924_v52 }
 0x328   : > { %4125 = vmatprep.mubr.msk.bf16.mxu1 %vm2508_vm13, %v2917_v22 }
 0x32f   : > { %4126 = vmatmul.mubr.msk.bf16.vlgmr.msra.gmra.mrb[16].mxu1 %vm2508_vm13, %v2920_v53 }
 0x330   : > { %4129 = vmatprep.mubr.msk.bf16.mxu1 %vm2508_vm13, %v2923_v34  ;;  %v4996_v34 = vld [vmem:[%s6647_s6 + $0x40] sm:$0xff]   ;;  %4055 = vmatpush3.bf16.msra.mxu1 %v5007_v60 }
 0x331   : > { %4032 = vmatprep.subr.bf16.mxu0 %v4996_v34  ;;  %4056 = vmatprep.subr.bf16.mxu1 %v5008_v40 }
 0x332   : > { %4033 = vmatpush3.bf16.msra.mxu0 %v4997_v39 }
 0x333   : > { %4034 = vmatprep.subr.bf16.mxu0 %v4998_v27 }
 0x334   : > { %4057 = vmatpush3.bf16.msra.mxu1 %v5010_v2  ;;  %v5018_v2 = vld [vmem:[%s6647_s6 + $0xe0] sm:$0xff]  }
 0x335   : > { %4058 = vmatprep.subr.bf16.mxu1 %v5012_v14  ;;  %v5017_v14 = vld [vmem:[%s6647_s6 + $0x30] sm:$0xff]  }
 0x336   : > { %4035 = vmatpush3.bf16.msra.mxu0 %v4999_v31 }
 0x337   : > { %4130 = vmatmul.mubr.msk.bf16.gmra.mrb[20].mxu1 %vm2508_vm13, %v2926_v51  ;;  %4036 = vmatprep.subr.bf16.mxu0 %v5000_v61 }
 0x338   : > { %4059 = vmatpush3.bf16.msra.mxu1 %v5013_v10 }
 0x339   : > { %4060 = vmatprep.subr.bf16.mxu1 %v5014_v17 }
 0x33a   : > { %4037 = vmatpush3.bf16.msra.mxu0 %v5001_v5 }
 0x33b   : > { %4038 = vmatprep.subr.bf16.mxu0 %v5002_v29  ;;  %v5019_v29 = vld [vmem:[%s6647_s6 + $0xa0] sm:$0xff]  }
 0x33c   : > { %4061 = vmatpush3.bf16.msra.mxu1 %v5016_v57 }
 0x33d   : > { %4062 = vmatprep.subr.bf16.mxu1 %v5018_v2 }
 0x33e   : > { %4039 = vmatpush3.bf16.msra.mxu0 %v5003_v41 }
 0x33f   : > { %4040 = vmatprep.subr.bf16.mxu0 %v5004_v54 }
 0x340   : > { %4063 = vmatpush3.bf16.msra.mxu1 %v5019_v29 }
 0x342   : > { %4041 = vmatpush3.bf16.msra.mxu0 %v5005_v58 }
 0x343   : > { %4042 = vmatprep.subr.bf16.mxu0 %v5009_v18  ;;  %v5020_v18 = vld [vmem:[%s6647_s6 + $0x78] sm:$0xff]  }
 0x346   : > { %4043 = vmatpush3.bf16.msra.mxu0 %v5011_v19  ;;  %v5021_v19 = vld [vmem:[%s6647_s6 + $0xe8] sm:$0xff]  }
 0x347   : > { %4044 = vmatprep.subr.bf16.mxu0 %v5015_v28  ;;  %4064 = vmatprep.subr.bf16.mxu1 %v5021_v19 }
 0x34a   : > { %4045 = vmatpush3.bf16.msra.mxu0 %v5017_v14 }
 0x34b   : > { %4046 = vmatprep.subr.bf16.mxu0 %v5020_v18 }
 0x357   : > { %v4002_v55 = vpop.f32.mrb[0].mxu1 }
 0x358   : > { %v4003_v37 = vpop.f32.mrb[1].mxu1 }
 0x359   : > { %v6461_v30 = vadd.f32 %v4003_v37, %v4002_v55  ;;  %v4005_v44 = vpop.f32.mrb[2].mxu1 }
 0x35a   : > { %v4006_v22 = vpop.f32.mrb[3].mxu1 }
 0x35b   : > { %v6463_v32 = vadd.f32 %v4006_v22, %v4005_v44  ;;  %v3125_v11 = vadd.f32 %v6461_v30, %v3901_v38 }
 0x35d   : > { %v3128_v3 = vadd.f32 %v6463_v32, %v3901_v38 }
 0x397   : > { %v4008_v24 = vpop.f32.mrb[4].mxu1 }
 0x398   : > { %v4009_v56 = vpop.f32.mrb[5].mxu1 }
 0x399   : > { %v4010_v53 = vadd.f32 %v4009_v56, %v4008_v24  ;;  %v4011_v26 = vpop.f32.mrb[6].mxu1 }
 0x39a   : > { %v4012_v35 = vpop.f32.mrb[7].mxu1 }
 0x39b   : > { %v4013_v48 = vadd.f32 %v4012_v35, %v4011_v26  ;;  %v3133_v9 = vadd.f32 %v4010_v53, %v3901_v38 }
 0x39d   : > { %v3136_v12 = vadd.f32 %v4013_v48, %v3901_v38 }
 0x3d7   : > { %v4014_v45 = vpop.f32.mrb[8].mxu1 }
 0x3d8   : > { %v4015_v16 = vpop.f32.mrb[9].mxu1 }
 0x3d9   : > { %v4016_v62 = vadd.f32 %v4015_v16, %v4014_v45  ;;  %v4017_v6 = vpop.f32.mrb[10].mxu1  ;;  %v5022_v16 = vld [vmem:[%s6647_s6 + $0x38] sm:$0xff]  }
 0x3da   : > { %v4018_v4 = vpop.f32.mrb[11].mxu1  ;;  %4047 = vmatpush3.bf16.msra.mxu0 %v5022_v16 }
 0x3db   : > { %v4019_v15 = vadd.f32 %v4018_v4, %v4017_v6  ;;  %v3141_v56 = vadd.f32 %v4016_v62, %v3901_v38  ;;  %v5023_v6 = vld [vmem:[%s6647_s6 + $0xa8] sm:$0xff]   ;;  %4133 = vmatprep.subr.bf16.mxu0 %v5074_v1 }
 0x3dc   : > { %4065 = vmatpush3.bf16.msra.mxu1 %v5023_v6 }
 0x3dd   : > { %v3144_v39 = vadd.f32 %v4019_v15, %v3901_v38 }
 0x3fa   : > { %v4020_v20 = vpop.f32.mrb[12].mxu1 }
 0x3fb   : > { %v4021_v33 = vpop.f32.mrb[13].mxu1 }
 0x3fc   : > { %v4022_v23 = vadd.f32 %v4021_v33, %v4020_v20  ;;  %v4023_v46 = vpop.f32.mrb[14].mxu1 }
 0x3fd   : > { %v4024_v7 = vpop.f32.mrb[15].mxu1 }
 0x3fe   : > { %v4025_v36 = vadd.f32 %v4024_v7, %v4023_v46  ;;  %v3149_v37 = vadd.f32 %v4022_v23, %v3901_v38  ;;  %v5024_v23 = vld [vmem:[%s6647_s6 + $0xf0] sm:$0xff]  }
 0x3ff   : > { %v5025_v46 = vld [vmem:[%s6647_s6 + $0xb0] sm:$0xff]   ;;  %4066 = vmatprep.subr.bf16.mxu1 %v5024_v23 }
 0x400   : > { %v3152_v35 = vadd.f32 %v4025_v36, %v3901_v38  ;;  %4067 = vmatpush3.bf16.msra.mxu1 %v5025_v46  ;;  %v5034_v23 = vld [vmem:[%s6650_s9 + $0x30] sm:$0xff]   ;;  %v5035_v46 = vld [vmem:[%s6650_s9 + $0x38] sm:$0xff]  }
 0x402   : > { %v4127_v50 = vpop.f32.mrb[16].mxu1 }
 0x403   : > { %v3198_v21 = vadd.f32 %v4127_v50, %v3133_v9  ;;  %v3189_v8 = vpop.f32.mrb[17].mxu1  ;;  %v5026_v50 = vld [vmem:[%s6647_s6 + $0xf8] sm:$0xff]  }
 0x404   : > { %v3190_v0 = vadd.f32 %v3189_v8, %v3125_v11  ;;  %v4128_v63 = vpop.f32.mrb[18].mxu1  ;;  %v5027_v8 = vld [vmem:[%s6647_s6 + $0xb8] sm:$0xff]   ;;  %4068 = vmatprep.subr.bf16.mxu1 %v5026_v50 }
 0x405   : > { %v3230_v43 = vmul.f32 0.1, %v3198_v21  ;;  %v3201_v42 = vadd.f32 %v4128_v63, %v3136_v12  ;;  %v3192_v47 = vpop.f32.mrb[19].mxu1  ;;  %vm3222_vm4 = vcmp.ge.f32.partialorder %v3198_v21, 0.0  ;;  %4069 = vmatpush3.bf16.msra.mxu1 %v5027_v8 }
 0x406   : > { %v3228_v49 = vmul.f32 0.1, %v3190_v0  ;;  %v3193_v25 = vadd.f32 %v3192_v47, %v3128_v3  ;;  %vm3220_vm5 = vcmp.ge.f32.partialorder %v3190_v0, 0.0 }
 0x407   : > { %vm3223_vm6 = vcmp.ge.f32.partialorder %v3201_v42, 0.0  ;;  %v3231_v52 = vmul.f32 0.1, %v3201_v42  ;;  %v3238_v51 = vsel %vm3222_vm4, %v3198_v21, %v3230_v43 }
 0x408   : > { %vm3221_vm7 = vcmp.ge.f32.partialorder %v3193_v25, 0.0  ;;  %v3229_v13 = vmul.f32 0.1, %v3193_v25  ;;  %v3236_v30 = vsel %vm3220_vm5, %v3190_v0, %v3228_v49 }
 0x409   : > { %v3239_v55 = vsel %vm3223_vm6, %v3201_v42, %v3231_v52 }
 0x40a   : > { %v3245_v44 = vmax.f32 %v3238_v51, %v3239_v55  ;;  %v3237_v22 = vsel %vm3221_vm7, %v3193_v25, %v3229_v13  ;;  %v4131_v24 = vpop.f32.mrb[20].mxu1 }
 0x40b   : > { %v3244_v32 = vmax.f32 %v3236_v30, %v3237_v22  ;;  %v3214_v53 = vadd.f32 %v4131_v24, %v3149_v37  ;;  %v3205_v26 = vpop.f32.mrb[21].mxu1 }
 0x40c   : > { %3249 = vst.msk [vmem:[#allocation5 + $0x8] sm:$0xff] %vm2508_vm13, %v3245_v44  ;;  %v3206_v48 = vadd.f32 %v3205_v26, %v3141_v56  ;;  %v4132_v34 = vpop.f32.mrb[22].mxu1 }
 0x40d   : > { %3248 = vst.msk [vmem:[#allocation5] sm:$0xff] %vm2508_vm13, %v3244_v32  ;;  %v3234_v27 = vmul.f32 0.1, %v3214_v53  ;;  %v3217_v31 = vadd.f32 %v4132_v34, %v3152_v35  ;;  %v3208_v59 = vpop.f32.mrb[23].mxu1  ;;  %vm3226_vm8 = vcmp.ge.f32.partialorder %v3214_v53, 0.0 }
 0x40e   : > { %v3232_v60 = vmul.f32 0.1, %v3206_v48  ;;  %v3209_v61 = vadd.f32 %v3208_v59, %v3144_v39  ;;  %vm3224_vm9 = vcmp.ge.f32.partialorder %v3206_v48, 0.0 }
 0x40f   : > { %vm3227_vm10 = vcmp.ge.f32.partialorder %v3217_v31, 0.0  ;;  %v3235_v40 = vmul.f32 0.1, %v3217_v31  ;;  %v3242_v10 = vsel %vm3226_vm8, %v3214_v53, %v3234_v27 }
 0x410   : > { %vm3225_vm11 = vcmp.ge.f32.partialorder %v3209_v61, 0.0  ;;  %v3233_v5 = vmul.f32 0.1, %v3209_v61  ;;  %v3240_v17 = vsel %vm3224_vm9, %v3206_v48, %v3232_v60 }
 0x411   : > { %v3243_v41 = vsel %vm3227_vm10, %v3217_v31, %v3235_v40  ;;  %v5028_v40 = vld [vmem:[%s6650_s9] sm:$0xff]  }
 0x412   : > { %v3247_v54 = vmax.f32 %v3242_v10, %v3243_v41  ;;  %v3241_v57 = vsel %vm3225_vm11, %v3209_v61, %v3233_v5 }
 0x413   : > { %v3246_v58 = vmax.f32 %v3240_v17, %v3241_v57  ;;  %v5029_v57 = vld [vmem:[%s6650_s9 + $0x8] sm:$0xff]  }
 0x414   : > { %v3252_v28 = vld [vmem:[#allocation5] ss:$2 sm:$0xff]  ;;  %v3256_v45 = vld [vmem:[#allocation5 + $0x1] ss:$2 sm:$0xff]  ;;  %3251 = vst.msk [vmem:[#allocation5 + $0x18] sm:$0xff] %vm2508_vm13, %v3247_v54 }
 0x415   : > { %v3259_v62 = vmax.f32 %v3252_v28, %v3256_v45  ;;  %3250 = vst.msk [vmem:[#allocation5 + $0x10] sm:$0xff] %vm2508_vm13, %v3246_v58 }
 0x417   : > { %v3266_v4 = vrot.slane %v3259_v62, 2  ;;  %v3280_v15 = vrot.slane %v3259_v62, 6  ;;  %v3262_v20 = vrot.slane %v3259_v62, 1  ;;  %v3276_v33 = vrot.slane %v3259_v62, 5 }
 0x418   : > { %v3270_v38 = vrot.slane %v3259_v62, 3  ;;  %v3284_v9 = vrot.slane %v3259_v62, 7  ;;  %v3274_v37 = vrot.slane %v3259_v62, 4 }
 0x419   : > { %v4951_v7 = vpack.i.bf16 %v3266_v4, %v3280_v15  ;;  %v4946_v36 = vpack.i.bf16 %v3262_v20, %v3276_v33  ;;  %v5030_v4 = vld [vmem:[%s6650_s9 + $0x10] sm:$0xff]   ;;  %v5031_v15 = vld [vmem:[%s6650_s9 + $0x18] sm:$0xff]   ;;  %v5032_v20 = vld [vmem:[%s6650_s9 + $0x20] sm:$0xff]  }
 0x41a   : > { %v4956_v0 = vpack.i.bf16 %v3270_v38, %v3284_v9  ;;  %v5033_v33 = vld [vmem:[%s6650_s9 + $0x28] sm:$0xff]  }
 0x41b   : > { %4952 = vrot.lane.b32.xlu1 %v4951_v7, %s5085_s22  ;;  %4947 = vrot.lane.b32.xlu0 %v4946_v36, %s5084_s21  ;;  %v3678_v7 = vlaneseq  ;;  %v3395_v36 = vld [vmem:[%s6648_s7] sm:$0x1] }
 0x41c   : > { %v3254_v11 = vld [vmem:[#allocation5 + $0x10] ss:$2 sm:$0xff]  ;;  %v3258_v21 = vld [vmem:[#allocation5 + $0x11] ss:$2 sm:$0xff]  ;;  %v3396_v50 = vunpack.c.l.bf16 %v3395_v36 }
 0x41d   : > { %v3260_v12 = vmax.f32 %v3254_v11, %v3258_v21  ;;  %v3679_v8 = vshrl.u32 %v3678_v7, 7 }
 0x41f   : > { %4957 = vrot.lane.b32.xlu0 %v4956_v0, %s5086_s29  ;;  %v3289_v63 = vrot.slane %v3260_v12, 1  ;;  %v3303_v3 = vrot.slane %v3260_v12, 5  ;;  %v3293_v43 = vrot.slane %v3260_v12, 2  ;;  %v3307_v42 = vrot.slane %v3260_v12, 6 }
 0x420   : > { %v3297_v25 = vrot.slane %v3260_v12, 3  ;;  %v3311_v52 = vrot.slane %v3260_v12, 7  ;;  %v3301_v2 = vrot.slane %v3260_v12, 4 }
 0x421   : > { %v4961_v47 = vpack.i.bf16 %v3289_v63, %v3303_v3  ;;  %v4966_v49 = vpack.i.bf16 %v3293_v43, %v3307_v42  ;;  %v3680_v43 = vsub.s32 1, %v3679_v8 }
 0x422   : > { %v4971_v13 = vpack.i.bf16 %v3297_v25, %v3311_v52 }
 0x423   : > { %4962 = vrot.lane.b32.xlu1 %v4961_v47, %s5084_s21  ;;  %4967 = vrot.lane.b32.xlu0 %v4966_v49, %s5085_s22  ;;  %s3924_s22 = sshll.u32 %s5167_s28, 7 }
 0x424   : > { %s3398_s14 = sld [smem:[#allocation7 + %s3924_s22]] }
 0x427   : > { %4972 = vrot.lane.b32.xlu1 %v4971_v13, %s5086_s29  ;;  %s3673_s29 = sadd.s32 1, %s3924_s22 }
 0x428   : > { %s3674_s15 = sld [smem:[#allocation7 + %s3673_s29]] }
 0x42e   : > { %v3675_v63 = vstv %s3674_s15 }
 0x42f   : > { %v3676_v3 = vmul.f32 %v3675_v63, %v3396_v50 }
 0x431   : > { %v3681_v52 = vrot.slane %v3676_v3, %v3680_v43 }
 0x48d   : > { %v4953_v51 = vpop.permute.xlu1 %4952  ;;  %v4948_v55 = vpop.permute.xlu0 %4947 }
 0x48e   : > { %v4950_v30 = vunpack.i.h.bf16 %v4948_v55  ;;  %v4949_v44 = vunpack.i.l.bf16 %v4948_v55  ;;  %v4955_v22 = vunpack.i.h.bf16 %v4953_v51  ;;  %v4954_v24 = vunpack.i.l.bf16 %v4953_v51 }
 0x490   : > { %v3315_v56 = vsel %vm2508_vm13, %v3259_v62, %v4950_v30  ;;  %v3318_v32 = vsel %vm2508_vm13, %v3274_v37, %v4949_v44  ;;  %v3684_v37 = vld [vmem:[%s6649_s8] sm:$0x1] }
 0x491   : > { %v4958_v53 = vpop.permute.xlu0 %4957  ;;  %v3316_v48 = vsel %vm2873_vm14, %v3315_v56, %v4955_v22  ;;  %v3319_v34 = vsel %vm2873_vm14, %v3318_v32, %v4954_v24  ;;  %v3706_v32 = vld [vmem:[%s6651_s10] sm:$0x1] }
 0x492   : > { %v4960_v26 = vunpack.i.h.bf16 %v4958_v53  ;;  %v4959_v35 = vunpack.i.l.bf16 %v4958_v53 }
 0x494   : > { %v3317_v39 = vsel %vm2882_vm15, %v3316_v48, %v4960_v26  ;;  %v3320_v27 = vsel %vm2882_vm15, %v3319_v34, %v4959_v35 }
 0x495   : > { %v3327_v31 = vpack.c.bf16 %v3317_v39, %v3317_v39  ;;  %v4963_v59 = vpop.permute.xlu1 %4962  ;;  %v4968_v60 = vpop.permute.xlu0 %4967  ;;  %v3328_v61 = vpack.c.bf16 %v3320_v27, %v3320_v27  ;;  %v3798_v27 = vld [vmem:[%s6652_s11] sm:$0x1] }
 0x496   : > { %v4965_v5 = vunpack.i.h.bf16 %v4963_v59  ;;  %v4964_v14 = vunpack.i.l.bf16 %v4963_v59  ;;  %v4970_v29 = vunpack.i.h.bf16 %v4968_v60  ;;  %v4969_v10 = vunpack.i.l.bf16 %v4968_v60 }
 0x497   : > { %3625 = vmatprep.mubr.bf16.mxu0 %v3328_v61  ;;  %v3804_v61 = vld [vmem:[#allocation6] sm:$0x1] }
 0x498   : > { %v3321_v41 = vsel %vm2508_vm13, %v3260_v12, %v4965_v5  ;;  %v3324_v17 = vsel %vm2508_vm13, %v3301_v2, %v4964_v14  ;;  %3626 = vmatmul.mubr.bf16.vlgmr.msra.gmra.mrb[32].mxu0 %v3327_v31  ;;  %vm5087_vm13 = vmmov 0   ;;  %v3399_v12 = vstv %s3398_s14 }
 0x499   : > { %v4973_v54 = vpop.permute.xlu1 %4972  ;;  %4134 = vmatpush3.bf16.msra.mxu0 %v5028_v40  ;;  %v3322_v19 = vsel %vm2873_vm14, %v3321_v41, %v4970_v29  ;;  %v3325_v28 = vsel %vm2873_vm14, %v3324_v17, %v4969_v10  ;;  %4149 = vmatprep.mubr.msk.bf16.mxu0 %vm5087_vm13, %v5074_v1 }
 0x49a   : > { %v4975_v58 = vunpack.i.h.bf16 %v4973_v54  ;;  %v4974_v18 = vunpack.i.l.bf16 %v4973_v54  ;;  %4135 = vmatprep.subr.bf16.mxu0 %v5074_v1 }
 0x49c   : > { %v3323_v45 = vsel %vm2882_vm15, %v3322_v19, %v4975_v58  ;;  %v3326_v16 = vsel %vm2882_vm15, %v3325_v28, %v4974_v18  ;;  %vm3800_vm15 = vcmask 516096  }
 0x49d   : > { %v3329_v62 = vpack.c.bf16 %v3323_v45, %v3323_v45  ;;  %v3330_v6 = vpack.c.bf16 %v3326_v16, %v3326_v16  ;;  %4136 = vmatpush3.bf16.msra.mxu0 %v5029_v57 }
 0x49e   : > { %4137 = vmatprep.subr.bf16.mxu0 %v5074_v1 }
 0x49f   : > { %3665 = vmatprep.mubr.bf16.mxu1 %v3330_v6 }
 0x4a0   : > { %3666 = vmatmul.mubr.bf16.vlgmr.msra.gmra.mrb[24].mxu1 %v3329_v62 }
 0x4a1   : > { %4138 = vmatpush3.bf16.msra.mxu0 %v5030_v4 }
 0x4a2   : > { %4139 = vmatprep.subr.bf16.mxu0 %v5074_v1 }
 0x4a5   : > { %4140 = vmatpush3.bf16.msra.mxu0 %v5031_v15 }
 0x4a6   : > { %4141 = vmatprep.subr.bf16.mxu0 %v5074_v1 }
 0x4a9   : > { %4142 = vmatpush3.bf16.msra.mxu0 %v5032_v20 }
 0x4aa   : > { %4143 = vmatprep.subr.bf16.mxu0 %v5074_v1 }
 0x4ad   : > { %4144 = vmatpush3.bf16.msra.mxu0 %v5033_v33 }
 0x4ae   : > { %4145 = vmatprep.subr.bf16.mxu0 %v5074_v1 }
 0x4b1   : > { %4146 = vmatpush3.bf16.msra.mxu0 %v5034_v23 }
 0x4b2   : > { %4147 = vmatprep.subr.bf16.mxu0 %v5074_v1  ;;  %v3400_v1 = vmul.f32 %v3399_v12, %v3396_v50 }
 0x4b5   : > { %4148 = vmatpush3.bf16.msra.mxu0 %v5035_v46 }
 0x56b   : > { %v4048_v38 = vpop.f32.mrb[32].mxu0 }
 0x56c   : > { %v4049_v9 = vpop.f32.mrb[33].mxu0 }
 0x56d   : > { %v4050_v11 = vadd.f32 %v4049_v9, %v4048_v38  ;;  %v4051_v21 = vpop.f32.mrb[34].mxu0 }
 0x56e   : > { %v4052_v0 = vpop.f32.mrb[35].mxu0 }
 0x56f   : > { %v3628_v49 = vadd.f32 %v4050_v11, %v3400_v1 }
 0x573   : > { %v4070_v42 = vpop.f32.mrb[24].mxu1 }
 0x574   : > { %v4071_v47 = vpop.f32.mrb[25].mxu1 }
 0x575   : > { %v4072_v25 = vadd.f32 %v4071_v47, %v4070_v42  ;;  %v4073_v13 = vpop.f32.mrb[26].mxu1 }
 0x576   : > { %v4074_v51 = vpop.f32.mrb[27].mxu1 }
 0x577   : > { %v3668_v55 = vadd.f32 %v4072_v25, %v3628_v49 }
 0x579   : > { %v3683_v30 = vadd.f32 %v3681_v52, %v3668_v55 }
 0x57b   : > { %v3685_v44 = vadd.f32 %v3684_v37, %v3683_v30 }
 0x57d   : > { %v3687_v22 = vmul.f32 0.1, %v3685_v44  ;;  %vm3686_vm12 = vcmp.ge.f32.partialorder %v3685_v44, 0.0 }
 0x57f   : > { %v3688_v24 = vsel %vm3686_vm12, %v3685_v44, %v3687_v22 }
 0x580   : > { %v3689_v56 = vpack.c.bf16 %v3688_v24, %v3688_v24 }
 0x582   : > { %4150 = vmatmul.mubr.bf16.vlgmr.msra.gmra.mrb[36].mxu0 %v3689_v56 }
 0x655   : > { %v3789_v53 = vpop.f32.mrb[36].mxu0 }
 0x656   : > { %v3790_v26 = vadd.f32 %v3789_v53, %v3706_v32  ;;  %v4151_v35 = vpop.f32.mrb[37].mxu0 }
 0x657   : > { %v3792_v48 = vpop.f32.mrb[38].mxu0 }
 0x658   : > { %vm3795_vm14 = vcmp.ge.f32.partialorder %v3790_v26, 0.0  ;;  %v3796_v34 = vmul.f32 0.1, %v3790_v26  ;;  %v4152_v39 = vpop.f32.mrb[39].mxu0 }
 0x65a   : > { %v3797_v31 = vsel %vm3795_vm14, %v3790_v26, %v3796_v34 }
 0x65b   : > { %v3799_v59 = vmul.f32 %v3798_v27, %v3797_v31 }
 0x65d   : > { %v3801_v60 = vsel %vm3800_vm15, %v3799_v59, 0.0 }
 0x65e   : > { %3802 = vadd.xlane.f32.xlu0 %v3801_v60 }
 0x6eb   : > { %v3803_v40 = vpop.xlane.xlu0 %3802 }
 0x6ec   : > { %v3805_v2 = vadd.f32 %v3804_v61, %v3803_v40 }
 0x6ee   : > { %v3806_v5 = vsub.f32 0.0, %v3805_v2 }
 0x6f0   : > { %v3807_v14 = vmul.f32 1.442695, %v3806_v5 }
 0x6f2   : > { %5036 = vpow2.f32 %v3807_v14 }
 0x6fc   : > { %v5037_v29 = vpop.eup %5036 }
 0x6fd   : > { %v3809_v10 = vadd.f32 1.0, %v5037_v29 }
 0x6ff   : > { %5038 = vrcp.f32 %v3809_v10 }
 0x709   : > { %v5039_v41 = vpop.eup %5038 }
 0x70a   : > { %3813 = vst.msk [vmem:[%s452_s30] sm:$0x1] %vm3812_vm0, %v5039_v41 }
 0x70b PF: > { %s26_s27 = sadd.s32 1, %s5071_s27  }
 0x70c   : > { %p23_p1 = scmp.ge.s32.totalorder %s26_s27, 4  }
 0x70e   :  { %25 = sbr.rel (!%p23_p1) target bundleno = 4 (0x4), region = 131 }
 0x715   :  { %3831 = vsyncpa [#allocation8], 1 }
 0x716   :  { %3833 = vsyncpa [#allocation8 + $0x1], 1 }

</bundles_post_ra>
